<compile_context>
chip_gen: v5e
topology: v5e:2x2
jax: 0.10.0
libtpu: 0.0.40
codegen_flags: <defaults>
</compile_context>

<pallas_src>
import functools
import math

import jax
import jax.numpy as jnp
from jax.experimental import pallas as pl
from jax.experimental.pallas import tpu as pltpu


def _encoder_kernel(x_ref,
                    g1_ref, b1_ref,
                    wqkv_ref, bqkv_ref,
                    wo_ref, bo_ref,
                    g2_ref, b2_ref,
                    w1_ref, bf1_ref,
                    w2_ref, bf2_ref,
                    o_ref,
                    *, embed_dim, num_heads, seq_len, block_batch):
    head_dim = embed_dim // num_heads
    eps = 1e-5
    m_rows = block_batch * seq_len
    f32, bf16 = jnp.float32, jnp.bfloat16

    # Fold the Bt sequences of this grid step into the matmul M dimension.
    x = x_ref[...].reshape(m_rows, embed_dim)                     # (Bt*S, E) f32

    def layer_norm(v, g, b):                                      # f32 math
        mu = jnp.mean(v, axis=-1, keepdims=True)
        var = jnp.mean((v - mu) ** 2, axis=-1, keepdims=True)
        return (v - mu) * jax.lax.rsqrt(var + eps) * g + b

    # --- pre-norm 1 + multi-head self-attention ------------------------------
    x1 = layer_norm(x, g1_ref[0], b1_ref[0])

    # One fused QKV projection, bf16 operands -> f32 accumulation, M = Bt*S.
    # 1/sqrt(head_dim) is already folded into the Q columns of wqkv/bqkv.
    qkv = jnp.dot(x1.astype(bf16), wqkv_ref[...],
                  preferred_element_type=f32) + bqkv_ref[0]
    # Cast to bf16 right away (halves the largest live activation; it is the
    # MXU operand dtype anyway) and expose the batch axis for batched einsums.
    qkv = qkv.astype(bf16).reshape(block_batch, seq_len, 3 * embed_dim)

    # Per-head attention, accumulating each head's contribution directly into
    # the output projection: attn += oh_h @ Wo[h*hd:(h+1)*hd, :].  No per-head
    # list and no lane-axis concatenate; only the single f32 accumulator stays
    # live across heads.
    # TODO(synk): a fully head-batched (Bt*H, S, hd) einsum would replace the H
    # small matmuls with one large one, but needs an (S,H)-swapping relayout
    # that Mosaic does not lower reliably for hd < 128; revisit with einshape.
    attn = jnp.zeros((m_rows, embed_dim), dtype=f32)
    for h in range(num_heads):
        lo = h * head_dim
        qh = qkv[:, :, lo:lo + head_dim]                           # (Bt,S,hd) bf16
        kh = qkv[:, :, embed_dim + lo:embed_dim + lo + head_dim]
        vh = qkv[:, :, 2 * embed_dim + lo:2 * embed_dim + lo + head_dim]
        # Batched over the Bt sequences; contracts last dim (no explicit k.T).
        s = jnp.einsum('bqd,bkd->bqk', qh, kh,
                       preferred_element_type=f32)                 # (Bt,S,S) f32
        s = s - jnp.max(s, axis=-1, keepdims=True)
        p = jnp.exp(s)
        p = p * pl.reciprocal(jnp.sum(p, axis=-1, keepdims=True), approx=True)
        # TODO(synk): attention-weight dropout (p=0.1) skipped -> eval mode.
        oh = jnp.einsum('bqk,bkd->bqd', p.astype(bf16), vh,
                        preferred_element_type=f32)                # (Bt,S,hd)
        attn += jnp.dot(oh.reshape(m_rows, head_dim).astype(bf16),
                        wo_ref[lo:lo + head_dim, :],               # static sublane slice
                        preferred_element_type=f32)
    x = x + attn + bo_ref[0]                                       # residual 1

    # --- pre-norm 2 + feed-forward --------------------------------------------
    x2 = layer_norm(x, g2_ref[0], b2_ref[0])
    hdn = jnp.dot(x2.astype(bf16), w1_ref[...],
                  preferred_element_type=f32) + bf1_ref[0]
    hdn = jnp.maximum(hdn, 0.0).astype(bf16)      # ReLU output kept bf16
    ff = jnp.dot(hdn, w2_ref[...], preferred_element_type=f32) + bf2_ref[0]
    # TODO(synk): FFN-output dropout (p=0.1) skipped -> eval mode.

    # TODO(synk): for production E not a multiple of 128, present a lane-dense
    # output slab wrapper-side to avoid masked vst on this store.
    o_ref[...] = (x + ff).reshape(block_batch, seq_len, embed_dim).astype(o_ref.dtype)


# ----------------------------- sizing helpers --------------------------------

def _multi_tensorcore():
    """True only on parts where the grid is shared by >1 TensorCore
    (v4/v5p megacore, v7x); v2/v3/v5e/v6e devices expose a single TC."""
    try:
        kind = jax.devices()[0].device_kind.lower()
    except Exception:
        return False
    single_tc = any(t in kind for t in ("lite", "v5e", "v6e", "v2", "v3"))
    return not single_tc


def _vmem_budget_bytes():
    try:
        cap = int(pltpu.get_tpu_info().vmem_capacity_bytes)
    except Exception:
        cap = 128 * 1024 * 1024
    # Leave ~1/4 headroom for compiler-internal scratch / spills:
    # 48 MiB on v7x (64 MiB physical), 96 MiB on v5e/v6e (128 MiB).
    return (cap * 3) // 4


def _step_vmem_bytes(block_batch, seq_len, embed_dim, ff_dim, weight_buffers):
    m = block_batch * seq_len
    bf16, f32 = 2, 4
    weights = (3 * embed_dim * embed_dim + embed_dim * embed_dim
               + 2 * embed_dim * ff_dim) * bf16 * weight_buffers
    io = m * embed_dim * f32 * 2 * 2                       # x in + out, double buffered
    acts = (m * 3 * embed_dim * (f32 + bf16)               # qkv f32 + bf16 copy
            + m * ff_dim * (f32 + bf16)                    # FFN hidden
            + 4 * m * embed_dim * f32                      # x, x1/x2, attn, ff
            + block_batch * seq_len * seq_len * f32 * 2)   # one head's s / p
    return weights + io + acts


def _choose_block_batch(batch, seq_len, embed_dim, ff_dim, *, multi_tc,
                        vmem_budget_bytes, weight_buffers=1):
    """Largest batch tile (divisor of B) whose working set fits the VMEM
    budget: big tiles amortize the ~0.35us/step pipeline cost and keep
    M = Bt*S at/above the 256-wide MXU whenever the batch allows.  Only on
    multi-TensorCore parts do we force >= 2 grid steps so both cores work."""
    divisors = [d for d in range(1, batch + 1) if batch % d == 0]
    fits = [d for d in divisors
            if _step_vmem_bytes(d, seq_len, embed_dim, ff_dim,
                                weight_buffers) <= vmem_budget_bytes]
    if not fits:
        fits = [1]
    bt = max(fits)
    if multi_tc and batch // bt < 2:
        smaller = [d for d in fits if batch // d >= 2]
        if smaller:
            bt = max(smaller)
    return bt


# --------------------------------- wrapper ------------------------------------

def transformer_encoder_block(x, params, *, num_heads, block_batch=None,
                              single_buffer_weights=True):
    B, S, E = x.shape
    assert E % num_heads == 0, (E, num_heads)
    head_dim = E // num_heads
    ff_dim = params["w1"].shape[0]

    multi_tc = _multi_tensorcore()
    vmem_budget = _vmem_budget_bytes()
    if block_batch is None:
        block_batch = _choose_block_batch(
            B, S, E, ff_dim, multi_tc=multi_tc, vmem_budget_bytes=vmem_budget,
            weight_buffers=1 if single_buffer_weights else 2)
    assert B % block_batch == 0, (B, block_batch)

    # PyTorch Linear computes x @ W.T + b: pre-transpose once and store bf16
    # (native MXU fast path, half the VMEM/DMA bytes).  Fold the attention
    # scale 1/sqrt(head_dim) into the Q columns of the fused QKV projection
    # (one-time constant preprocessing, removes an in-kernel VPU multiply).
    scale = jnp.concatenate([
        jnp.full((E,), 1.0 / math.sqrt(head_dim), jnp.float32),
        jnp.ones((2 * E,), jnp.float32)])
    wqkv_t = (params["in_proj_weight"].T * scale[None, :]).astype(jnp.bfloat16)
    bqkv = (params["in_proj_bias"].astype(jnp.float32) * scale)
    wo_t = params["out_proj_weight"].T.astype(jnp.bfloat16)        # (E, E)
    w1_t = params["w1"].T.astype(jnp.bfloat16)                     # (E, ff)
    w2_t = params["w2"].T.astype(jnp.bfloat16)                     # (ff, E)

    def row(v):  # 1-D params as (1, n) f32 rows for 2-D VMEM layout
        return v.reshape(1, -1).astype(jnp.float32)

    kernel = functools.partial(_encoder_kernel, embed_dim=E, num_heads=num_heads,
                               seq_len=S, block_batch=block_batch)

    def call(single_buffer):
        def const(shape, big=False):
            idx = lambda b: (0,) * len(shape)
            if big and single_buffer:
                # Constant-index weight blocks are DMA'd once; a single buffer
                # halves their resident VMEM (matters on v7x's 64 MiB VMEM).
                return pl.BlockSpec(shape, idx, pipeline_mode=pl.Buffered(1))
            return pl.BlockSpec(shape, idx)

        # TODO(synk): at very large ff_dim, tile the FFN weights with an inner
        # pltpu.emit_pipeline over ff instead of keeping w1/w2 fully resident.
        return pl.pallas_call(
            kernel,
            out_shape=jax.ShapeDtypeStruct((B, S, E), x.dtype),
            grid=(B // block_batch,),
            in_specs=[
                pl.BlockSpec((block_batch, S, E), lambda b: (b, 0, 0)),   # x
                const((1, E)), const((1, E)),                             # ln1 g/b
                const((E, 3 * E), big=True), const((1, 3 * E)),           # qkv proj
                const((E, E), big=True), const((1, E)),                   # out proj
                const((1, E)), const((1, E)),                             # ln2 g/b
                const((E, ff_dim), big=True), const((1, ff_dim)),         # ff linear 1
                const((ff_dim, E), big=True), const((1, E)),              # ff linear 2
            ],
            out_specs=pl.BlockSpec((block_batch, S, E), lambda b: (b, 0, 0)),
            compiler_params=pltpu.CompilerParams(
                dimension_semantics=("parallel",),
                vmem_limit_bytes=vmem_budget),
        )(x,
          row(params["ln1_g"]), row(params["ln1_b"]),
          wqkv_t, row(bqkv),
          wo_t, row(params["out_proj_bias"]),
          row(params["ln2_g"]), row(params["ln2_b"]),
          w1_t, row(params["b1"]),
          w2_t, row(params["b2"]))

    if single_buffer_weights:
        try:
            return call(True)
        except Exception:
            # pipeline_mode support varies across jax versions; fall back to
            # default double-buffered weights rather than failing outright.
            pass
    return call(False)


# --------------------------- pure-JAX reference --------------------------------

def reference_forward(x, params, *, num_heads):
    """Pure-JAX f32 reference mirroring PyTorch semantics (eval mode)."""
    E = x.shape[-1]
    hd = E // num_heads
    eps = 1e-5

    def ln(v, g, b):
        mu = jnp.mean(v, axis=-1, keepdims=True)
        var = jnp.mean((v - mu) ** 2, axis=-1, keepdims=True)
        return (v - mu) / jnp.sqrt(var + eps) * g + b

    x1 = ln(x, params["ln1_g"], params["ln1_b"])
    qkv = x1 @ params["in_proj_weight"].T + params["in_proj_bias"]
    q, k, v = jnp.split(qkv, 3, axis=-1)

    def split_heads(t):  # (B,S,E) -> (B,H,S,hd)
        B, S, _ = t.shape
        return t.reshape(B, S, num_heads, hd).transpose(0, 2, 1, 3)

    qh, kh, vh = split_heads(q), split_heads(k), split_heads(v)
    s = jnp.einsum("bhqd,bhkd->bhqk", qh, kh) / math.sqrt(hd)
    p = jax.nn.softmax(s, axis=-1)
    o = jnp.einsum("bhqk,bhkd->bhqd", p, vh)
    o = o.transpose(0, 2, 1, 3).reshape(x.shape)
    attn = o @ params["out_proj_weight"].T + params["out_proj_bias"]

    x = x + attn
    x2 = ln(x, params["ln2_g"], params["ln2_b"])
    h = jnp.maximum(x2 @ params["w1"].T + params["b1"], 0.0)
    ff = h @ params["w2"].T + params["b2"]
    return x + ff


if __name__ == "__main__":
    B, S, E = 8, 8, 32
    NUM_HEADS = 4
    FF_DIM = 128

    key = jax.random.PRNGKey(0)
    ks = jax.random.split(key, 9)

    params = {
        "ln1_g": jnp.ones((E,), jnp.float32),
        "ln1_b": jnp.zeros((E,), jnp.float32),
        "in_proj_weight": 0.05 * jax.random.normal(ks[0], (3 * E, E), jnp.float32),
        "in_proj_bias": 0.01 * jax.random.normal(ks[1], (3 * E,), jnp.float32),
        "out_proj_weight": 0.05 * jax.random.normal(ks[2], (E, E), jnp.float32),
        "out_proj_bias": 0.01 * jax.random.normal(ks[3], (E,), jnp.float32),
        "ln2_g": jnp.ones((E,), jnp.float32),
        "ln2_b": jnp.zeros((E,), jnp.float32),
        "w1": 0.05 * jax.random.normal(ks[4], (FF_DIM, E), jnp.float32),
        "b1": 0.01 * jax.random.normal(ks[5], (FF_DIM,), jnp.float32),
        "w2": 0.05 * jax.random.normal(ks[6], (E, FF_DIM), jnp.float32),
        "b2": 0.01 * jax.random.normal(ks[7], (E,), jnp.float32),
    }

    x = jax.random.normal(ks[8], (B, S, E), jnp.float32)

    out = transformer_encoder_block(x, params, num_heads=NUM_HEADS)
    out = jax.block_until_ready(out)

    ref = reference_forward(x, params, num_heads=NUM_HEADS)
    assert out.shape == (B, S, E)
    # bf16 matmul operands + approx-reciprocal softmax -> loosened tolerance.
    assert jnp.allclose(out, ref, rtol=2e-2, atol=2e-2), (
        f"max abs err {jnp.max(jnp.abs(out - ref))}")

    print("KERNEL_OK")
</pallas_src>

<mosaic_0001>
module attributes {stable_mosaic.version = 11 : i64} {
  func.func @_encoder_kernel(%arg0: i32, %arg1: memref<4x8x32xf32, #tpu.memory_space<vmem>>, %arg2: memref<1x32xf32, #tpu.memory_space<vmem>>, %arg3: memref<1x32xf32, #tpu.memory_space<vmem>>, %arg4: memref<32x96xbf16, #tpu.memory_space<vmem>>, %arg5: memref<1x96xf32, #tpu.memory_space<vmem>>, %arg6: memref<32x32xbf16, #tpu.memory_space<vmem>>, %arg7: memref<1x32xf32, #tpu.memory_space<vmem>>, %arg8: memref<1x32xf32, #tpu.memory_space<vmem>>, %arg9: memref<1x32xf32, #tpu.memory_space<vmem>>, %arg10: memref<32x128xbf16, #tpu.memory_space<vmem>>, %arg11: memref<1x128xf32, #tpu.memory_space<vmem>>, %arg12: memref<128x32xbf16, #tpu.memory_space<vmem>>, %arg13: memref<1x32xf32, #tpu.memory_space<vmem>>, %arg14: memref<4x8x32xf32, #tpu.memory_space<vmem>>) attributes {dimension_semantics = [#tpu.dimension_semantics<parallel>], iteration_bounds = array<i64: 2>, scalar_prefetch = 0 : i64, scratch_operands = 0 : i64, tpu.core_type = #tpu.core_type<tc>, window_params = [{transform_indices = @transform_0, window_bounds = array<i64: 4, 8, 32>}, {pipeline_mode = #tpu.pipeline_mode<synchronous>, transform_indices = @transform_1, window_bounds = array<i64: 1, 32>}, {pipeline_mode = #tpu.pipeline_mode<synchronous>, transform_indices = @transform_2, window_bounds = array<i64: 1, 32>}, {pipeline_mode = #tpu.pipeline_mode<synchronous>, transform_indices = @transform_3, window_bounds = array<i64: 32, 96>}, {pipeline_mode = #tpu.pipeline_mode<synchronous>, transform_indices = @transform_4, window_bounds = array<i64: 1, 96>}, {pipeline_mode = #tpu.pipeline_mode<synchronous>, transform_indices = @transform_5, window_bounds = array<i64: 32, 32>}, {pipeline_mode = #tpu.pipeline_mode<synchronous>, transform_indices = @transform_6, window_bounds = array<i64: 1, 32>}, {pipeline_mode = #tpu.pipeline_mode<synchronous>, transform_indices = @transform_7, window_bounds = array<i64: 1, 32>}, {pipeline_mode = #tpu.pipeline_mode<synchronous>, transform_indices = @transform_8, window_bounds = array<i64: 1, 32>}, {pipeline_mode = #tpu.pipeline_mode<synchronous>, transform_indices = @transform_9, window_bounds = array<i64: 32, 128>}, {pipeline_mode = #tpu.pipeline_mode<synchronous>, transform_indices = @transform_10, window_bounds = array<i64: 1, 128>}, {pipeline_mode = #tpu.pipeline_mode<synchronous>, transform_indices = @transform_11, window_bounds = array<i64: 128, 32>}, {pipeline_mode = #tpu.pipeline_mode<synchronous>, transform_indices = @transform_12, window_bounds = array<i64: 1, 32>}, {transform_indices = @transform_13, window_bounds = array<i64: 4, 8, 32>}]} {
    %c0 = arith.constant 0 : index
    %c0_0 = arith.constant 0 : index
    %c0_1 = arith.constant 0 : index
    %0 = vector.load %arg1[%c0, %c0_0, %c0_1] : memref<4x8x32xf32, #tpu.memory_space<vmem>>, vector<4x8x32xf32>
    %1 = vector.shape_cast %0 : vector<4x8x32xf32> to vector<32x32xf32>
    %c0_2 = arith.constant 0 : index
    %c0_3 = arith.constant 0 : index
    %2 = vector.load %arg2[%c0_2, %c0_3] : memref<1x32xf32, #tpu.memory_space<vmem>>, vector<1x32xf32>
    %3 = vector.shape_cast %2 : vector<1x32xf32> to vector<32xf32>
    %c0_4 = arith.constant 0 : index
    %c0_5 = arith.constant 0 : index
    %4 = vector.load %arg3[%c0_4, %c0_5] : memref<1x32xf32, #tpu.memory_space<vmem>>, vector<1x32xf32>
    %5 = vector.shape_cast %4 : vector<1x32xf32> to vector<32xf32>
    %cst = arith.constant dense<0.000000e+00> : vector<32xf32>
    %6 = vector.multi_reduction <add>, %1, %cst [1] : vector<32x32xf32> to vector<32xf32>
    %7 = vector.shape_cast %6 : vector<32xf32> to vector<32x1xf32>
    %cst_6 = arith.constant 3.200000e+01 : f32
    %8 = vector.broadcast %cst_6 : f32 to vector<32x1xf32>
    %9 = arith.divf %7, %8 : vector<32x1xf32>
    %10 = vector.broadcast %9 : vector<32x1xf32> to vector<32x32xf32>
    %11 = arith.subf %1, %10 : vector<32x32xf32>
    %12 = arith.mulf %11, %11 : vector<32x32xf32>
    %cst_7 = arith.constant dense<0.000000e+00> : vector<32xf32>
    %13 = vector.multi_reduction <add>, %12, %cst_7 [1] : vector<32x32xf32> to vector<32xf32>
    %14 = vector.shape_cast %13 : vector<32xf32> to vector<32x1xf32>
    %cst_8 = arith.constant 3.200000e+01 : f32
    %15 = vector.broadcast %cst_8 : f32 to vector<32x1xf32>
    %16 = arith.divf %14, %15 : vector<32x1xf32>
    %17 = vector.broadcast %9 : vector<32x1xf32> to vector<32x32xf32>
    %18 = arith.subf %1, %17 : vector<32x32xf32>
    %cst_9 = arith.constant 9.99999974E-6 : f32
    %19 = vector.broadcast %cst_9 : f32 to vector<32x1xf32>
    %20 = arith.addf %16, %19 : vector<32x1xf32>
    %21 = math.rsqrt %20 : vector<32x1xf32>
    %22 = vector.broadcast %21 : vector<32x1xf32> to vector<32x32xf32>
    %23 = arith.mulf %18, %22 : vector<32x32xf32>
    %24 = vector.shape_cast %3 : vector<32xf32> to vector<1x32xf32>
    %25 = vector.broadcast %24 : vector<1x32xf32> to vector<32x32xf32>
    %26 = arith.mulf %23, %25 : vector<32x32xf32>
    %27 = vector.shape_cast %5 : vector<32xf32> to vector<1x32xf32>
    %28 = vector.broadcast %27 : vector<1x32xf32> to vector<32x32xf32>
    %29 = arith.addf %26, %28 : vector<32x32xf32>
    %30 = arith.truncf %29 : vector<32x32xf32> to vector<32x32xbf16>
    %c0_10 = arith.constant 0 : index
    %c0_11 = arith.constant 0 : index
    %31 = vector.load %arg4[%c0_10, %c0_11] : memref<32x96xbf16, #tpu.memory_space<vmem>>, vector<32x96xbf16>
    %cst_12 = arith.constant dense<0.000000e+00> : vector<32x96xf32>
    %32 = tpu.matmul %30, %31, %cst_12 {dimension_numbers = #tpu.dot_dimension_numbers<[1], [0], [0], [1], [0, 0, 1, 1], [], []>} : vector<32x32xbf16>, vector<32x96xbf16>, vector<32x96xf32> -> vector<32x96xf32>
    %c0_13 = arith.constant 0 : index
    %c0_14 = arith.constant 0 : index
    %33 = vector.load %arg5[%c0_13, %c0_14] : memref<1x96xf32, #tpu.memory_space<vmem>>, vector<1x96xf32>
    %34 = vector.shape_cast %33 : vector<1x96xf32> to vector<96xf32>
    %35 = vector.shape_cast %34 : vector<96xf32> to vector<1x96xf32>
    %36 = vector.broadcast %35 : vector<1x96xf32> to vector<32x96xf32>
    %37 = arith.addf %32, %36 : vector<32x96xf32>
    %38 = arith.truncf %37 : vector<32x96xf32> to vector<32x96xbf16>
    %39 = vector.shape_cast %38 : vector<32x96xbf16> to vector<4x8x96xbf16>
    %cst_15 = arith.constant 0.000000e+00 : f32
    %40 = vector.broadcast %cst_15 : f32 to vector<32x32xf32>
    %41 = vector.extract_strided_slice %39 {offsets = [0, 0, 0], sizes = [4, 8, 8], strides = [1, 1, 1]} : vector<4x8x96xbf16> to vector<4x8x8xbf16>
    %42 = vector.extract_strided_slice %39 {offsets = [0, 0, 32], sizes = [4, 8, 8], strides = [1, 1, 1]} : vector<4x8x96xbf16> to vector<4x8x8xbf16>
    %43 = vector.extract_strided_slice %39 {offsets = [0, 0, 64], sizes = [4, 8, 8], strides = [1, 1, 1]} : vector<4x8x96xbf16> to vector<4x8x8xbf16>
    "tpu.trace_start"() <{level = 10 : i32, message = "bqd,bkd->bqk"}> : () -> ()
    %cst_16 = arith.constant dense<0.000000e+00> : vector<4x8x8xf32>
    %44 = tpu.matmul %41, %42, %cst_16 {dimension_numbers = #tpu.dot_dimension_numbers<[2], [2], [1], [1], [0, 0, 0, 1, 1, 1], [0], [0]>} : vector<4x8x8xbf16>, vector<4x8x8xbf16>, vector<4x8x8xf32> -> vector<4x8x8xf32>
    "tpu.trace_stop"() : () -> ()
    %cst_17 = arith.constant dense<0xFF800000> : vector<4x8xf32>
    %45 = vector.multi_reduction <maximumf>, %44, %cst_17 [2] : vector<4x8x8xf32> to vector<4x8xf32>
    %46 = vector.shape_cast %45 : vector<4x8xf32> to vector<4x8x1xf32>
    %47 = vector.broadcast %46 : vector<4x8x1xf32> to vector<4x8x8xf32>
    %48 = arith.subf %44, %47 : vector<4x8x8xf32>
    %49 = math.exp %48 : vector<4x8x8xf32>
    %cst_18 = arith.constant dense<0.000000e+00> : vector<4x8xf32>
    %50 = vector.multi_reduction <add>, %49, %cst_18 [2] : vector<4x8x8xf32> to vector<4x8xf32>
    %51 = vector.shape_cast %50 : vector<4x8xf32> to vector<4x8x1xf32>
    %52 = tpu.reciprocal %51 {approx = true} : vector<4x8x1xf32> -> vector<4x8x1xf32>
    %53 = vector.broadcast %52 : vector<4x8x1xf32> to vector<4x8x8xf32>
    %54 = arith.mulf %49, %53 : vector<4x8x8xf32>
    %55 = arith.truncf %54 : vector<4x8x8xf32> to vector<4x8x8xbf16>
    "tpu.trace_start"() <{level = 10 : i32, message = "bqk,bkd->bqd"}> : () -> ()
    %cst_19 = arith.constant dense<0.000000e+00> : vector<4x8x8xf32>
    %56 = tpu.matmul %55, %43, %cst_19 {dimension_numbers = #tpu.dot_dimension_numbers<[2], [1], [1], [2], [0, 0, 0, 1, 1, 2], [0], [0]>} : vector<4x8x8xbf16>, vector<4x8x8xbf16>, vector<4x8x8xf32> -> vector<4x8x8xf32>
    "tpu.trace_stop"() : () -> ()
    %57 = vector.shape_cast %56 : vector<4x8x8xf32> to vector<32x8xf32>
    %58 = arith.truncf %57 : vector<32x8xf32> to vector<32x8xbf16>
    %c0_20 = arith.constant 0 : index
    %c0_21 = arith.constant 0 : index
    %59 = vector.load %arg6[%c0_20, %c0_21] : memref<32x32xbf16, #tpu.memory_space<vmem>>, vector<8x32xbf16>
    %cst_22 = arith.constant dense<0.000000e+00> : vector<32x32xf32>
    %60 = tpu.matmul %58, %59, %cst_22 {dimension_numbers = #tpu.dot_dimension_numbers<[1], [0], [0], [1], [0, 0, 1, 1], [], []>} : vector<32x8xbf16>, vector<8x32xbf16>, vector<32x32xf32> -> vector<32x32xf32>
    %61 = arith.addf %40, %60 : vector<32x32xf32>
    %62 = vector.extract_strided_slice %39 {offsets = [0, 0, 8], sizes = [4, 8, 8], strides = [1, 1, 1]} : vector<4x8x96xbf16> to vector<4x8x8xbf16>
    %63 = vector.extract_strided_slice %39 {offsets = [0, 0, 40], sizes = [4, 8, 8], strides = [1, 1, 1]} : vector<4x8x96xbf16> to vector<4x8x8xbf16>
    %64 = vector.extract_strided_slice %39 {offsets = [0, 0, 72], sizes = [4, 8, 8], strides = [1, 1, 1]} : vector<4x8x96xbf16> to vector<4x8x8xbf16>
    "tpu.trace_start"() <{level = 10 : i32, message = "bqd,bkd->bqk"}> : () -> ()
    %cst_23 = arith.constant dense<0.000000e+00> : vector<4x8x8xf32>
    %65 = tpu.matmul %62, %63, %cst_23 {dimension_numbers = #tpu.dot_dimension_numbers<[2], [2], [1], [1], [0, 0, 0, 1, 1, 1], [0], [0]>} : vector<4x8x8xbf16>, vector<4x8x8xbf16>, vector<4x8x8xf32> -> vector<4x8x8xf32>
    "tpu.trace_stop"() : () -> ()
    %cst_24 = arith.constant dense<0xFF800000> : vector<4x8xf32>
    %66 = vector.multi_reduction <maximumf>, %65, %cst_24 [2] : vector<4x8x8xf32> to vector<4x8xf32>
    %67 = vector.shape_cast %66 : vector<4x8xf32> to vector<4x8x1xf32>
    %68 = vector.broadcast %67 : vector<4x8x1xf32> to vector<4x8x8xf32>
    %69 = arith.subf %65, %68 : vector<4x8x8xf32>
    %70 = math.exp %69 : vector<4x8x8xf32>
    %cst_25 = arith.constant dense<0.000000e+00> : vector<4x8xf32>
    %71 = vector.multi_reduction <add>, %70, %cst_25 [2] : vector<4x8x8xf32> to vector<4x8xf32>
    %72 = vector.shape_cast %71 : vector<4x8xf32> to vector<4x8x1xf32>
    %73 = tpu.reciprocal %72 {approx = true} : vector<4x8x1xf32> -> vector<4x8x1xf32>
    %74 = vector.broadcast %73 : vector<4x8x1xf32> to vector<4x8x8xf32>
    %75 = arith.mulf %70, %74 : vector<4x8x8xf32>
    %76 = arith.truncf %75 : vector<4x8x8xf32> to vector<4x8x8xbf16>
    "tpu.trace_start"() <{level = 10 : i32, message = "bqk,bkd->bqd"}> : () -> ()
    %cst_26 = arith.constant dense<0.000000e+00> : vector<4x8x8xf32>
    %77 = tpu.matmul %76, %64, %cst_26 {dimension_numbers = #tpu.dot_dimension_numbers<[2], [1], [1], [2], [0, 0, 0, 1, 1, 2], [0], [0]>} : vector<4x8x8xbf16>, vector<4x8x8xbf16>, vector<4x8x8xf32> -> vector<4x8x8xf32>
    "tpu.trace_stop"() : () -> ()
    %78 = vector.shape_cast %77 : vector<4x8x8xf32> to vector<32x8xf32>
    %79 = arith.truncf %78 : vector<32x8xf32> to vector<32x8xbf16>
    %c8 = arith.constant 8 : index
    %c0_27 = arith.constant 0 : index
    %80 = vector.load %arg6[%c8, %c0_27] : memref<32x32xbf16, #tpu.memory_space<vmem>>, vector<8x32xbf16>
    %cst_28 = arith.constant dense<0.000000e+00> : vector<32x32xf32>
    %81 = tpu.matmul %79, %80, %cst_28 {dimension_numbers = #tpu.dot_dimension_numbers<[1], [0], [0], [1], [0, 0, 1, 1], [], []>} : vector<32x8xbf16>, vector<8x32xbf16>, vector<32x32xf32> -> vector<32x32xf32>
    %82 = arith.addf %61, %81 : vector<32x32xf32>
    %83 = vector.extract_strided_slice %39 {offsets = [0, 0, 16], sizes = [4, 8, 8], strides = [1, 1, 1]} : vector<4x8x96xbf16> to vector<4x8x8xbf16>
    %84 = vector.extract_strided_slice %39 {offsets = [0, 0, 48], sizes = [4, 8, 8], strides = [1, 1, 1]} : vector<4x8x96xbf16> to vector<4x8x8xbf16>
    %85 = vector.extract_strided_slice %39 {offsets = [0, 0, 80], sizes = [4, 8, 8], strides = [1, 1, 1]} : vector<4x8x96xbf16> to vector<4x8x8xbf16>
    "tpu.trace_start"() <{level = 10 : i32, message = "bqd,bkd->bqk"}> : () -> ()
    %cst_29 = arith.constant dense<0.000000e+00> : vector<4x8x8xf32>
    %86 = tpu.matmul %83, %84, %cst_29 {dimension_numbers = #tpu.dot_dimension_numbers<[2], [2], [1], [1], [0, 0, 0, 1, 1, 1], [0], [0]>} : vector<4x8x8xbf16>, vector<4x8x8xbf16>, vector<4x8x8xf32> -> vector<4x8x8xf32>
    "tpu.trace_stop"() : () -> ()
    %cst_30 = arith.constant dense<0xFF800000> : vector<4x8xf32>
    %87 = vector.multi_reduction <maximumf>, %86, %cst_30 [2] : vector<4x8x8xf32> to vector<4x8xf32>
    %88 = vector.shape_cast %87 : vector<4x8xf32> to vector<4x8x1xf32>
    %89 = vector.broadcast %88 : vector<4x8x1xf32> to vector<4x8x8xf32>
    %90 = arith.subf %86, %89 : vector<4x8x8xf32>
    %91 = math.exp %90 : vector<4x8x8xf32>
    %cst_31 = arith.constant dense<0.000000e+00> : vector<4x8xf32>
    %92 = vector.multi_reduction <add>, %91, %cst_31 [2] : vector<4x8x8xf32> to vector<4x8xf32>
    %93 = vector.shape_cast %92 : vector<4x8xf32> to vector<4x8x1xf32>
    %94 = tpu.reciprocal %93 {approx = true} : vector<4x8x1xf32> -> vector<4x8x1xf32>
    %95 = vector.broadcast %94 : vector<4x8x1xf32> to vector<4x8x8xf32>
    %96 = arith.mulf %91, %95 : vector<4x8x8xf32>
    %97 = arith.truncf %96 : vector<4x8x8xf32> to vector<4x8x8xbf16>
    "tpu.trace_start"() <{level = 10 : i32, message = "bqk,bkd->bqd"}> : () -> ()
    %cst_32 = arith.constant dense<0.000000e+00> : vector<4x8x8xf32>
    %98 = tpu.matmul %97, %85, %cst_32 {dimension_numbers = #tpu.dot_dimension_numbers<[2], [1], [1], [2], [0, 0, 0, 1, 1, 2], [0], [0]>} : vector<4x8x8xbf16>, vector<4x8x8xbf16>, vector<4x8x8xf32> -> vector<4x8x8xf32>
    "tpu.trace_stop"() : () -> ()
    %99 = vector.shape_cast %98 : vector<4x8x8xf32> to vector<32x8xf32>
    %100 = arith.truncf %99 : vector<32x8xf32> to vector<32x8xbf16>
    %c16 = arith.constant 16 : index
    %c0_33 = arith.constant 0 : index
    %101 = vector.load %arg6[%c16, %c0_33] : memref<32x32xbf16, #tpu.memory_space<vmem>>, vector<8x32xbf16>
    %cst_34 = arith.constant dense<0.000000e+00> : vector<32x32xf32>
    %102 = tpu.matmul %100, %101, %cst_34 {dimension_numbers = #tpu.dot_dimension_numbers<[1], [0], [0], [1], [0, 0, 1, 1], [], []>} : vector<32x8xbf16>, vector<8x32xbf16>, vector<32x32xf32> -> vector<32x32xf32>
    %103 = arith.addf %82, %102 : vector<32x32xf32>
    %104 = vector.extract_strided_slice %39 {offsets = [0, 0, 24], sizes = [4, 8, 8], strides = [1, 1, 1]} : vector<4x8x96xbf16> to vector<4x8x8xbf16>
    %105 = vector.extract_strided_slice %39 {offsets = [0, 0, 56], sizes = [4, 8, 8], strides = [1, 1, 1]} : vector<4x8x96xbf16> to vector<4x8x8xbf16>
    %106 = vector.extract_strided_slice %39 {offsets = [0, 0, 88], sizes = [4, 8, 8], strides = [1, 1, 1]} : vector<4x8x96xbf16> to vector<4x8x8xbf16>
    "tpu.trace_start"() <{level = 10 : i32, message = "bqd,bkd->bqk"}> : () -> ()
    %cst_35 = arith.constant dense<0.000000e+00> : vector<4x8x8xf32>
    %107 = tpu.matmul %104, %105, %cst_35 {dimension_numbers = #tpu.dot_dimension_numbers<[2], [2], [1], [1], [0, 0, 0, 1, 1, 1], [0], [0]>} : vector<4x8x8xbf16>, vector<4x8x8xbf16>, vector<4x8x8xf32> -> vector<4x8x8xf32>
    "tpu.trace_stop"() : () -> ()
    %cst_36 = arith.constant dense<0xFF800000> : vector<4x8xf32>
    %108 = vector.multi_reduction <maximumf>, %107, %cst_36 [2] : vector<4x8x8xf32> to vector<4x8xf32>
    %109 = vector.shape_cast %108 : vector<4x8xf32> to vector<4x8x1xf32>
    %110 = vector.broadcast %109 : vector<4x8x1xf32> to vector<4x8x8xf32>
    %111 = arith.subf %107, %110 : vector<4x8x8xf32>
    %112 = math.exp %111 : vector<4x8x8xf32>
    %cst_37 = arith.constant dense<0.000000e+00> : vector<4x8xf32>
    %113 = vector.multi_reduction <add>, %112, %cst_37 [2] : vector<4x8x8xf32> to vector<4x8xf32>
    %114 = vector.shape_cast %113 : vector<4x8xf32> to vector<4x8x1xf32>
    %115 = tpu.reciprocal %114 {approx = true} : vector<4x8x1xf32> -> vector<4x8x1xf32>
    %116 = vector.broadcast %115 : vector<4x8x1xf32> to vector<4x8x8xf32>
    %117 = arith.mulf %112, %116 : vector<4x8x8xf32>
    %118 = arith.truncf %117 : vector<4x8x8xf32> to vector<4x8x8xbf16>
    "tpu.trace_start"() <{level = 10 : i32, message = "bqk,bkd->bqd"}> : () -> ()
    %cst_38 = arith.constant dense<0.000000e+00> : vector<4x8x8xf32>
    %119 = tpu.matmul %118, %106, %cst_38 {dimension_numbers = #tpu.dot_dimension_numbers<[2], [1], [1], [2], [0, 0, 0, 1, 1, 2], [0], [0]>} : vector<4x8x8xbf16>, vector<4x8x8xbf16>, vector<4x8x8xf32> -> vector<4x8x8xf32>
    "tpu.trace_stop"() : () -> ()
    %120 = vector.shape_cast %119 : vector<4x8x8xf32> to vector<32x8xf32>
    %121 = arith.truncf %120 : vector<32x8xf32> to vector<32x8xbf16>
    %c24 = arith.constant 24 : index
    %c0_39 = arith.constant 0 : index
    %122 = vector.load %arg6[%c24, %c0_39] : memref<32x32xbf16, #tpu.memory_space<vmem>>, vector<8x32xbf16>
    %cst_40 = arith.constant dense<0.000000e+00> : vector<32x32xf32>
    %123 = tpu.matmul %121, %122, %cst_40 {dimension_numbers = #tpu.dot_dimension_numbers<[1], [0], [0], [1], [0, 0, 1, 1], [], []>} : vector<32x8xbf16>, vector<8x32xbf16>, vector<32x32xf32> -> vector<32x32xf32>
    %124 = arith.addf %103, %123 : vector<32x32xf32>
    %125 = arith.addf %1, %124 : vector<32x32xf32>
    %c0_41 = arith.constant 0 : index
    %c0_42 = arith.constant 0 : index
    %126 = vector.load %arg7[%c0_41, %c0_42] : memref<1x32xf32, #tpu.memory_space<vmem>>, vector<1x32xf32>
    %127 = vector.shape_cast %126 : vector<1x32xf32> to vector<32xf32>
    %128 = vector.shape_cast %127 : vector<32xf32> to vector<1x32xf32>
    %129 = vector.broadcast %128 : vector<1x32xf32> to vector<32x32xf32>
    %130 = arith.addf %125, %129 : vector<32x32xf32>
    %c0_43 = arith.constant 0 : index
    %c0_44 = arith.constant 0 : index
    %131 = vector.load %arg8[%c0_43, %c0_44] : memref<1x32xf32, #tpu.memory_space<vmem>>, vector<1x32xf32>
    %132 = vector.shape_cast %131 : vector<1x32xf32> to vector<32xf32>
    %c0_45 = arith.constant 0 : index
    %c0_46 = arith.constant 0 : index
    %133 = vector.load %arg9[%c0_45, %c0_46] : memref<1x32xf32, #tpu.memory_space<vmem>>, vector<1x32xf32>
    %134 = vector.shape_cast %133 : vector<1x32xf32> to vector<32xf32>
    %cst_47 = arith.constant dense<0.000000e+00> : vector<32xf32>
    %135 = vector.multi_reduction <add>, %130, %cst_47 [1] : vector<32x32xf32> to vector<32xf32>
    %136 = vector.shape_cast %135 : vector<32xf32> to vector<32x1xf32>
    %cst_48 = arith.constant 3.200000e+01 : f32
    %137 = vector.broadcast %cst_48 : f32 to vector<32x1xf32>
    %138 = arith.divf %136, %137 : vector<32x1xf32>
    %139 = vector.broadcast %138 : vector<32x1xf32> to vector<32x32xf32>
    %140 = arith.subf %130, %139 : vector<32x32xf32>
    %141 = arith.mulf %140, %140 : vector<32x32xf32>
    %cst_49 = arith.constant dense<0.000000e+00> : vector<32xf32>
    %142 = vector.multi_reduction <add>, %141, %cst_49 [1] : vector<32x32xf32> to vector<32xf32>
    %143 = vector.shape_cast %142 : vector<32xf32> to vector<32x1xf32>
    %cst_50 = arith.constant 3.200000e+01 : f32
    %144 = vector.broadcast %cst_50 : f32 to vector<32x1xf32>
    %145 = arith.divf %143, %144 : vector<32x1xf32>
    %146 = vector.broadcast %138 : vector<32x1xf32> to vector<32x32xf32>
    %147 = arith.subf %130, %146 : vector<32x32xf32>
    %cst_51 = arith.constant 9.99999974E-6 : f32
    %148 = vector.broadcast %cst_51 : f32 to vector<32x1xf32>
    %149 = arith.addf %145, %148 : vector<32x1xf32>
    %150 = math.rsqrt %149 : vector<32x1xf32>
    %151 = vector.broadcast %150 : vector<32x1xf32> to vector<32x32xf32>
    %152 = arith.mulf %147, %151 : vector<32x32xf32>
    %153 = vector.shape_cast %132 : vector<32xf32> to vector<1x32xf32>
    %154 = vector.broadcast %153 : vector<1x32xf32> to vector<32x32xf32>
    %155 = arith.mulf %152, %154 : vector<32x32xf32>
    %156 = vector.shape_cast %134 : vector<32xf32> to vector<1x32xf32>
    %157 = vector.broadcast %156 : vector<1x32xf32> to vector<32x32xf32>
    %158 = arith.addf %155, %157 : vector<32x32xf32>
    %159 = arith.truncf %158 : vector<32x32xf32> to vector<32x32xbf16>
    %c0_52 = arith.constant 0 : index
    %c0_53 = arith.constant 0 : index
    %160 = vector.load %arg10[%c0_52, %c0_53] : memref<32x128xbf16, #tpu.memory_space<vmem>>, vector<32x128xbf16>
    %cst_54 = arith.constant dense<0.000000e+00> : vector<32x128xf32>
    %161 = tpu.matmul %159, %160, %cst_54 {dimension_numbers = #tpu.dot_dimension_numbers<[1], [0], [0], [1], [0, 0, 1, 1], [], []>} : vector<32x32xbf16>, vector<32x128xbf16>, vector<32x128xf32> -> vector<32x128xf32>
    %c0_55 = arith.constant 0 : index
    %c0_56 = arith.constant 0 : index
    %162 = vector.load %arg11[%c0_55, %c0_56] : memref<1x128xf32, #tpu.memory_space<vmem>>, vector<1x128xf32>
    %163 = vector.shape_cast %162 : vector<1x128xf32> to vector<128xf32>
    %164 = vector.shape_cast %163 : vector<128xf32> to vector<1x128xf32>
    %165 = vector.broadcast %164 : vector<1x128xf32> to vector<32x128xf32>
    %166 = arith.addf %161, %165 : vector<32x128xf32>
    %cst_57 = arith.constant 0.000000e+00 : f32
    %167 = vector.broadcast %cst_57 : f32 to vector<32x128xf32>
    %168 = arith.maximumf %166, %167 : vector<32x128xf32>
    %169 = arith.truncf %168 : vector<32x128xf32> to vector<32x128xbf16>
    %c0_58 = arith.constant 0 : index
    %c0_59 = arith.constant 0 : index
    %170 = vector.load %arg12[%c0_58, %c0_59] : memref<128x32xbf16, #tpu.memory_space<vmem>>, vector<128x32xbf16>
    %cst_60 = arith.constant dense<0.000000e+00> : vector<32x32xf32>
    %171 = tpu.matmul %169, %170, %cst_60 {dimension_numbers = #tpu.dot_dimension_numbers<[1], [0], [0], [1], [0, 0, 1, 1], [], []>} : vector<32x128xbf16>, vector<128x32xbf16>, vector<32x32xf32> -> vector<32x32xf32>
    %c0_61 = arith.constant 0 : index
    %c0_62 = arith.constant 0 : index
    %172 = vector.load %arg13[%c0_61, %c0_62] : memref<1x32xf32, #tpu.memory_space<vmem>>, vector<1x32xf32>
    %173 = vector.shape_cast %172 : vector<1x32xf32> to vector<32xf32>
    %174 = vector.shape_cast %173 : vector<32xf32> to vector<1x32xf32>
    %175 = vector.broadcast %174 : vector<1x32xf32> to vector<32x32xf32>
    %176 = arith.addf %171, %175 : vector<32x32xf32>
    %177 = arith.addf %130, %176 : vector<32x32xf32>
    %178 = vector.shape_cast %177 : vector<32x32xf32> to vector<4x8x32xf32>
    %c0_63 = arith.constant 0 : index
    %c0_64 = arith.constant 0 : index
    %c0_65 = arith.constant 0 : index
    %179 = vector.load %arg14[%c0_63, %c0_64, %c0_65] : memref<4x8x32xf32, #tpu.memory_space<vmem>>, vector<4x8x32xf32>
    tpu.vector_store %arg14[%c0_63, %c0_64, %c0_65], %178 {strides = array<i32>} : memref<4x8x32xf32, #tpu.memory_space<vmem>>, vector<4x8x32xf32>,
    return
  }
  func.func @transform_0(%arg0: i32) -> (i32, i32, i32) {
    %c0_i32 = arith.constant 0 : i32
    %c0_i32_0 = arith.constant 0 : i32
    %c0_i32_1 = arith.constant 0 : i32
    return %arg0, %c0_i32, %c0_i32_0 : i32, i32, i32
  }
  func.func @transform_1(%arg0: i32) -> (i32, i32) {
    %c0_i32 = arith.constant 0 : i32
    %c0_i32_0 = arith.constant 0 : i32
    %c0_i32_1 = arith.constant 0 : i32
    return %c0_i32, %c0_i32_0 : i32, i32
  }
  func.func @transform_2(%arg0: i32) -> (i32, i32) {
    %c0_i32 = arith.constant 0 : i32
    %c0_i32_0 = arith.constant 0 : i32
    %c0_i32_1 = arith.constant 0 : i32
    return %c0_i32, %c0_i32_0 : i32, i32
  }
  func.func @transform_3(%arg0: i32) -> (i32, i32) {
    %c0_i32 = arith.constant 0 : i32
    %c0_i32_0 = arith.constant 0 : i32
    %c0_i32_1 = arith.constant 0 : i32
    return %c0_i32, %c0_i32_0 : i32, i32
  }
  func.func @transform_4(%arg0: i32) -> (i32, i32) {
    %c0_i32 = arith.constant 0 : i32
    %c0_i32_0 = arith.constant 0 : i32
    %c0_i32_1 = arith.constant 0 : i32
    return %c0_i32, %c0_i32_0 : i32, i32
  }
  func.func @transform_5(%arg0: i32) -> (i32, i32) {
    %c0_i32 = arith.constant 0 : i32
    %c0_i32_0 = arith.constant 0 : i32
    %c0_i32_1 = arith.constant 0 : i32
    return %c0_i32, %c0_i32_0 : i32, i32
  }
  func.func @transform_6(%arg0: i32) -> (i32, i32) {
    %c0_i32 = arith.constant 0 : i32
    %c0_i32_0 = arith.constant 0 : i32
    %c0_i32_1 = arith.constant 0 : i32
    return %c0_i32, %c0_i32_0 : i32, i32
  }
  func.func @transform_7(%arg0: i32) -> (i32, i32) {
    %c0_i32 = arith.constant 0 : i32
    %c0_i32_0 = arith.constant 0 : i32
    %c0_i32_1 = arith.constant 0 : i32
    return %c0_i32, %c0_i32_0 : i32, i32
  }
  func.func @transform_8(%arg0: i32) -> (i32, i32) {
    %c0_i32 = arith.constant 0 : i32
    %c0_i32_0 = arith.constant 0 : i32
    %c0_i32_1 = arith.constant 0 : i32
    return %c0_i32, %c0_i32_0 : i32, i32
  }
  func.func @transform_9(%arg0: i32) -> (i32, i32) {
    %c0_i32 = arith.constant 0 : i32
    %c0_i32_0 = arith.constant 0 : i32
    %c0_i32_1 = arith.constant 0 : i32
    return %c0_i32, %c0_i32_0 : i32, i32
  }
  func.func @transform_10(%arg0: i32) -> (i32, i32) {
    %c0_i32 = arith.constant 0 : i32
    %c0_i32_0 = arith.constant 0 : i32
    %c0_i32_1 = arith.constant 0 : i32
    return %c0_i32, %c0_i32_0 : i32, i32
  }
  func.func @transform_11(%arg0: i32) -> (i32, i32) {
    %c0_i32 = arith.constant 0 : i32
    %c0_i32_0 = arith.constant 0 : i32
    %c0_i32_1 = arith.constant 0 : i32
    return %c0_i32, %c0_i32_0 : i32, i32
  }
  func.func @transform_12(%arg0: i32) -> (i32, i32) {
    %c0_i32 = arith.constant 0 : i32
    %c0_i32_0 = arith.constant 0 : i32
    %c0_i32_1 = arith.constant 0 : i32
    return %c0_i32, %c0_i32_0 : i32, i32
  }
  func.func @transform_13(%arg0: i32) -> (i32, i32, i32) {
    %c0_i32 = arith.constant 0 : i32
    %c0_i32_0 = arith.constant 0 : i32
    %c0_i32_1 = arith.constant 0 : i32
    return %arg0, %c0_i32, %c0_i32_0 : i32, i32, i32
  }
}

module attributes {stable_mosaic.version = 11 : i64} {
  func.func @_encoder_kernel(%arg0: i32, %arg1: memref<4x8x32xf32, #tpu.memory_space<vmem>>, %arg2: memref<1x32xf32, #tpu.memory_space<vmem>>, %arg3: memref<1x32xf32, #tpu.memory_space<vmem>>, %arg4: memref<32x96xbf16, #tpu.memory_space<vmem>>, %arg5: memref<1x96xf32, #tpu.memory_space<vmem>>, %arg6: memref<32x32xbf16, #tpu.memory_space<vmem>>, %arg7: memref<1x32xf32, #tpu.memory_space<vmem>>, %arg8: memref<1x32xf32, #tpu.memory_space<vmem>>, %arg9: memref<1x32xf32, #tpu.memory_space<vmem>>, %arg10: memref<32x128xbf16, #tpu.memory_space<vmem>>, %arg11: memref<1x128xf32, #tpu.memory_space<vmem>>, %arg12: memref<128x32xbf16, #tpu.memory_space<vmem>>, %arg13: memref<1x32xf32, #tpu.memory_space<vmem>>, %arg14: memref<4x8x32xf32, #tpu.memory_space<vmem>>) attributes {dimension_semantics = [#tpu.dimension_semantics<parallel>], iteration_bounds = array<i64: 2>, scalar_prefetch = 0 : i64, scratch_operands = 0 : i64, tpu.core_type = #tpu.core_type<tc>, window_params = [{transform_indices = @transform_0, window_bounds = array<i64: 4, 8, 32>}, {pipeline_mode = #tpu.pipeline_mode<synchronous>, transform_indices = @transform_1, window_bounds = array<i64: 1, 32>}, {pipeline_mode = #tpu.pipeline_mode<synchronous>, transform_indices = @transform_2, window_bounds = array<i64: 1, 32>}, {pipeline_mode = #tpu.pipeline_mode<synchronous>, transform_indices = @transform_3, window_bounds = array<i64: 32, 96>}, {pipeline_mode = #tpu.pipeline_mode<synchronous>, transform_indices = @transform_4, window_bounds = array<i64: 1, 96>}, {pipeline_mode = #tpu.pipeline_mode<synchronous>, transform_indices = @transform_5, window_bounds = array<i64: 32, 32>}, {pipeline_mode = #tpu.pipeline_mode<synchronous>, transform_indices = @transform_6, window_bounds = array<i64: 1, 32>}, {pipeline_mode = #tpu.pipeline_mode<synchronous>, transform_indices = @transform_7, window_bounds = array<i64: 1, 32>}, {pipeline_mode = #tpu.pipeline_mode<synchronous>, transform_indices = @transform_8, window_bounds = array<i64: 1, 32>}, {pipeline_mode = #tpu.pipeline_mode<synchronous>, transform_indices = @transform_9, window_bounds = array<i64: 32, 128>}, {pipeline_mode = #tpu.pipeline_mode<synchronous>, transform_indices = @transform_10, window_bounds = array<i64: 1, 128>}, {pipeline_mode = #tpu.pipeline_mode<synchronous>, transform_indices = @transform_11, window_bounds = array<i64: 128, 32>}, {pipeline_mode = #tpu.pipeline_mode<synchronous>, transform_indices = @transform_12, window_bounds = array<i64: 1, 32>}, {transform_indices = @transform_13, window_bounds = array<i64: 4, 8, 32>}]} {
    %c0 = arith.constant 0 : index
    %c0_0 = arith.constant 0 : index
    %c0_1 = arith.constant 0 : index
    %0 = vector.load %arg1[%c0, %c0_0, %c0_1] : memref<4x8x32xf32, #tpu.memory_space<vmem>>, vector<4x8x32xf32>
    %1 = vector.shape_cast %0 : vector<4x8x32xf32> to vector<32x32xf32>
    %c0_2 = arith.constant 0 : index
    %c0_3 = arith.constant 0 : index
    %2 = vector.load %arg2[%c0_2, %c0_3] : memref<1x32xf32, #tpu.memory_space<vmem>>, vector<1x32xf32>
    %3 = vector.shape_cast %2 : vector<1x32xf32> to vector<32xf32>
    %c0_4 = arith.constant 0 : index
    %c0_5 = arith.constant 0 : index
    %4 = vector.load %arg3[%c0_4, %c0_5] : memref<1x32xf32, #tpu.memory_space<vmem>>, vector<1x32xf32>
    %5 = vector.shape_cast %4 : vector<1x32xf32> to vector<32xf32>
    %cst = arith.constant dense<0.000000e+00> : vector<32xf32>
    %6 = vector.multi_reduction <add>, %1, %cst [1] : vector<32x32xf32> to vector<32xf32>
    %7 = vector.shape_cast %6 : vector<32xf32> to vector<32x1xf32>
    %cst_6 = arith.constant 3.200000e+01 : f32
    %8 = vector.broadcast %cst_6 : f32 to vector<32x1xf32>
    %9 = arith.divf %7, %8 : vector<32x1xf32>
    %10 = vector.broadcast %9 : vector<32x1xf32> to vector<32x32xf32>
    %11 = arith.subf %1, %10 : vector<32x32xf32>
    %12 = arith.mulf %11, %11 : vector<32x32xf32>
    %cst_7 = arith.constant dense<0.000000e+00> : vector<32xf32>
    %13 = vector.multi_reduction <add>, %12, %cst_7 [1] : vector<32x32xf32> to vector<32xf32>
    %14 = vector.shape_cast %13 : vector<32xf32> to vector<32x1xf32>
    %cst_8 = arith.constant 3.200000e+01 : f32
    %15 = vector.broadcast %cst_8 : f32 to vector<32x1xf32>
    %16 = arith.divf %14, %15 : vector<32x1xf32>
    %17 = vector.broadcast %9 : vector<32x1xf32> to vector<32x32xf32>
    %18 = arith.subf %1, %17 : vector<32x32xf32>
    %cst_9 = arith.constant 9.99999974E-6 : f32
    %19 = vector.broadcast %cst_9 : f32 to vector<32x1xf32>
    %20 = arith.addf %16, %19 : vector<32x1xf32>
    %21 = math.rsqrt %20 : vector<32x1xf32>
    %22 = vector.broadcast %21 : vector<32x1xf32> to vector<32x32xf32>
    %23 = arith.mulf %18, %22 : vector<32x32xf32>
    %24 = vector.shape_cast %3 : vector<32xf32> to vector<1x32xf32>
    %25 = vector.broadcast %24 : vector<1x32xf32> to vector<32x32xf32>
    %26 = arith.mulf %23, %25 : vector<32x32xf32>
    %27 = vector.shape_cast %5 : vector<32xf32> to vector<1x32xf32>
    %28 = vector.broadcast %27 : vector<1x32xf32> to vector<32x32xf32>
    %29 = arith.addf %26, %28 : vector<32x32xf32>
    %30 = arith.truncf %29 : vector<32x32xf32> to vector<32x32xbf16>
    %c0_10 = arith.constant 0 : index
    %c0_11 = arith.constant 0 : index
    %31 = vector.load %arg4[%c0_10, %c0_11] : memref<32x96xbf16, #tpu.memory_space<vmem>>, vector<32x96xbf16>
    %cst_12 = arith.constant dense<0.000000e+00> : vector<32x96xf32>
    %32 = tpu.matmul %30, %31, %cst_12 {dimension_numbers = #tpu.dot_dimension_numbers<[1], [0], [0], [1], [0, 0, 1, 1], [], []>} : vector<32x32xbf16>, vector<32x96xbf16>, vector<32x96xf32> -> vector<32x96xf32>
    %c0_13 = arith.constant 0 : index
    %c0_14 = arith.constant 0 : index
    %33 = vector.load %arg5[%c0_13, %c0_14] : memref<1x96xf32, #tpu.memory_space<vmem>>, vector<1x96xf32>
    %34 = vector.shape_cast %33 : vector<1x96xf32> to vector<96xf32>
    %35 = vector.shape_cast %34 : vector<96xf32> to vector<1x96xf32>
    %36 = vector.broadcast %35 : vector<1x96xf32> to vector<32x96xf32>
    %37 = arith.addf %32, %36 : vector<32x96xf32>
    %38 = arith.truncf %37 : vector<32x96xf32> to vector<32x96xbf16>
    %39 = vector.shape_cast %38 : vector<32x96xbf16> to vector<4x8x96xbf16>
    %cst_15 = arith.constant 0.000000e+00 : f32
    %40 = vector.broadcast %cst_15 : f32 to vector<32x32xf32>
    %41 = vector.extract_strided_slice %39 {offsets = [0, 0, 0], sizes = [4, 8, 8], strides = [1, 1, 1]} : vector<4x8x96xbf16> to vector<4x8x8xbf16>
    %42 = vector.extract_strided_slice %39 {offsets = [0, 0, 32], sizes = [4, 8, 8], strides = [1, 1, 1]} : vector<4x8x96xbf16> to vector<4x8x8xbf16>
    %43 = vector.extract_strided_slice %39 {offsets = [0, 0, 64], sizes = [4, 8, 8], strides = [1, 1, 1]} : vector<4x8x96xbf16> to vector<4x8x8xbf16>
    "tpu.trace_start"() <{level = 10 : i32, message = "bqd,bkd->bqk"}> : () -> ()
    %cst_16 = arith.constant dense<0.000000e+00> : vector<4x8x8xf32>
    %44 = tpu.matmul %41, %42, %cst_16 {dimension_numbers = #tpu.dot_dimension_numbers<[2], [2], [1], [1], [0, 0, 0, 1, 1, 1], [0], [0]>} : vector<4x8x8xbf16>, vector<4x8x8xbf16>, vector<4x8x8xf32> -> vector<4x8x8xf32>
    "tpu.trace_stop"() : () -> ()
    %cst_17 = arith.constant dense<0xFF800000> : vector<4x8xf32>
    %45 = vector.multi_reduction <maximumf>, %44, %cst_17 [2] : vector<4x8x8xf32> to vector<4x8xf32>
    %46 = vector.shape_cast %45 : vector<4x8xf32> to vector<4x8x1xf32>
    %47 = vector.broadcast %46 : vector<4x8x1xf32> to vector<4x8x8xf32>
    %48 = arith.subf %44, %47 : vector<4x8x8xf32>
    %49 = math.exp %48 : vector<4x8x8xf32>
    %cst_18 = arith.constant dense<0.000000e+00> : vector<4x8xf32>
    %50 = vector.multi_reduction <add>, %49, %cst_18 [2] : vector<4x8x8xf32> to vector<4x8xf32>
    %51 = vector.shape_cast %50 : vector<4x8xf32> to vector<4x8x1xf32>
    %52 = tpu.reciprocal %51 {approx = true} : vector<4x8x1xf32> -> vector<4x8x1xf32>
    %53 = vector.broadcast %52 : vector<4x8x1xf32> to vector<4x8x8xf32>
    %54 = arith.mulf %49, %53 : vector<4x8x8xf32>
    %55 = arith.truncf %54 : vector<4x8x8xf32> to vector<4x8x8xbf16>
    "tpu.trace_start"() <{level = 10 : i32, message = "bqk,bkd->bqd"}> : () -> ()
    %cst_19 = arith.constant dense<0.000000e+00> : vector<4x8x8xf32>
    %56 = tpu.matmul %55, %43, %cst_19 {dimension_numbers = #tpu.dot_dimension_numbers<[2], [1], [1], [2], [0, 0, 0, 1, 1, 2], [0], [0]>} : vector<4x8x8xbf16>, vector<4x8x8xbf16>, vector<4x8x8xf32> -> vector<4x8x8xf32>
    "tpu.trace_stop"() : () -> ()
    %57 = vector.shape_cast %56 : vector<4x8x8xf32> to vector<32x8xf32>
    %58 = arith.truncf %57 : vector<32x8xf32> to vector<32x8xbf16>
    %c0_20 = arith.constant 0 : index
    %c0_21 = arith.constant 0 : index
    %59 = vector.load %arg6[%c0_20, %c0_21] : memref<32x32xbf16, #tpu.memory_space<vmem>>, vector<8x32xbf16>
    %cst_22 = arith.constant dense<0.000000e+00> : vector<32x32xf32>
    %60 = tpu.matmul %58, %59, %cst_22 {dimension_numbers = #tpu.dot_dimension_numbers<[1], [0], [0], [1], [0, 0, 1, 1], [], []>} : vector<32x8xbf16>, vector<8x32xbf16>, vector<32x32xf32> -> vector<32x32xf32>
    %61 = arith.addf %40, %60 : vector<32x32xf32>
    %62 = vector.extract_strided_slice %39 {offsets = [0, 0, 8], sizes = [4, 8, 8], strides = [1, 1, 1]} : vector<4x8x96xbf16> to vector<4x8x8xbf16>
    %63 = vector.extract_strided_slice %39 {offsets = [0, 0, 40], sizes = [4, 8, 8], strides = [1, 1, 1]} : vector<4x8x96xbf16> to vector<4x8x8xbf16>
    %64 = vector.extract_strided_slice %39 {offsets = [0, 0, 72], sizes = [4, 8, 8], strides = [1, 1, 1]} : vector<4x8x96xbf16> to vector<4x8x8xbf16>
    "tpu.trace_start"() <{level = 10 : i32, message = "bqd,bkd->bqk"}> : () -> ()
    %cst_23 = arith.constant dense<0.000000e+00> : vector<4x8x8xf32>
    %65 = tpu.matmul %62, %63, %cst_23 {dimension_numbers = #tpu.dot_dimension_numbers<[2], [2], [1], [1], [0, 0, 0, 1, 1, 1], [0], [0]>} : vector<4x8x8xbf16>, vector<4x8x8xbf16>, vector<4x8x8xf32> -> vector<4x8x8xf32>
    "tpu.trace_stop"() : () -> ()
    %cst_24 = arith.constant dense<0xFF800000> : vector<4x8xf32>
    %66 = vector.multi_reduction <maximumf>, %65, %cst_24 [2] : vector<4x8x8xf32> to vector<4x8xf32>
    %67 = vector.shape_cast %66 : vector<4x8xf32> to vector<4x8x1xf32>
    %68 = vector.broadcast %67 : vector<4x8x1xf32> to vector<4x8x8xf32>
    %69 = arith.subf %65, %68 : vector<4x8x8xf32>
    %70 = math.exp %69 : vector<4x8x8xf32>
    %cst_25 = arith.constant dense<0.000000e+00> : vector<4x8xf32>
    %71 = vector.multi_reduction <add>, %70, %cst_25 [2] : vector<4x8x8xf32> to vector<4x8xf32>
    %72 = vector.shape_cast %71 : vector<4x8xf32> to vector<4x8x1xf32>
    %73 = tpu.reciprocal %72 {approx = true} : vector<4x8x1xf32> -> vector<4x8x1xf32>
    %74 = vector.broadcast %73 : vector<4x8x1xf32> to vector<4x8x8xf32>
    %75 = arith.mulf %70, %74 : vector<4x8x8xf32>
    %76 = arith.truncf %75 : vector<4x8x8xf32> to vector<4x8x8xbf16>
    "tpu.trace_start"() <{level = 10 : i32, message = "bqk,bkd->bqd"}> : () -> ()
    %cst_26 = arith.constant dense<0.000000e+00> : vector<4x8x8xf32>
    %77 = tpu.matmul %76, %64, %cst_26 {dimension_numbers = #tpu.dot_dimension_numbers<[2], [1], [1], [2], [0, 0, 0, 1, 1, 2], [0], [0]>} : vector<4x8x8xbf16>, vector<4x8x8xbf16>, vector<4x8x8xf32> -> vector<4x8x8xf32>
    "tpu.trace_stop"() : () -> ()
    %78 = vector.shape_cast %77 : vector<4x8x8xf32> to vector<32x8xf32>
    %79 = arith.truncf %78 : vector<32x8xf32> to vector<32x8xbf16>
    %c8 = arith.constant 8 : index
    %c0_27 = arith.constant 0 : index
    %80 = vector.load %arg6[%c8, %c0_27] : memref<32x32xbf16, #tpu.memory_space<vmem>>, vector<8x32xbf16>
    %cst_28 = arith.constant dense<0.000000e+00> : vector<32x32xf32>
    %81 = tpu.matmul %79, %80, %cst_28 {dimension_numbers = #tpu.dot_dimension_numbers<[1], [0], [0], [1], [0, 0, 1, 1], [], []>} : vector<32x8xbf16>, vector<8x32xbf16>, vector<32x32xf32> -> vector<32x32xf32>
    %82 = arith.addf %61, %81 : vector<32x32xf32>
    %83 = vector.extract_strided_slice %39 {offsets = [0, 0, 16], sizes = [4, 8, 8], strides = [1, 1, 1]} : vector<4x8x96xbf16> to vector<4x8x8xbf16>
    %84 = vector.extract_strided_slice %39 {offsets = [0, 0, 48], sizes = [4, 8, 8], strides = [1, 1, 1]} : vector<4x8x96xbf16> to vector<4x8x8xbf16>
    %85 = vector.extract_strided_slice %39 {offsets = [0, 0, 80], sizes = [4, 8, 8], strides = [1, 1, 1]} : vector<4x8x96xbf16> to vector<4x8x8xbf16>
    "tpu.trace_start"() <{level = 10 : i32, message = "bqd,bkd->bqk"}> : () -> ()
    %cst_29 = arith.constant dense<0.000000e+00> : vector<4x8x8xf32>
    %86 = tpu.matmul %83, %84, %cst_29 {dimension_numbers = #tpu.dot_dimension_numbers<[2], [2], [1], [1], [0, 0, 0, 1, 1, 1], [0], [0]>} : vector<4x8x8xbf16>, vector<4x8x8xbf16>, vector<4x8x8xf32> -> vector<4x8x8xf32>
    "tpu.trace_stop"() : () -> ()
    %cst_30 = arith.constant dense<0xFF800000> : vector<4x8xf32>
    %87 = vector.multi_reduction <maximumf>, %86, %cst_30 [2] : vector<4x8x8xf32> to vector<4x8xf32>
    %88 = vector.shape_cast %87 : vector<4x8xf32> to vector<4x8x1xf32>
    %89 = vector.broadcast %88 : vector<4x8x1xf32> to vector<4x8x8xf32>
    %90 = arith.subf %86, %89 : vector<4x8x8xf32>
    %91 = math.exp %90 : vector<4x8x8xf32>
    %cst_31 = arith.constant dense<0.000000e+00> : vector<4x8xf32>
    %92 = vector.multi_reduction <add>, %91, %cst_31 [2] : vector<4x8x8xf32> to vector<4x8xf32>
    %93 = vector.shape_cast %92 : vector<4x8xf32> to vector<4x8x1xf32>
    %94 = tpu.reciprocal %93 {approx = true} : vector<4x8x1xf32> -> vector<4x8x1xf32>
    %95 = vector.broadcast %94 : vector<4x8x1xf32> to vector<4x8x8xf32>
    %96 = arith.mulf %91, %95 : vector<4x8x8xf32>
    %97 = arith.truncf %96 : vector<4x8x8xf32> to vector<4x8x8xbf16>
    "tpu.trace_start"() <{level = 10 : i32, message = "bqk,bkd->bqd"}> : () -> ()
    %cst_32 = arith.constant dense<0.000000e+00> : vector<4x8x8xf32>
    %98 = tpu.matmul %97, %85, %cst_32 {dimension_numbers = #tpu.dot_dimension_numbers<[2], [1], [1], [2], [0, 0, 0, 1, 1, 2], [0], [0]>} : vector<4x8x8xbf16>, vector<4x8x8xbf16>, vector<4x8x8xf32> -> vector<4x8x8xf32>
    "tpu.trace_stop"() : () -> ()
    %99 = vector.shape_cast %98 : vector<4x8x8xf32> to vector<32x8xf32>
    %100 = arith.truncf %99 : vector<32x8xf32> to vector<32x8xbf16>
    %c16 = arith.constant 16 : index
    %c0_33 = arith.constant 0 : index
    %101 = vector.load %arg6[%c16, %c0_33] : memref<32x32xbf16, #tpu.memory_space<vmem>>, vector<8x32xbf16>
    %cst_34 = arith.constant dense<0.000000e+00> : vector<32x32xf32>
    %102 = tpu.matmul %100, %101, %cst_34 {dimension_numbers = #tpu.dot_dimension_numbers<[1], [0], [0], [1], [0, 0, 1, 1], [], []>} : vector<32x8xbf16>, vector<8x32xbf16>, vector<32x32xf32> -> vector<32x32xf32>
    %103 = arith.addf %82, %102 : vector<32x32xf32>
    %104 = vector.extract_strided_slice %39 {offsets = [0, 0, 24], sizes = [4, 8, 8], strides = [1, 1, 1]} : vector<4x8x96xbf16> to vector<4x8x8xbf16>
    %105 = vector.extract_strided_slice %39 {offsets = [0, 0, 56], sizes = [4, 8, 8], strides = [1, 1, 1]} : vector<4x8x96xbf16> to vector<4x8x8xbf16>
    %106 = vector.extract_strided_slice %39 {offsets = [0, 0, 88], sizes = [4, 8, 8], strides = [1, 1, 1]} : vector<4x8x96xbf16> to vector<4x8x8xbf16>
    "tpu.trace_start"() <{level = 10 : i32, message = "bqd,bkd->bqk"}> : () -> ()
    %cst_35 = arith.constant dense<0.000000e+00> : vector<4x8x8xf32>
    %107 = tpu.matmul %104, %105, %cst_35 {dimension_numbers = #tpu.dot_dimension_numbers<[2], [2], [1], [1], [0, 0, 0, 1, 1, 1], [0], [0]>} : vector<4x8x8xbf16>, vector<4x8x8xbf16>, vector<4x8x8xf32> -> vector<4x8x8xf32>
    "tpu.trace_stop"() : () -> ()
    %cst_36 = arith.constant dense<0xFF800000> : vector<4x8xf32>
    %108 = vector.multi_reduction <maximumf>, %107, %cst_36 [2] : vector<4x8x8xf32> to vector<4x8xf32>
    %109 = vector.shape_cast %108 : vector<4x8xf32> to vector<4x8x1xf32>
    %110 = vector.broadcast %109 : vector<4x8x1xf32> to vector<4x8x8xf32>
    %111 = arith.subf %107, %110 : vector<4x8x8xf32>
    %112 = math.exp %111 : vector<4x8x8xf32>
    %cst_37 = arith.constant dense<0.000000e+00> : vector<4x8xf32>
    %113 = vector.multi_reduction <add>, %112, %cst_37 [2] : vector<4x8x8xf32> to vector<4x8xf32>
    %114 = vector.shape_cast %113 : vector<4x8xf32> to vector<4x8x1xf32>
    %115 = tpu.reciprocal %114 {approx = true} : vector<4x8x1xf32> -> vector<4x8x1xf32>
    %116 = vector.broadcast %115 : vector<4x8x1xf32> to vector<4x8x8xf32>
    %117 = arith.mulf %112, %116 : vector<4x8x8xf32>
    %118 = arith.truncf %117 : vector<4x8x8xf32> to vector<4x8x8xbf16>
    "tpu.trace_start"() <{level = 10 : i32, message = "bqk,bkd->bqd"}> : () -> ()
    %cst_38 = arith.constant dense<0.000000e+00> : vector<4x8x8xf32>
    %119 = tpu.matmul %118, %106, %cst_38 {dimension_numbers = #tpu.dot_dimension_numbers<[2], [1], [1], [2], [0, 0, 0, 1, 1, 2], [0], [0]>} : vector<4x8x8xbf16>, vector<4x8x8xbf16>, vector<4x8x8xf32> -> vector<4x8x8xf32>
    "tpu.trace_stop"() : () -> ()
    %120 = vector.shape_cast %119 : vector<4x8x8xf32> to vector<32x8xf32>
    %121 = arith.truncf %120 : vector<32x8xf32> to vector<32x8xbf16>
    %c24 = arith.constant 24 : index
    %c0_39 = arith.constant 0 : index
    %122 = vector.load %arg6[%c24, %c0_39] : memref<32x32xbf16, #tpu.memory_space<vmem>>, vector<8x32xbf16>
    %cst_40 = arith.constant dense<0.000000e+00> : vector<32x32xf32>
    %123 = tpu.matmul %121, %122, %cst_40 {dimension_numbers = #tpu.dot_dimension_numbers<[1], [0], [0], [1], [0, 0, 1, 1], [], []>} : vector<32x8xbf16>, vector<8x32xbf16>, vector<32x32xf32> -> vector<32x32xf32>
    %124 = arith.addf %103, %123 : vector<32x32xf32>
    %125 = arith.addf %1, %124 : vector<32x32xf32>
    %c0_41 = arith.constant 0 : index
    %c0_42 = arith.constant 0 : index
    %126 = vector.load %arg7[%c0_41, %c0_42] : memref<1x32xf32, #tpu.memory_space<vmem>>, vector<1x32xf32>
    %127 = vector.shape_cast %126 : vector<1x32xf32> to vector<32xf32>
    %128 = vector.shape_cast %127 : vector<32xf32> to vector<1x32xf32>
    %129 = vector.broadcast %128 : vector<1x32xf32> to vector<32x32xf32>
    %130 = arith.addf %125, %129 : vector<32x32xf32>
    %c0_43 = arith.constant 0 : index
    %c0_44 = arith.constant 0 : index
    %131 = vector.load %arg8[%c0_43, %c0_44] : memref<1x32xf32, #tpu.memory_space<vmem>>, vector<1x32xf32>
    %132 = vector.shape_cast %131 : vector<1x32xf32> to vector<32xf32>
    %c0_45 = arith.constant 0 : index
    %c0_46 = arith.constant 0 : index
    %133 = vector.load %arg9[%c0_45, %c0_46] : memref<1x32xf32, #tpu.memory_space<vmem>>, vector<1x32xf32>
    %134 = vector.shape_cast %133 : vector<1x32xf32> to vector<32xf32>
    %cst_47 = arith.constant dense<0.000000e+00> : vector<32xf32>
    %135 = vector.multi_reduction <add>, %130, %cst_47 [1] : vector<32x32xf32> to vector<32xf32>
    %136 = vector.shape_cast %135 : vector<32xf32> to vector<32x1xf32>
    %cst_48 = arith.constant 3.200000e+01 : f32
    %137 = vector.broadcast %cst_48 : f32 to vector<32x1xf32>
    %138 = arith.divf %136, %137 : vector<32x1xf32>
    %139 = vector.broadcast %138 : vector<32x1xf32> to vector<32x32xf32>
    %140 = arith.subf %130, %139 : vector<32x32xf32>
    %141 = arith.mulf %140, %140 : vector<32x32xf32>
    %cst_49 = arith.constant dense<0.000000e+00> : vector<32xf32>
    %142 = vector.multi_reduction <add>, %141, %cst_49 [1] : vector<32x32xf32> to vector<32xf32>
    %143 = vector.shape_cast %142 : vector<32xf32> to vector<32x1xf32>
    %cst_50 = arith.constant 3.200000e+01 : f32
    %144 = vector.broadcast %cst_50 : f32 to vector<32x1xf32>
    %145 = arith.divf %143, %144 : vector<32x1xf32>
    %146 = vector.broadcast %138 : vector<32x1xf32> to vector<32x32xf32>
    %147 = arith.subf %130, %146 : vector<32x32xf32>
    %cst_51 = arith.constant 9.99999974E-6 : f32
    %148 = vector.broadcast %cst_51 : f32 to vector<32x1xf32>
    %149 = arith.addf %145, %148 : vector<32x1xf32>
    %150 = math.rsqrt %149 : vector<32x1xf32>
    %151 = vector.broadcast %150 : vector<32x1xf32> to vector<32x32xf32>
    %152 = arith.mulf %147, %151 : vector<32x32xf32>
    %153 = vector.shape_cast %132 : vector<32xf32> to vector<1x32xf32>
    %154 = vector.broadcast %153 : vector<1x32xf32> to vector<32x32xf32>
    %155 = arith.mulf %152, %154 : vector<32x32xf32>
    %156 = vector.shape_cast %134 : vector<32xf32> to vector<1x32xf32>
    %157 = vector.broadcast %156 : vector<1x32xf32> to vector<32x32xf32>
    %158 = arith.addf %155, %157 : vector<32x32xf32>
    %159 = arith.truncf %158 : vector<32x32xf32> to vector<32x32xbf16>
    %c0_52 = arith.constant 0 : index
    %c0_53 = arith.constant 0 : index
    %160 = vector.load %arg10[%c0_52, %c0_53] : memref<32x128xbf16, #tpu.memory_space<vmem>>, vector<32x128xbf16>
    %cst_54 = arith.constant dense<0.000000e+00> : vector<32x128xf32>
    %161 = tpu.matmul %159, %160, %cst_54 {dimension_numbers = #tpu.dot_dimension_numbers<[1], [0], [0], [1], [0, 0, 1, 1], [], []>} : vector<32x32xbf16>, vector<32x128xbf16>, vector<32x128xf32> -> vector<32x128xf32>
    %c0_55 = arith.constant 0 : index
    %c0_56 = arith.constant 0 : index
    %162 = vector.load %arg11[%c0_55, %c0_56] : memref<1x128xf32, #tpu.memory_space<vmem>>, vector<1x128xf32>
    %163 = vector.shape_cast %162 : vector<1x128xf32> to vector<128xf32>
    %164 = vector.shape_cast %163 : vector<128xf32> to vector<1x128xf32>
    %165 = vector.broadcast %164 : vector<1x128xf32> to vector<32x128xf32>
    %166 = arith.addf %161, %165 : vector<32x128xf32>
    %cst_57 = arith.constant 0.000000e+00 : f32
    %167 = vector.broadcast %cst_57 : f32 to vector<32x128xf32>
    %168 = arith.maximumf %166, %167 : vector<32x128xf32>
    %169 = arith.truncf %168 : vector<32x128xf32> to vector<32x128xbf16>
    %c0_58 = arith.constant 0 : index
    %c0_59 = arith.constant 0 : index
    %170 = vector.load %arg12[%c0_58, %c0_59] : memref<128x32xbf16, #tpu.memory_space<vmem>>, vector<128x32xbf16>
    %cst_60 = arith.constant dense<0.000000e+00> : vector<32x32xf32>
    %171 = tpu.matmul %169, %170, %cst_60 {dimension_numbers = #tpu.dot_dimension_numbers<[1], [0], [0], [1], [0, 0, 1, 1], [], []>} : vector<32x128xbf16>, vector<128x32xbf16>, vector<32x32xf32> -> vector<32x32xf32>
    %c0_61 = arith.constant 0 : index
    %c0_62 = arith.constant 0 : index
    %172 = vector.load %arg13[%c0_61, %c0_62] : memref<1x32xf32, #tpu.memory_space<vmem>>, vector<1x32xf32>
    %173 = vector.shape_cast %172 : vector<1x32xf32> to vector<32xf32>
    %174 = vector.shape_cast %173 : vector<32xf32> to vector<1x32xf32>
    %175 = vector.broadcast %174 : vector<1x32xf32> to vector<32x32xf32>
    %176 = arith.addf %171, %175 : vector<32x32xf32>
    %177 = arith.addf %130, %176 : vector<32x32xf32>
    %178 = vector.shape_cast %177 : vector<32x32xf32> to vector<4x8x32xf32>
    %c0_63 = arith.constant 0 : index
    %c0_64 = arith.constant 0 : index
    %c0_65 = arith.constant 0 : index
    %179 = vector.load %arg14[%c0_63, %c0_64, %c0_65] : memref<4x8x32xf32, #tpu.memory_space<vmem>>, vector<4x8x32xf32>
    tpu.vector_store %arg14[%c0_63, %c0_64, %c0_65], %178 {strides = array<i32>} : memref<4x8x32xf32, #tpu.memory_space<vmem>>, vector<4x8x32xf32>,
    return
  }
  func.func @transform_0(%arg0: i32) -> (i32, i32, i32) {
    %c0_i32 = arith.constant 0 : i32
    %c0_i32_0 = arith.constant 0 : i32
    %c0_i32_1 = arith.constant 0 : i32
    return %arg0, %c0_i32, %c0_i32_0 : i32, i32, i32
  }
  func.func @transform_1(%arg0: i32) -> (i32, i32) {
    %c0_i32 = arith.constant 0 : i32
    %c0_i32_0 = arith.constant 0 : i32
    %c0_i32_1 = arith.constant 0 : i32
    return %c0_i32, %c0_i32_0 : i32, i32
  }
  func.func @transform_2(%arg0: i32) -> (i32, i32) {
    %c0_i32 = arith.constant 0 : i32
    %c0_i32_0 = arith.constant 0 : i32
    %c0_i32_1 = arith.constant 0 : i32
    return %c0_i32, %c0_i32_0 : i32, i32
  }
  func.func @transform_3(%arg0: i32) -> (i32, i32) {
    %c0_i32 = arith.constant 0 : i32
    %c0_i32_0 = arith.constant 0 : i32
    %c0_i32_1 = arith.constant 0 : i32
    return %c0_i32, %c0_i32_0 : i32, i32
  }
  func.func @transform_4(%arg0: i32) -> (i32, i32) {
    %c0_i32 = arith.constant 0 : i32
    %c0_i32_0 = arith.constant 0 : i32
    %c0_i32_1 = arith.constant 0 : i32
    return %c0_i32, %c0_i32_0 : i32, i32
  }
  func.func @transform_5(%arg0: i32) -> (i32, i32) {
    %c0_i32 = arith.constant 0 : i32
    %c0_i32_0 = arith.constant 0 : i32
    %c0_i32_1 = arith.constant 0 : i32
    return %c0_i32, %c0_i32_0 : i32, i32
  }
  func.func @transform_6(%arg0: i32) -> (i32, i32) {
    %c0_i32 = arith.constant 0 : i32
    %c0_i32_0 = arith.constant 0 : i32
    %c0_i32_1 = arith.constant 0 : i32
    return %c0_i32, %c0_i32_0 : i32, i32
  }
  func.func @transform_7(%arg0: i32) -> (i32, i32) {
    %c0_i32 = arith.constant 0 : i32
    %c0_i32_0 = arith.constant 0 : i32
    %c0_i32_1 = arith.constant 0 : i32
    return %c0_i32, %c0_i32_0 : i32, i32
  }
  func.func @transform_8(%arg0: i32) -> (i32, i32) {
    %c0_i32 = arith.constant 0 : i32
    %c0_i32_0 = arith.constant 0 : i32
    %c0_i32_1 = arith.constant 0 : i32
    return %c0_i32, %c0_i32_0 : i32, i32
  }
  func.func @transform_9(%arg0: i32) -> (i32, i32) {
    %c0_i32 = arith.constant 0 : i32
    %c0_i32_0 = arith.constant 0 : i32
    %c0_i32_1 = arith.constant 0 : i32
    return %c0_i32, %c0_i32_0 : i32, i32
  }
  func.func @transform_10(%arg0: i32) -> (i32, i32) {
    %c0_i32 = arith.constant 0 : i32
    %c0_i32_0 = arith.constant 0 : i32
    %c0_i32_1 = arith.constant 0 : i32
    return %c0_i32, %c0_i32_0 : i32, i32
  }
  func.func @transform_11(%arg0: i32) -> (i32, i32) {
    %c0_i32 = arith.constant 0 : i32
    %c0_i32_0 = arith.constant 0 : i32
    %c0_i32_1 = arith.constant 0 : i32
    return %c0_i32, %c0_i32_0 : i32, i32
  }
  func.func @transform_12(%arg0: i32) -> (i32, i32) {
    %c0_i32 = arith.constant 0 : i32
    %c0_i32_0 = arith.constant 0 : i32
    %c0_i32_1 = arith.constant 0 : i32
    return %c0_i32, %c0_i32_0 : i32, i32
  }
  func.func @transform_13(%arg0: i32) -> (i32, i32, i32) {
    %c0_i32 = arith.constant 0 : i32
    %c0_i32_0 = arith.constant 0 : i32
    %c0_i32_1 = arith.constant 0 : i32
    return %arg0, %c0_i32, %c0_i32_0 : i32, i32, i32
  }
}

</mosaic_0001>

<bundles_post_ra>
// kernel: tpu_custom_call.1
= control target key start
LH: loop header
LB: loop body
LE: loop exit
PB: predicated region body
PF: predicated region fallthrough
CT: control target
= control target key end

     0   :  { %s3156_s0 = inlined_call_operand.vmem [shape: f32[8,8,32], index: 0, kind: input, shape index: {}]   ;;  %s3157_s1 = inlined_call_operand.hbm [shape: f32[1,32], index: 1, kind: input, shape index: {}]   ;;  %s3158_s2 = inlined_call_operand.vmem [shape: f32[1,32], index: 2, kind: input, shape index: {}]   ;;  %s3159_s3 = inlined_call_operand.vmem [shape: bf16[32,96], index: 3, kind: input, shape index: {}]   ;;  %s3160_s4 = inlined_call_operand.vmem [shape: f32[1,96], index: 4, kind: input, shape index: {}]   ;;  %s3161_s5 = inlined_call_operand.hbm [shape: bf16[32,32], index: 5, kind: input, shape index: {}]   ;;  %s3162_s6 = inlined_call_operand.vmem [shape: f32[1,32], index: 6, kind: input, shape index: {}]   ;;  %s3163_s7 = inlined_call_operand.vmem [shape: f32[1,32], index: 7, kind: input, shape index: {}]   ;;  %s3164_s8 = inlined_call_operand.vmem [shape: f32[1,32], index: 8, kind: input, shape index: {}]   ;;  %s3165_s9 = inlined_call_operand.hbm [shape: bf16[32,128], index: 9, kind: input, shape index: {}]   ;;  %s3166_s10 = inlined_call_operand.vmem [shape: f32[1,128], index: 10, kind: input, shape index: {}]   ;;  %s3167_s11 = inlined_call_operand.vmem [shape: bf16[128,32], index: 11, kind: input, shape index: {}]   ;;  %s3168_s12 = inlined_call_operand.vmem [shape: f32[1,32], index: 12, kind: input, shape index: {}]   ;;  %s3169_s13 = inlined_call_operand.hbm [shape: f32[8,8,32], index: 13, kind: output, shape index: {}]  }
   0x1   :  { %3175 = sst [smem:[#allocation17_spill]] %s3161_s5 }
   0x2   :  { %18 = vsyncpa [#allocation3], 0 }
   0x3   :  { %19 = vsyncpa [#allocation6], 0 }
   0x4   :  { %20 = vsyncpa [#allocation4], 0 }
   0x5   :  { %22 = vsyncpa [#allocation4 + $0x1], 0  ;;  %s2619_s25 = smov 0   ;;  %s2621_s26 = smov 0  }
   0x6   :  { %s2623_s27 = smov 0   ;;  %s2625_s28 = smov 0  }
   0x7 LB: > { %3176 = sst [smem:[#allocation12_spill]] %s2516_s25  ;;  %s2640_s29 = sadd.s32 4294967295, %s2528_s28   ;;  %s2528_s28 = sphi %s2625_s28, %s3188_s28   ;;  %s2524_s27 = sphi %s2623_s27, %s3190_s27   ;;  %s2520_s26 = sphi %s2621_s26, %s3192_s26   ;;  %s2516_s25 = sphi %s2619_s25, %s3191_s25  }
   0x8   : > { %3177 = sst [smem:[#allocation13_spill]] %s2524_s27  ;;  %s2065_s30 = sadd.s32 4294967294, %s2528_s28  }
   0x9   : > { %s2644_s14 = sadd.s32 1, %s2528_s28   ;;  %s313_s15 = sadd.s32 1, %s2524_s27 }
   0xa   : > { %3178 = sst [smem:[#allocation14_spill]] %s2644_s14  ;;  %s310_s16 = ssub.s32 %s2528_s28, %s2644_s14 }
   0xb   : > { %p323_p0 = scmp.ne.s32.totalorder %s2524_s27, %s2520_s26  ;;  %p311_p1 = scmp.eq.s32.totalorder %s310_s16, 0 }
   0xc   : > { %p324_p2 = scmp.eq.s32.totalorder %s2640_s29, 1  ;;  %p329_p3 = scmp.ne.s32.totalorder %s2520_s26, %s2516_s25 }
   0xd   : > { %p330_p4 = scmp.eq.s32.totalorder %s2065_s30, 1  ;;  %p2066_p7 = scmp.ge.s32.totalorder %s2528_s28, 1 }
   0xe   : > { %s2655_s17 = scalar_select %p311_p1, %s2524_s27, %s313_s15  }
   0xf   : > { %p2657_p5 = por %p324_p2, %p323_p0  ;;  %p2661_p6 = por %p330_p4, %p329_p3 }
  0x10   : > { %3179 = sst [smem:[#allocation15_spill]] %s2655_s17  ;;  %p337_p8 = scmp.lt.s32.totalorder %s2528_s28, 3 }
  0x11   : > { %s3181_s19 = scalar_select %p2661_p6, 1, 0 }
  0x12   : > { %p2216_p9 = scmp.eq.s32.totalorder %s2640_s29, 0  ;;  %p2668_p10 = pnand %p2066_p7, %p337_p8 }
  0x13   : > { %3182 = sst [smem:[#allocation16_spill]] %s3181_s19  ;;  %s2530_s24 = smov [#allocation5]  }
  0x14   : > { %s3184_s5 = sld [smem:[#allocation17_spill]]  ;;  %p2202_p11 = pneg %p2668_p10 }
  0x15   : > { %s371_s30 = sshll.u32 %s2530_s24, 4  ;;  %s349_s21 = sshll.u32 %s3157_s1, 4  ;;  %s372_s30 = int_to_ptr.vmem [resolvable:$true] %s371_s30  ;;  %s350_s21 = int_to_ptr.hbm [resolvable:$true] %s349_s21 }
  0x16   : > { %p2679_p12 = pnand %p2216_p9, %p2202_p11  ;;  %s2531_s22 = smov 64  }
  0x17   : > { %s2533_s27 = smov [#allocation2]   ;;  %s392_s25 = sshll.u32 %s3165_s9, 4  ;;  %s393_s25 = int_to_ptr.hbm [resolvable:$true] %s392_s25 }
  0x18   : > { %s351_s24 = sshll.u32 %s2533_s27, 4  ;;  %s2534_s17 = smov [#allocation7]   ;;  %s352_s24 = int_to_ptr.vmem [resolvable:$true] %s351_s24 }
  0x19   : > { %2205 = dma.hbm_to_vmem [thread:$0]  (!%p2679_p12), %s350_s21, 16, %s352_s24, [#allocation3]  }
  0x1a   : > { %s369_s23 = sshll.u32 %s3184_s5, 4  ;;  %s2532_s5 = smov 4   ;;  %s370_s23 = int_to_ptr.hbm [resolvable:$true] %s369_s23 }
  0x1b   : > { %2208 = dma.hbm_to_vmem [thread:$0]  (!%p2679_p12), %s370_s23, 256, %s372_s30, [#allocation6], %s2531_s22, %s2531_s22, %s2532_s5  }
  0x1c   : > { %s394_s16 = sshll.u32 %s2534_s17, 4  ;;  %428 = sbr.rel (%p2668_p10) target bundleno = 3055 (0xbef), region = 72  ;;  %s395_s16 = int_to_ptr.vmem [resolvable:$true] %s394_s16 }
  0x1d   : > { %2211 = dma.hbm_to_vmem [thread:$0]  (!%p2679_p12), %s393_s25, 256, %s395_s16, [#allocation6], %s2531_s22, %s2531_s22, %s2532_s5  }
  0x21   : > { %2503 = dma.done.wait (%p2216_p9), [#allocation3], 16  }
  0x22   : > { %2505 = vsyncadd (%p2216_p9), [#allocation3], 4294967280 }
  0x23   : > { %2507 = dma.done.wait (%p2216_p9), [#allocation6], 512  }
  0x24   : > { %2509 = vsyncadd (%p2216_p9), [#allocation6], 4294966784  ;;  %s2076_s27 = sshll.u32 %s2640_s29, 2  ;;  %vm497_vm0 = vcmask 261120   ;;  %v2535_v8 = vmov 32.0   ;;  %v2176_v35 = vld [vmem:[%s3159_s3 + $0x8] sm:$0xff] }
  0x25   : > { %p484_p13 = scmp.lt.s32.totalorder %s2076_s27, 7  ;;  %2282 = vrcp.f32 %v2535_v8  ;;  %641 = vmatpush.bf16.msra.mxu0 %v2176_v35  ;;  %v2175_v39 = vld [vmem:[%s3159_s3] sm:$0xff]  ;;  %s2536_s16 = smov 96   ;;  %vm663_vm14 = vcmask 64512   ;;  %vm808_vm15 = vcmask 1043456  }
  0x26   : > { %s2539_s25 = smov 120   ;;  %s2540_s14 = smov 112  }
  0x27   : > { %s3194_s27 = smov (!%p484_p13, %s2076_s27), 7  ;;  %s2541_s20 = smov 56  }
  0x28   : > { %s2077_s5 = sshll.u32 %s3194_s27, 3  ;;  %s2537_s27 = smov 64  }
  0x29   : > { %s2709_s19 = scalar_lea.vmem %s3156_s0, %s2077_s5  ;;  %642 = vmatpush.bf16.msra.mxu0 %v2175_v39  ;;  %s2538_s5 = smov 88  }
  0x2a   : > { %v493_v0 = vld [vmem:[%s2709_s19 + $0x10] sm:$0xff]  ;;  %v491_v1 = vld [vmem:[%s2709_s19] sm:$0xff]  ;;  %v494_v4 = vld [vmem:[%s2709_s19 + $0x18] sm:$0xff]  ;;  %s2542_s23 = smov 80   ;;  %s2543_s30 = smov 48  }
  0x2b   : > { %v504_v2 = vsel %vm497_vm0, %v493_v0, 0.0  ;;  %v498_v3 = vsel %vm497_vm0, %v491_v1, 0.0  ;;  %v492_v5 = vld [vmem:[%s2709_s19 + $0x8] sm:$0xff]  ;;  %v507_v6 = vsel %vm497_vm0, %v494_v4, 0.0  ;;  %v2283_v9 = vpop.eup %2282  ;;  %s2544_s15 = smov 104   ;;  %s2545_s21 = smov 72  }
  0x2c   : > { %505 = vadd.xlane.f32.xlu1 %v504_v2  ;;  %499 = vadd.xlane.f32.xlu0 %v498_v3  ;;  %v501_v7 = vsel %vm497_vm0, %v492_v5, 0.0  ;;  %v511_v10 = vmul.f32 32.0, %v2283_v9  ;;  %vm515_vm1 = vweird.f32 %v2283_v9  ;;  %s2546_s22 = smov 40   ;;  %s2187_s17 = sshll.u32 %s2640_s29, 5 }
  0x2e   : > { %v512_v11 = vsub.f32 1.0, %v511_v10 }
  0x30   : > { %v513_v12 = vmul.f32 %v2283_v9, %v512_v11 }
  0x32   : > { %v514_v13 = vadd.f32 %v2283_v9, %v513_v12  ;;  %v2275_v12 = vld [vmem:[%s3158_s2] ss:$0 sm:$0xff] }
  0x34   : > { %508 = vadd.xlane.f32.xlu1 %v507_v6  ;;  %502 = vadd.xlane.f32.xlu0 %v501_v7  ;;  %v2719_v14 = vsel %vm515_vm1, %v2283_v9, %v514_v13 }
  0x9f   : > { %v506_v15 = vpop.xlane.xlu1 %505  ;;  %v500_v16 = vpop.xlane.xlu0 %499 }
  0xa0   : > { %v519_v17 = vmul.f32 %v2719_v14, %v506_v15  ;;  %v517_v18 = vmul.f32 %v2719_v14, %v500_v16 }
  0xa2   : > { %v2723_v19 = vsub.f32 %v493_v0, %v519_v17  ;;  %v521_v20 = vsub.f32 %v491_v1, %v517_v18 }
  0xa4   : > { %v527_v21 = vmul.f32 %v2723_v19, %v2723_v19  ;;  %v525_v22 = vmul.f32 %v521_v20, %v521_v20 }
  0xa6   : > { %v535_v23 = vsel %vm497_vm0, %v527_v21, 0.0  ;;  %v529_v24 = vsel %vm497_vm0, %v525_v22, 0.0 }
  0xa7   : > { %v509_v25 = vpop.xlane.xlu1 %508  ;;  %536 = vadd.xlane.f32.xlu0 %v535_v23  ;;  %530 = vadd.xlane.f32.xlu2 %v529_v24  ;;  %v503_v26 = vpop.xlane.xlu0 %502 }
  0xa8   : > { %v520_v27 = vmul.f32 %v2719_v14, %v509_v25  ;;  %v518_v28 = vmul.f32 %v2719_v14, %v503_v26 }
  0xaa   : > { %v2731_v29 = vsub.f32 %v494_v4, %v520_v27  ;;  %v522_v30 = vsub.f32 %v492_v5, %v518_v28  ;;  %v2274_v5 = vld [vmem:[#allocation2] ss:$0 sm:$0xff] }
  0xac   : > { %v528_v31 = vmul.f32 %v2731_v29, %v2731_v29  ;;  %v526_v32 = vmul.f32 %v522_v30, %v522_v30 }
  0xae   : > { %v538_v33 = vsel %vm497_vm0, %v528_v31, 0.0  ;;  %v532_v34 = vsel %vm497_vm0, %v526_v32, 0.0  ;;  %v2276_v32 = vld [vmem:[%s3160_s4] ss:$0 sm:$0xff] }
  0xaf   : > { %539 = vadd.xlane.f32.xlu1 %v538_v33  ;;  %533 = vadd.xlane.f32.xlu2 %v532_v34 }
 0x11a   : > { %v531_v36 = vpop.xlane.xlu2 %530  ;;  %v537_v38 = vpop.xlane.xlu0 %536 }
 0x11b   : > { %v541_v37 = vmul.f32 %v531_v36, %v2719_v14  ;;  %v543_v41 = vmul.f32 %v537_v38, %v2719_v14 }
 0x11d   : > { %v545_v40 = vadd.f32 1e-05, %v541_v37  ;;  %v547_v42 = vadd.f32 1e-05, %v543_v41 }
 0x11f   : > { %2284 = vrsqrt.f32 %v545_v40  ;;  %vm555_vm3 = vweird.f32 %v545_v40  ;;  %vm575_vm10 = vweird.f32 %v547_v42 }
 0x120   : > { %2286 = vrsqrt.f32 %v547_v42 }
 0x122   : > { %v540_v43 = vpop.xlane.xlu1 %539  ;;  %v534_v44 = vpop.xlane.xlu2 %533 }
 0x123   : > { %v544_v45 = vmul.f32 %v540_v43, %v2719_v14  ;;  %v542_v46 = vmul.f32 %v534_v44, %v2719_v14 }
 0x125   : > { %v2285_v47 = vpop.eup %2284  ;;  %v548_v48 = vadd.f32 1e-05, %v544_v45  ;;  %v546_v49 = vadd.f32 1e-05, %v542_v46 }
 0x126   : > { %v550_v50 = vmul.f32 %v2285_v47, %v545_v40  ;;  %v2287_v53 = vpop.eup %2286  ;;  %vm556_vm2 = vweird.f32 %v2285_v47 }
 0x127   : > { %2288 = vrsqrt.f32 %v548_v48  ;;  %v570_v59 = vmul.f32 %v2287_v53, %v547_v42  ;;  %vm557_vm4 = vmor %vm555_vm3, %vm556_vm2  ;;  %vm565_vm6 = vweird.f32 %v546_v49  ;;  %vm585_vm8 = vweird.f32 %v548_v48 }
 0x128   : > { %v551_v51 = vmul.f32 %v2285_v47, %v550_v50  ;;  %2290 = vrsqrt.f32 %v546_v49  ;;  %vm576_vm11 = vweird.f32 %v2287_v53 }
 0x129   : > { %v571_v0 = vmul.f32 %v2287_v53, %v570_v59  ;;  %vm577_vm13 = vmor %vm575_vm10, %vm576_vm11 }
 0x12a   : > { %v552_v52 = vmul.f32 0.5, %v551_v51 }
 0x12b   : > { %v572_v6 = vmul.f32 0.5, %v571_v0 }
 0x12c   : > { %v553_v54 = vsub.f32 1.5, %v552_v52 }
 0x12d   : > { %v2289_v55 = vpop.eup %2288  ;;  %v573_v13 = vsub.f32 1.5, %v572_v6 }
 0x12e   : > { %v2291_v56 = vpop.eup %2290  ;;  %v580_v57 = vmul.f32 %v2289_v55, %v548_v48  ;;  %v554_v58 = vmul.f32 %v2285_v47, %v553_v54  ;;  %vm586_vm9 = vweird.f32 %v2289_v55 }
 0x12f   : > { %v560_v60 = vmul.f32 %v2291_v56, %v546_v49  ;;  %vm566_vm5 = vweird.f32 %v2291_v56  ;;  %vm587_vm12 = vmor %vm585_vm8, %vm586_vm9 }
 0x130   : > { %v581_v61 = vmul.f32 %v2289_v55, %v580_v57  ;;  %v558_v63 = vsel %vm557_vm4, %v2285_v47, %v554_v58  ;;  %vm567_vm7 = vmor %vm565_vm6, %vm566_vm5 }
 0x131   : > { %v561_v62 = vmul.f32 %v2291_v56, %v560_v60  ;;  %v589_v4 = vmul.f32 %v558_v63, %v521_v20  ;;  %v574_v20 = vmul.f32 %v2287_v53, %v573_v13 }
 0x132   : > { %v582_v2 = vmul.f32 0.5, %v581_v61 }
 0x133   : > { %v562_v1 = vmul.f32 0.5, %v561_v62  ;;  %v596_v11 = vmul.f32 %v2274_v5, %v589_v4  ;;  %v578_v23 = vsel %vm577_vm13, %v2287_v53, %v574_v20 }
 0x134   : > { %v583_v8 = vsub.f32 1.5, %v582_v2  ;;  %v591_v25 = vmul.f32 %v578_v23, %v2723_v19 }
 0x135   : > { %v563_v3 = vsub.f32 1.5, %v562_v1  ;;  %v603_v17 = vadd.f32 %v2275_v12, %v596_v11 }
 0x136   : > { %v584_v16 = vmul.f32 %v2289_v55, %v583_v8  ;;  %v598_v27 = vmul.f32 %v2274_v5, %v591_v25 }
 0x137   : > { %v564_v7 = vmul.f32 %v2291_v56, %v563_v3 }
 0x138   : > { %v588_v22 = vsel %vm587_vm12, %v2289_v55, %v584_v16 }
 0x139   : > { %v568_v9 = vsel %vm567_vm7, %v2291_v56, %v564_v7  ;;  %v592_v24 = vmul.f32 %v588_v22, %v2731_v29 }
 0x13a   : > { %v590_v10 = vmul.f32 %v568_v9, %v522_v30  ;;  %v605_v30 = vadd.f32 %v2275_v12, %v598_v27 }
 0x13b   : > { %v599_v26 = vmul.f32 %v2274_v5, %v592_v24 }
 0x13c   : > { %v597_v15 = vmul.f32 %v2274_v5, %v590_v10 }
 0x13d   : > { %v606_v28 = vadd.f32 %v2275_v12, %v599_v26 }
 0x13e   : > { %v604_v18 = vadd.f32 %v2275_v12, %v597_v15 }
 0x13f   : > { %v608_v31 = vpack.c.bf16 %v606_v28, %v605_v30 }
 0x140   : > { %v607_v21 = vpack.c.bf16 %v604_v18, %v603_v17 }
 0x142   : > { %2086 = vmatmul.msk.bf16.vlgmr.msra.gmra.mxu0 %vm497_vm0, %v607_v21 }
 0x152   : > { %2087 = vmatmul.msk.bf16.gmra.mxu0 %vm497_vm0, %v608_v31 }
 0x1bf   : > { %v644_v33 = vpop.f32.mrf.mxu0 }
 0x1c0   : > { %v645_v34 = vadd.f32 %v2276_v32, %v644_v33 }
 0x1c2   : > { %v654_v35 = vpack.c.bf16 %v645_v34, %v645_v34 }
 0x1c4   : > { %v659_v36 = vunpack.c.l.b16 %v654_v35 }
 0x1c6   : > { %v2757_v37 = vpack.c.b16 %v659_v36, %v659_v36 }
 0x1c7   : > { %v646_v29 = vpop.f32.mrf.mxu0 }
 0x1c8   : > { %661 = vrot.lane.b32.xlu2 %v2757_v37, %s2536_s16  ;;  %v647_v44 = vadd.f32 %v2276_v32, %v646_v29 }
 0x1ca   : > { %v655_v47 = vpack.c.bf16 %v647_v44, %v647_v44 }
 0x1cc   : > { %v684_v49 = vunpack.c.l.b16 %v655_v47 }
 0x1ce   : > { %v2766_v50 = vpack.c.b16 %v684_v49, %v684_v49 }
 0x1cf   : > { %v649_v19 = vpop.f32.mrf.mxu0 }
 0x1d0   : > { %v650_v38 = vadd.f32 %v2276_v32, %v649_v19 }
 0x1d2   : > { %v656_v39 = vpack.c.bf16 %v650_v38, %v650_v38 }
 0x1d4   : > { %v708_v40 = vunpack.c.l.b16 %v656_v39 }
 0x1d6   : > { %v2760_v41 = vpack.c.b16 %v708_v40, %v708_v40 }
 0x1d7   : > { %v651_v42 = vpop.f32.mrf.mxu0 }
 0x1d8   : > { %v652_v43 = vadd.f32 %v2276_v32, %v651_v42  ;;  %710 = vrot.lane.b32.xlu0 %v2760_v41, %s2536_s16 }
 0x1da   : > { %v657_v45 = vpack.c.bf16 %v652_v43, %v652_v43 }
 0x1dc   : > { %v732_v46 = vunpack.c.l.b16 %v657_v45 }
 0x1de   : > { %v2763_v48 = vpack.c.b16 %v732_v46, %v732_v46 }
 0x1e0   : > { %734 = vrot.lane.b32.xlu1 %v2763_v48, %s2536_s16 }
 0x1e8   : > { %686 = vrot.lane.b32.xlu1 %v2766_v50, %s2536_s16 }
 0x222   : > { %v662_v51 = vpop.permute.xlu2 %661 }
 0x223   : > { %v668_v52 = vsel %vm663_vm14, %v662_v51, 0 }
 0x224   : > { %677 = vmatpush.bf16.xpose.msra.mxu1 %v668_v52 }
 0x22b   : > { %2088 = vmatmul.msk.bf16.vlgmr.msra.gmra.mxu1 %vm663_vm14, %v654_v35 }
 0x24a   : > { %v711_v53 = vpop.permute.xlu0 %710 }
 0x24b   : > { %v716_v54 = vsel %vm663_vm14, %v711_v53, 0 }
 0x24c   : > { %725 = vmatpush.bf16.xpose.msra.mxu3 %v716_v54 }
 0x252   : > { %v735_v55 = vpop.permute.xlu1 %734 }
 0x253   : > { %2090 = vmatmul.msk.bf16.vlgmr.msra.gmra.mxu3 %vm663_vm14, %v656_v39  ;;  %v740_v56 = vsel %vm663_vm14, %v735_v55, 0 }
 0x254   : > { %749 = vmatpush.bf16.xpose.msrb.mxu1 %v740_v56 }
 0x25a   : > { %v687_v57 = vpop.permute.xlu1 %686 }
 0x25b   : > { %2091 = vmatmul.msk.bf16.vlgmr.msrb.gmra.mxu1 %vm663_vm14, %v657_v45  ;;  %v692_v58 = vsel %vm663_vm14, %v687_v57, 0 }
 0x25c   : > { %701 = vmatpush.bf16.xpose.msra.mxu2 %v692_v58 }
 0x263   : > { %2089 = vmatmul.msk.bf16.vlgmr.msra.gmra.mxu2 %vm663_vm14, %v655_v47 }
 0x2a8   : > { %v2777_v59 = vpop.f32.mrf.mxu1 }
 0x2b0   : > { %v681_v60 = vpop.f32.mrf.mxu1 }
 0x2b1   : > { %v755_v60 = vsel %vm663_vm14, %v2777_v59, -inf }
 0x2d6   : > { %v727_v61 = vpop.f32.mrf.mxu3 }
 0x2d7   : > { %v761_v62 = vsel %vm663_vm14, %v727_v61, -inf }
 0x2d8   : > { %v751_v63 = vpop.f32.mrf.mxu1  ;;  %762 = vmax.xlane.f32.xlu0 %v761_v62 }
 0x2d9   : > { %v764_v0 = vsel %vm663_vm14, %v751_v63, -inf }
 0x2da   : > { %765 = vmax.xlane.f32.xlu2 %v764_v0 }
 0x2de   : > { %v729_v1 = vpop.f32.mrf.mxu3 }
 0x2e0   : > { %v753_v2 = vpop.f32.mrf.mxu1 }
 0x2e6   : > { %v2781_v3 = vpop.f32.mrf.mxu2 }
 0x2e7   : > { %v758_v26 = vsel %vm663_vm14, %v2781_v3, -inf }
 0x2ec   : > { %867 = vrot.lane.b32.xlu0 %v2763_v48, %s2537_s27 }
 0x2ee   : > { %v705_v4 = vpop.f32.mrf.mxu2 }
 0x2f2   : > { %846 = vrot.lane.b32.xlu2 %v2760_v41, %s2537_s27 }
 0x2f4   : > { %939 = vrot.lane.b32.xlu0 %v2760_v41, %s2538_s5 }
 0x2fc   : > { %937 = vrot.lane.b32.xlu0 %v2760_v41, %s2539_s25 }
 0x304   : > { %825 = vrot.lane.b32.xlu0 %v2766_v50, %s2537_s27 }
 0x30c   : > { %1197 = vrot.lane.b32.xlu0 %v2766_v50, %s2540_s14 }
 0x34b   : > { %v763_v5 = vpop.xlane.xlu0 %762 }
 0x34c   : > { %v769_v6 = vsub.f32 %v727_v61, %v763_v5 }
 0x34d   : > { %v766_v7 = vpop.xlane.xlu2 %765 }
 0x34e   : > { %v775_v8 = vmul.f32 1.442695, %v769_v6  ;;  %v770_v9 = vsub.f32 %v751_v63, %v766_v7 }
 0x350   : > { %2292 = vpow2.f32 %v775_v8  ;;  %v777_v10 = vmul.f32 1.442695, %v770_v9 }
 0x352   : > { %2294 = vpow2.f32 %v777_v10 }
 0x355   : > { %v847_v11 = vpop.permute.xlu2 %846 }
 0x356   : > { %v2293_v12 = vpop.eup %2292  ;;  %v852_v13 = vsel %vm808_vm15, %v847_v11, 0 }
 0x357   : > { %861 = vmatpush.bf16.msrb.mxu0 %v852_v13  ;;  %v785_v15 = vsel %vm663_vm14, %v2293_v12, 0.0 }
 0x358   : > { %v2295_v16 = vpop.eup %2294  ;;  %786 = vadd.xlane.f32.xlu2 %v785_v15 }
 0x359   : > { %v788_v17 = vsel %vm663_vm14, %v2295_v16, 0.0 }
 0x35a   : > { %789 = vadd.xlane.f32.xlu1 %v788_v17 }
 0x35e   : > { %v868_v18 = vpop.permute.xlu0 %867 }
 0x35f   : > { %v873_v20 = vsel %vm808_vm15, %v868_v18, 0 }
 0x360   : > { %882 = vmatpush.bf16.msra.mxu1 %v873_v20 }
 0x366   : > { %v940_v21 = vpop.permute.xlu0 %939 }
 0x367   : > { %v945_v22 = vsel %vm663_vm14, %v940_v21, 0 }
 0x368   : > { %954 = vmatpush.bf16.xpose.msra.mxu0 %v945_v22 }
 0x36e   : > { %v938_v23 = vpop.permute.xlu0 %937 }
 0x370   : > { %960 = vrot.lane.b32.xlu2 %v2763_v48, %s2539_s25 }
 0x373   : > { %962 = vrot.lane.b32.xlu1 %v2763_v48, %s2538_s5 }
 0x376   : > { %v826_v24 = vpop.permute.xlu0 %825 }
 0x377   : > { %v831_v25 = vsel %vm808_vm15, %v826_v24, 0 }
 0x378   : > { %840 = vmatpush.bf16.msrb.mxu3 %v831_v25 }
 0x37b   : > { %916 = vrot.lane.b32.xlu1 %v2766_v50, %s2538_s5 }
 0x37e   : > { %v1198_v10 = vpop.permute.xlu0 %1197 }
 0x399   : > { %759 = vmax.xlane.f32.xlu2 %v758_v26 }
 0x3cb   : > { %v787_v27 = vpop.xlane.xlu2 %786 }
 0x3cc   : > { %2296 = vrcp.f32 %v787_v27 }
 0x3cd   : > { %v790_v28 = vpop.xlane.xlu1 %789 }
 0x3ce   : > { %2298 = vrcp.f32 %v790_v28 }
 0x3d2   : > { %v2297_v30 = vpop.eup %2296 }
 0x3d3   : > { %v797_v31 = vmul.f32 %v2297_v30, %v2293_v12  ;;  %v961_v19 = vpop.permute.xlu2 %960 }
 0x3d4   : > { %v2299_v32 = vpop.eup %2298 }
 0x3d5   : > { %v798_v33 = vmul.f32 %v2299_v32, %v2295_v16  ;;  %v801_v34 = vpack.c.bf16 %v797_v31, %v797_v31 }
 0x3d7   : > { %v802_v35 = vpack.c.bf16 %v798_v33, %v798_v33  ;;  %2094 = vmatmul.msk.bf16.vlgmr.msrb.gmra.mxu0 %vm663_vm14, %v801_v34 }
 0x3d9   : > { %2095 = vmatmul.msk.bf16.vlgmr.msra.gmra.mxu1 %vm663_vm14, %v802_v35 }
 0x3e5   : > { %v963_v36 = vpop.permute.xlu1 %962 }
 0x3e6   : > { %v968_v29 = vsel %vm663_vm14, %v963_v36, 0 }
 0x3e7   : > { %2098 = vmatmul.msk.bf16.vlgmr.msra.gmra.mxu0 %vm663_vm14, %v938_v23  ;;  %977 = vmatpush.bf16.xpose.msrb.mxu1 %v968_v29 }
 0x3ed   : > { %v917_v38 = vpop.permute.xlu1 %916 }
 0x3ee   : > { %v922_v39 = vsel %vm663_vm14, %v917_v38, 0  ;;  %2099 = vmatmul.msk.bf16.vlgmr.msrb.gmra.mxu1 %vm663_vm14, %v961_v19 }
 0x3ef   : > { %931 = vmatpush.bf16.xpose.msra.mxu3 %v922_v39 }
 0x40c   : > { %v760_v40 = vpop.xlane.xlu2 %759 }
 0x40d   : > { %v768_v42 = vsub.f32 %v2781_v3, %v760_v40 }
 0x40f   : > { %v773_v43 = vmul.f32 1.442695, %v768_v42 }
 0x411   : > { %2300 = vpow2.f32 %v773_v43 }
 0x417   : > { %v2301_v44 = vpop.eup %2300 }
 0x418   : > { %v782_v45 = vsel %vm663_vm14, %v2301_v44, 0.0 }
 0x419   : > { %783 = vadd.xlane.f32.xlu2 %v782_v45 }
 0x431   : > { %914 = vrot.lane.b32.xlu2 %v2766_v50, %s2539_s25 }
 0x439   : > { %1094 = vrot.lane.b32.xlu2 %v2763_v48, %s2541_s20 }
 0x441   : > { %1073 = vrot.lane.b32.xlu2 %v2760_v41, %s2541_s20 }
 0x449   : > { %1199 = vrot.lane.b32.xlu2 %v2766_v50, %s2542_s23 }
 0x451   : > { %1176 = vrot.lane.b32.xlu2 %v2757_v37, %s2542_s23 }
 0x454   : > { %v2827_v46 = vpop.f32.mrf.mxu0 }
 0x456   : > { %v2829_v47 = vpop.f32.mrf.mxu1 }
 0x457   : > { %v889_v49 = vpack.c.bf16 %v2829_v47, %v2827_v46 }
 0x45c   : > { %v865_v51 = vpop.f32.mrf.mxu0 }
 0x45e   : > { %v886_v52 = vpop.f32.mrf.mxu1 }
 0x464   : > { %v956_v53 = vpop.f32.mrf.mxu0 }
 0x465   : > { %v989_v54 = vsel %vm663_vm14, %v956_v53, -inf }
 0x466   : > { %990 = vmax.xlane.f32.xlu1 %v989_v54 }
 0x46b   : > { %v979_v55 = vpop.f32.mrf.mxu1 }
 0x46c   : > { %v958_v56 = vpop.f32.mrf.mxu0  ;;  %v992_v57 = vsel %vm663_vm14, %v979_v55, -inf }
 0x46d   : > { %993 = vmax.xlane.f32.xlu0 %v992_v57 }
 0x473   : > { %v981_v58 = vpop.f32.mrf.mxu1 }
 0x47a   : > { %756 = vmax.xlane.f32.xlu2 %v755_v60 }
 0x47f   : > { %1174 = vrot.lane.b32.xlu1 %v2757_v37, %s2540_s14 }
 0x481   : > { %1245 = vrot.lane.b32.xlu0 %v2763_v48, %s2542_s23 }
 0x48c   : > { %v784_v61 = vpop.xlane.xlu2 %783 }
 0x48d   : > { %2302 = vrcp.f32 %v784_v61 }
 0x492   : > { %803 = vrot.lane.b32.xlu2 %v2757_v37, %s2537_s27  ;;  %s1968_s27 = scalar_lea.hbm %s3169_s13, %s2187_s17 }
 0x493   : > { %v2303_v62 = vpop.eup %2302 }
 0x494   : > { %v796_v63 = vmul.f32 %v2303_v62, %v2301_v44  ;;  %v915_v0 = vpop.permute.xlu2 %914 }
 0x496   : > { %v800_v1 = vpack.c.bf16 %v796_v63, %v796_v63 }
 0x498   : > { %2093 = vmatmul.msk.bf16.vlgmr.msrb.gmra.mxu3 %vm663_vm14, %v800_v1 }
 0x49c   : > { %v1095_v2 = vpop.permute.xlu2 %1094 }
 0x49d   : > { %v1100_v3 = vsel %vm808_vm15, %v1095_v2, 0 }
 0x49e   : > { %1109 = vmatpush.bf16.msra.mxu1 %v1100_v3 }
 0x4a4   : > { %v1074_v4 = vpop.permute.xlu2 %1073 }
 0x4a5   : > { %v1079_v5 = vsel %vm808_vm15, %v1074_v4, 0 }
 0x4a6   : > { %1088 = vmatpush.bf16.msrb.mxu0 %v1079_v5 }
 0x4a8   : > { %2097 = vmatmul.msk.bf16.vlgmr.msra.gmra.mxu3 %vm663_vm14, %v915_v0 }
 0x4ac   : > { %v1200_v6 = vpop.permute.xlu2 %1199 }
 0x4ad   : > { %v1205_v7 = vsel %vm663_vm14, %v1200_v6, 0 }
 0x4ae   : > { %1214 = vmatpush.bf16.xpose.msrb.mxu1 %v1205_v7 }
 0x4b4   : > { %v1177_v8 = vpop.permute.xlu2 %1176 }
 0x4b5   : > { %v1182_v9 = vsel %vm663_vm14, %v1177_v8, 0 }
 0x4b6   : > { %1191 = vmatpush.bf16.xpose.msra.mxu0 %v1182_v9 }
 0x4d9   : > { %v991_v11 = vpop.xlane.xlu1 %990 }
 0x4da   : > { %v997_v12 = vsub.f32 %v956_v53, %v991_v11 }
 0x4dc   : > { %v1003_v13 = vmul.f32 1.442695, %v997_v12 }
 0x4de   : > { %2304 = vpow2.f32 %v1003_v13 }
 0x4e0   : > { %v994_v15 = vpop.xlane.xlu0 %993 }
 0x4e1   : > { %v998_v16 = vsub.f32 %v979_v55, %v994_v15 }
 0x4e3   : > { %v1005_v17 = vmul.f32 1.442695, %v998_v16 }
 0x4e4   : > { %v2305_v18 = vpop.eup %2304 }
 0x4e5   : > { %2306 = vpow2.f32 %v1005_v17  ;;  %v1013_v20 = vsel %vm663_vm14, %v2305_v18, 0.0 }
 0x4e6   : > { %1014 = vadd.xlane.f32.xlu1 %v1013_v20 }
 0x4eb   : > { %v2307_v21 = vpop.eup %2306 }
 0x4ec   : > { %v1016_v22 = vsel %vm663_vm14, %v2307_v21, 0.0 }
 0x4ed   : > { %v757_v23 = vpop.xlane.xlu2 %756  ;;  %1017 = vadd.xlane.f32.xlu0 %v1016_v22 }
 0x4ee   : > { %v767_v26 = vsub.f32 %v2777_v59, %v757_v23 }
 0x4f0   : > { %v771_v27 = vmul.f32 1.442695, %v767_v26 }
 0x4f1   : > { %v1175_v36 = vpop.permute.xlu1 %1174 }
 0x4f2   : > { %2308 = vpow2.f32 %v771_v27 }
 0x4f3   : > { %v1246_v29 = vpop.permute.xlu0 %1245 }
 0x4f4   : > { %v1251_v45 = vsel %vm663_vm14, %v1246_v29, 0 }
 0x4f5   : > { %v804_v24 = vpop.permute.xlu2 %803 }
 0x4f6   : > { %v810_v25 = vsel %vm808_vm15, %v804_v24, 0 }
 0x4f7   : > { %819 = vmatpush.bf16.msrb.mxu2 %v810_v25 }
 0x4f8   : > { %v2309_v31 = vpop.eup %2308 }
 0x4f9   : > { %v779_v32 = vsel %vm663_vm14, %v2309_v31, 0.0 }
 0x4ff   : > { %1243 = vrot.lane.b32.xlu1 %v2763_v48, %s2540_s14 }
 0x501   : > { %1222 = vrot.lane.b32.xlu0 %v2760_v41, %s2542_s23 }
 0x509   : > { %1220 = vrot.lane.b32.xlu0 %v2760_v41, %s2540_s14 }
 0x511   : > { %893 = vrot.lane.b32.xlu0 %v2757_v37, %s2538_s5 }
 0x519   : > { %891 = vrot.lane.b32.xlu0 %v2757_v37, %s2539_s25  ;;  %s1971_s25 = sshll.u32 %s1968_s27, 4  ;;  %s1972_s25 = int_to_ptr.hbm [resolvable:$true] %s1971_s25 }
 0x51a   : > { %s2472_s14 = sshra.s32 %s1972_s25, 4  ;;  %s2473_s14 = int_to_ptr.hbm [resolvable:$true] %s2472_s14 }
 0x51b   : > { %v2863_v28 = vpop.f32.mrf.mxu3  ;;  %p2479_p3 = scmp.lt.s32.totalorder %s2473_s14, %s3169_s13 }
 0x523   : > { %v844_v30 = vpop.f32.mrf.mxu3 }
 0x529   : > { %780 = vadd.xlane.f32.xlu1 %v779_v32 }
 0x52b   : > { %v933_v33 = vpop.f32.mrf.mxu3 }
 0x52c   : > { %v986_v35 = vsel %vm663_vm14, %v933_v33, -inf }
 0x533   : > { %v935_v34 = vpop.f32.mrf.mxu3 }
 0x543   : > { %987 = vmax.xlane.f32.xlu0 %v986_v35 }
 0x559   : > { %v1015_v59 = vpop.xlane.xlu1 %1014 }
 0x55a   : > { %2310 = vrcp.f32 %v1015_v59 }
 0x560   : > { %v2311_v19 = vpop.eup %2310  ;;  %v1018_v38 = vpop.xlane.xlu0 %1017 }
 0x561   : > { %v1025_v39 = vmul.f32 %v2311_v19, %v2305_v18  ;;  %2312 = vrcp.f32 %v1018_v38 }
 0x563   : > { %v1029_v40 = vpack.c.bf16 %v1025_v39, %v1025_v39 }
 0x565   : > { %2102 = vmatmul.msk.bf16.vlgmr.msrb.gmra.mxu0 %vm663_vm14, %v1029_v40 }
 0x567   : > { %v2313_v42 = vpop.eup %2312 }
 0x568   : > { %v1026_v43 = vmul.f32 %v2313_v42, %v2307_v21 }
 0x56a   : > { %v1030_v44 = vpack.c.bf16 %v1026_v43, %v1026_v43 }
 0x56c   : > { %2103 = vmatmul.msk.bf16.vlgmr.msra.gmra.mxu1 %vm663_vm14, %v1030_v44 }
 0x56d   : > { %1260 = vmatpush.bf16.xpose.msra.mxu1 %v1251_v45 }
 0x571   : > { %v1244_v56 = vpop.permute.xlu1 %1243 }
 0x573   : > { %v1223_v51 = vpop.permute.xlu0 %1222 }
 0x574   : > { %v1228_v52 = vsel %vm663_vm14, %v1223_v51, 0 }
 0x575   : > { %2108 = vmatmul.msk.bf16.vlgmr.msra.gmra.mxu0 %vm663_vm14, %v1175_v36 }
 0x576   : > { %1237 = vmatpush.bf16.xpose.msrb.mxu0 %v1228_v52  ;;  %v890_v52 = vld [vmem:[#allocation5] sm:$0xf] }
 0x57b   : > { %v1221_v53 = vpop.permute.xlu0 %1220 }
 0x57c   : > { %2109 = vmatmul.msk.bf16.vlgmr.msrb.gmra.mxu1 %vm663_vm14, %v1198_v10 }
 0x583   : > { %v894_v54 = vpop.permute.xlu0 %893 }
 0x584   : > { %v899_v55 = vsel %vm663_vm14, %v894_v54, 0 }
 0x585   : > { %908 = vmatpush.bf16.xpose.msra.mxu2 %v899_v55  ;;  %2110 = vmatmul.msk.bf16.vlgmr.msrb.gmra.mxu0 %vm663_vm14, %v1221_v53  ;;  %v1153_v55 = vsel %vm808_vm15, %v890_v52, 0 }
 0x58b   : > { %v892_v62 = vpop.permute.xlu0 %891 }
 0x58c   : > { %2111 = vmatmul.msk.bf16.vlgmr.msra.gmra.mxu1 %vm663_vm14, %v1244_v56 }
 0x59c   : > { %v781_v57 = vpop.xlane.xlu1 %780 }
 0x59d   : > { %2314 = vrcp.f32 %v781_v57 }
 0x5a3   : > { %v2315_v58 = vpop.eup %2314 }
 0x5a4   : > { %v795_v60 = vmul.f32 %v2315_v58, %v2309_v31 }
 0x5a6   : > { %v799_v61 = vpack.c.bf16 %v795_v60, %v795_v60 }
 0x5a8   : > { %2092 = vmatmul.msk.bf16.vlgmr.msrb.gmra.mxu2 %vm663_vm14, %v799_v61 }
 0x5b6   : > { %v988_v63 = vpop.xlane.xlu0 %987 }
 0x5b7   : > { %v996_v0 = vsub.f32 %v933_v33, %v988_v63 }
 0x5b8   : > { %2096 = vmatmul.msk.bf16.vlgmr.msra.gmra.mxu2 %vm663_vm14, %v892_v62 }
 0x5b9   : > { %v1001_v1 = vmul.f32 1.442695, %v996_v0 }
 0x5bb   : > { %2316 = vpow2.f32 %v1001_v1 }
 0x5c1   : > { %v2878_v2 = vpop.eup %2316 }
 0x5c2   : > { %v1010_v3 = vsel %vm663_vm14, %v2878_v2, 0.0 }
 0x5c3   : > { %1011 = vadd.xlane.f32.xlu1 %v1010_v3 }
 0x5e2   : > { %v2882_v4 = vpop.f32.mrf.mxu0 }
 0x5e9   : > { %v2884_v5 = vpop.f32.mrf.mxu1 }
 0x5ea   : > { %v1116_v6 = vpack.c.bf16 %v2884_v5, %v2882_v4  ;;  %v1092_v7 = vpop.f32.mrf.mxu0 }
 0x5f1   : > { %v1113_v8 = vpop.f32.mrf.mxu1 }
 0x5f2   : > { %v2888_v9 = vpop.f32.mrf.mxu0 }
 0x5f3   : > { %v1266_v40 = vsel %vm663_vm14, %v2888_v9, -inf }
 0x5f9   : > { %v1216_v10 = vpop.f32.mrf.mxu1 }
 0x5fa   : > { %v1195_v11 = vpop.f32.mrf.mxu0  ;;  %v1269_v12 = vsel %vm663_vm14, %v1216_v10, -inf }
 0x5fb   : > { %1270 = vmax.xlane.f32.xlu2 %v1269_v12 }
 0x601   : > { %v1218_v13 = vpop.f32.mrf.mxu1 }
 0x602   : > { %v1239_v15 = vpop.f32.mrf.mxu0 }
 0x603   : > { %v1272_v16 = vsel %vm663_vm14, %v1239_v15, -inf }
 0x604   : > { %1273 = vmax.xlane.f32.xlu0 %v1272_v16 }
 0x609   : > { %v1262_v17 = vpop.f32.mrf.mxu1 }
 0x60a   : > { %v1241_v18 = vpop.f32.mrf.mxu0  ;;  %v1275_v20 = vsel %vm663_vm14, %v1262_v17, -inf }
 0x60b   : > { %1276 = vmax.xlane.f32.xlu1 %v1275_v20 }
 0x611   : > { %v1264_v21 = vpop.f32.mrf.mxu1 }
 0x618   : > { %1356 = vrot.lane.b32.xlu0 %v2760_v41, %s2543_s30 }
 0x620   : > { %1433 = vrot.lane.b32.xlu0 %v2757_v37, %s2544_s15 }
 0x624   : > { %1052 = vrot.lane.b32.xlu1 %v2766_v50, %s2541_s20 }
 0x628   : > { %1479 = vrot.lane.b32.xlu0 %v2760_v41, %s2544_s15 }
 0x62b   : > { %v821_v22 = vpop.f32.mrf.mxu2 }
 0x62c   : > { %1377 = vrot.lane.b32.xlu1 %v2763_v48, %s2543_s30  ;;  %v888_v62 = vpack.c.bf16 %v2863_v28, %v821_v22 }
 0x633   : > { %v823_v23 = vpop.f32.mrf.mxu2 }
 0x634   : > { %1435 = vrot.lane.b32.xlu1 %v2757_v37, %s2545_s21 }
 0x636   : > { %v1012_v31 = vpop.xlane.xlu1 %1011 }
 0x63b   : > { %v2904_v24 = vpop.f32.mrf.mxu2 }
 0x63c   : > { %1481 = vrot.lane.b32.xlu1 %v2760_v41, %s2545_s21 }
 0x643   : > { %v912_v25 = vpop.f32.mrf.mxu2 }
 0x644   : > { %1458 = vrot.lane.b32.xlu1 %v2766_v50, %s2545_s21 }
 0x64c   : > { %1504 = vrot.lane.b32.xlu1 %v2763_v48, %s2545_s21  ;;  %s2478_s21 = scalar_lea.hbm %s3169_s13, 64 }
 0x654   : > { %1502 = vrot.lane.b32.xlu1 %v2763_v48, %s2544_s15 }
 0x65c   : > { %1031 = vrot.lane.b32.xlu1 %v2757_v37, %s2541_s20  ;;  %s2474_s20 = scalar_lea.hbm %s2473_s14, 32 }
 0x65d   : > { %p2475_p0 = scmp.ne.s32.totalorder %s2473_s14, %s2474_s20  ;;  %p2480_p4 = scmp.lt.s32.totalorder %s2478_s21, %s2474_s20 }
 0x65f   : > { %p2476_p1 = pnand %p2475_p0, %p2657_p5  ;;  %p2481_p7 = por %p2480_p4, %p2479_p3 }
 0x661   : > { %p2477_p2 = pneg %p2476_p1 }
 0x663   : > { %p2482_p8 = pnand %p2481_p7, %p2477_p2 }
 0x66e   : > { %v1271_v26 = vpop.xlane.xlu2 %1270 }
 0x66f   : > { %v1279_v27 = vsub.f32 %v1216_v10, %v1271_v26 }
 0x671   : > { %v1284_v30 = vmul.f32 1.442695, %v1279_v27 }
 0x673   : > { %2318 = vpow2.f32 %v1284_v30 }
 0x677   : > { %v1274_v32 = vpop.xlane.xlu0 %1273 }
 0x678   : > { %v1280_v33 = vsub.f32 %v1239_v15, %v1274_v32 }
 0x679   : > { %v2319_v34 = vpop.eup %2318 }
 0x67a   : > { %v1286_v35 = vmul.f32 1.442695, %v1280_v33  ;;  %v1293_v36 = vsel %vm663_vm14, %v2319_v34, 0.0 }
 0x67b   : > { %1294 = vadd.xlane.f32.xlu2 %v1293_v36 }
 0x67c   : > { %2320 = vpow2.f32 %v1286_v35 }
 0x67e   : > { %v1277_v29 = vpop.xlane.xlu1 %1276 }
 0x67f   : > { %v1281_v59 = vsub.f32 %v1262_v17, %v1277_v29 }
 0x681   : > { %v1288_v19 = vmul.f32 1.442695, %v1281_v59 }
 0x682   : > { %v2914_v38 = vpop.eup %2320 }
 0x683   : > { %2322 = vpow2.f32 %v1288_v19  ;;  %v1296_v39 = vsel %vm663_vm14, %v2914_v38, 0.0 }
 0x684   : > { %1297 = vadd.xlane.f32.xlu0 %v1296_v39  ;;  %2324 = vrcp.f32 %v1012_v31 }
 0x686   : > { %1267 = vmax.xlane.f32.xlu1 %v1266_v40 }
 0x689   : > { %v2920_v42 = vpop.eup %2322 }
 0x68a   : > { %v1357_v43 = vpop.permute.xlu0 %1356  ;;  %v1299_v44 = vsel %vm663_vm14, %v2920_v42, 0.0  ;;  %v2325_v51 = vpop.eup %2324 }
 0x68b   : > { %v1362_v45 = vsel %vm808_vm15, %v1357_v43, 0  ;;  %v1024_v53 = vmul.f32 %v2325_v51, %v2878_v2 }
 0x68c   : > { %1300 = vadd.xlane.f32.xlu0 %v1299_v44  ;;  %1371 = vmatpush.bf16.msra.mxu0 %v1362_v45 }
 0x68d   : > { %v1028_v57 = vpack.c.bf16 %v1024_v53, %v1024_v53 }
 0x692   : > { %v1434_v10 = vpop.permute.xlu0 %1433 }
 0x693   : > { %1335 = vrot.lane.b32.xlu2 %v2766_v50, %s2543_s30 }
 0x696   : > { %v1053_v54 = vpop.permute.xlu1 %1052 }
 0x697   : > { %v1058_v56 = vsel %vm808_vm15, %v1053_v54, 0 }
 0x698   : > { %1067 = vmatpush.bf16.msrb.mxu3 %v1058_v56 }
 0x69a   : > { %v1480_v12 = vpop.permute.xlu0 %1479 }
 0x69b   : > { %2101 = vmatmul.msk.bf16.vlgmr.msrb.gmra.mxu3 %vm663_vm14, %v1028_v57 }
 0x69c   : > { %1162 = vmatpush.bf16.msra.mxu3 %v1153_v55 }
 0x69e   : > { %v1378_v58 = vpop.permute.xlu1 %1377 }
 0x69f   : > { %v1383_v60 = vsel %vm808_vm15, %v1378_v58, 0  ;;  %1615 = vrot.lane.b32.xlu1 %v2760_v41, %s2546_s22  ;;  %v983_v41 = vsel %vm663_vm14, %v2904_v24, -inf }
 0x6a0   : > { %1392 = vmatpush.bf16.msrb.mxu1 %v1383_v60  ;;  %1456 = vrot.lane.b32.xlu0 %v2766_v50, %s2544_s15 }
 0x6a6   : > { %v1436_v61 = vpop.permute.xlu1 %1435 }
 0x6ab   : > { %2106 = vmatmul.msk.bf16.vlgmr.msra.gmra.mxu3 %vm663_vm14, %v888_v62 }
 0x6ae   : > { %v1482_v63 = vpop.permute.xlu1 %1481 }
 0x6af   : > { %v1487_v0 = vsel %vm663_vm14, %v1482_v63, 0 }
 0x6b0   : > { %1496 = vmatpush.bf16.xpose.msra.mxu1 %v1487_v0 }
 0x6b6   : > { %v1459_v1 = vpop.permute.xlu1 %1458 }
 0x6b7   : > { %v1464_v2 = vsel %vm663_vm14, %v1459_v1, 0 }
 0x6b8   : > { %1473 = vmatpush.bf16.xpose.msrb.mxu0 %v1464_v2 }
 0x6bb   : > { %2107 = vmatmul.msk.bf16.gmra.mxu3 %vm663_vm14, %v889_v49  ;;  %v1441_v49 = vsel %vm663_vm14, %v1436_v61, 0 }
 0x6bc   : > { %984 = vmax.xlane.f32.xlu2 %v983_v41  ;;  %v1117_v41 = vld [vmem:[#allocation5 + $0x4] sm:$0xf] }
 0x6be   : > { %v1505_v28 = vpop.permute.xlu1 %1504 }
 0x6bf   : > { %v1510_v18 = vsel %vm663_vm14, %v1505_v28, 0  ;;  %v1125_v28 = vsel %vm808_vm15, %v1117_v41, 0 }
 0x6c6   : > { %v1503_v3 = vpop.permute.xlu1 %1502 }
 0x6ce   : > { %v1032_v7 = vpop.permute.xlu1 %1031 }
 0x6cf   : > { %v1037_v8 = vsel %vm808_vm15, %v1032_v7, 0 }
 0x6d0   : > { %1046 = vmatpush.bf16.msrb.mxu2 %v1037_v8 }
 0x6d4   : > { %1134 = vmatpush.bf16.msra.mxu2 %v1125_v28 }
 0x6ee   : > { %v1295_v11 = vpop.xlane.xlu2 %1294 }
 0x6ef   : > { %2326 = vrcp.f32 %v1295_v11 }
 0x6f5   : > { %v2327_v13 = vpop.eup %2326 }
 0x6f6   : > { %v1307_v15 = vmul.f32 %v2327_v13, %v2319_v34  ;;  %v1336_v16 = vpop.permute.xlu2 %1335 }
 0x6f7   : > { %v1341_v46 = vsel %vm808_vm15, %v1336_v16, 0  ;;  %v1298_v47 = vpop.xlane.xlu0 %1297 }
 0x6f8   : > { %v1311_v17 = vpack.c.bf16 %v1307_v15, %v1307_v15  ;;  %2328 = vrcp.f32 %v1298_v47  ;;  %1350 = vmatpush.bf16.msrb.mxu3 %v1341_v46 }
 0x6f9   : > { %v1268_v27 = vpop.xlane.xlu1 %1267 }
 0x6fa   : > { %v1278_v57 = vsub.f32 %v2888_v9, %v1268_v27 }
 0x6fb   : > { %2113 = vmatmul.msk.bf16.vlgmr.msrb.gmra.mxu3 %vm663_vm14, %v1311_v17 }
 0x6fc   : > { %1450 = vmatpush.bf16.xpose.msra.mxu3 %v1441_v49  ;;  %v1282_v63 = vmul.f32 1.442695, %v1278_v57 }
 0x6fe   : > { %v2329_v20 = vpop.eup %2328 }
 0x6ff   : > { %v1308_v21 = vmul.f32 %v2329_v20, %v2914_v38  ;;  %v1301_v22 = vpop.xlane.xlu0 %1300 }
 0x700   : > { %2330 = vrcp.f32 %v1301_v22 }
 0x701   : > { %v1312_v23 = vpack.c.bf16 %v1308_v21, %v1308_v21 }
 0x703   : > { %2114 = vmatmul.msk.bf16.vlgmr.msra.gmra.mxu0 %vm663_vm14, %v1312_v23 }
 0x704   : > { %1519 = vmatpush.bf16.xpose.msrb.mxu3 %v1510_v18 }
 0x706   : > { %v2331_v25 = vpop.eup %2330 }
 0x707   : > { %v1309_v26 = vmul.f32 %v2331_v25, %v2920_v42 }
 0x709   : > { %v1313_v30 = vpack.c.bf16 %v1309_v26, %v1309_v26 }
 0x70b   : > { %2115 = vmatmul.msk.bf16.vlgmr.msrb.gmra.mxu1 %vm663_vm14, %v1313_v30  ;;  %2118 = vmatmul.msk.bf16.vlgmr.msra.gmra.mxu3 %vm663_vm14, %v1434_v10 }
 0x711   : > { %v1616_v31 = vpop.permute.xlu1 %1615 }
 0x712   : > { %v1621_v32 = vsel %vm808_vm15, %v1616_v31, 0  ;;  %v1457_v33 = vpop.permute.xlu0 %1456 }
 0x713   : > { %2119 = vmatmul.msk.bf16.vlgmr.msrb.gmra.mxu0 %vm663_vm14, %v1457_v33  ;;  %1630 = vmatpush.bf16.msra.mxu3 %v1621_v32 }
 0x71b   : > { %2120 = vmatmul.msk.bf16.vlgmr.msra.gmra.mxu1 %vm663_vm14, %v1480_v12  ;;  %2121 = vmatmul.msk.bf16.vlgmr.msrb.gmra.mxu3 %vm663_vm14, %v1503_v3 }
 0x71e   : > { %v2960_v34 = vpop.f32.mrf.mxu3 }
 0x726   : > { %v1071_v35 = vpop.f32.mrf.mxu3 }
 0x72e   : > { %v2966_v39 = vpop.f32.mrf.mxu3 }
 0x72f   : > { %v985_v36 = vpop.xlane.xlu2 %984 }
 0x730   : > { %v995_v29 = vsub.f32 %v2904_v24, %v985_v36 }
 0x732   : > { %v999_v59 = vmul.f32 1.442695, %v995_v29 }
 0x734   : > { %2332 = vpow2.f32 %v999_v59 }
 0x735   : > { %2334 = vpow2.f32 %v1282_v63 }
 0x736   : > { %v2970_v40 = vpop.f32.mrf.mxu3 }
 0x73a   : > { %v2333_v19 = vpop.eup %2332 }
 0x73b   : > { %v1007_v38 = vsel %vm663_vm14, %v2333_v19, 0.0  ;;  %v2335_v3 = vpop.eup %2334 }
 0x73c   : > { %1008 = vadd.xlane.f32.xlu0 %v1007_v38  ;;  %v1290_v9 = vsel %vm663_vm14, %v2335_v3, 0.0 }
 0x73e   : > { %v2972_v42 = vpop.f32.mrf.mxu3 }
 0x746   : > { %v2974_v43 = vpop.f32.mrf.mxu3 }
 0x750   : > { %1314 = vrot.lane.b32.xlu0 %v2757_v37, %s2543_s30  ;;  %s480_s30 = sand.u32 1, %s2520_s26  }
 0x751   : > { %s1957_s29 = scalar_lea.sflag [#allocation4], %s480_s30 }
 0x758   : > { %1573 = vrot.lane.b32.xlu0 %v2757_v37, %s2546_s22 }
 0x77e   : > { %v2976_v24 = vpop.f32.mrf.mxu3 }
 0x780   : > { %v2978_v44 = vpop.f32.mrf.mxu0 }
 0x786   : > { %v1354_v45 = vpop.f32.mrf.mxu3 }
 0x788   : > { %v1375_v51 = vpop.f32.mrf.mxu0  ;;  %v2980_v52 = vpop.f32.mrf.mxu1 }
 0x789   : > { %v1399_v53 = vpack.c.bf16 %v2980_v52, %v2978_v44 }
 0x78e   : > { %v1452_v54 = vpop.f32.mrf.mxu3 }
 0x78f   : > { %v1525_v37 = vsel %vm663_vm14, %v1452_v54, -inf }
 0x790   : > { %v1396_v55 = vpop.f32.mrf.mxu1  ;;  %v1475_v56 = vpop.f32.mrf.mxu0  ;;  %1526 = vmax.xlane.f32.xlu2 %v1525_v37 }
 0x791   : > { %v1528_v60 = vsel %vm663_vm14, %v1475_v56, -inf }
 0x796   : > { %v1454_v58 = vpop.f32.mrf.mxu3 }
 0x798   : > { %v1477_v61 = vpop.f32.mrf.mxu0  ;;  %v1498_v62 = vpop.f32.mrf.mxu1  ;;  %1529 = vmax.xlane.f32.xlu2 %v1528_v60 }
 0x799   : > { %v1531_v1 = vsel %vm663_vm14, %v1498_v62, -inf }
 0x79e   : > { %v1521_v0 = vpop.f32.mrf.mxu3 }
 0x79f   : > { %v1534_v10 = vsel %vm663_vm14, %v1521_v0, -inf }
 0x7a0   : > { %v1500_v2 = vpop.f32.mrf.mxu1  ;;  %1532 = vmax.xlane.f32.xlu2 %v1531_v1 }
 0x7a6   : > { %v1523_v7 = vpop.f32.mrf.mxu3 }
 0x7a8   : > { %1291 = vadd.xlane.f32.xlu2 %v1290_v9 }
 0x7af   : > { %v1009_v8 = vpop.xlane.xlu0 %1008 }
 0x7b0   : > { %2336 = vrcp.f32 %v1009_v8  ;;  %1535 = vmax.xlane.f32.xlu2 %v1534_v10  ;;  %v1400_v10 = vld [vmem:[#allocation5 + $0x8] sm:$0xf] }
 0x7b6   : > { %v2337_v11 = vpop.eup %2336 }
 0x7b7   : > { %v1023_v12 = vmul.f32 %v2337_v11, %v2333_v19 }
 0x7b9   : > { %v1027_v13 = vpack.c.bf16 %v1023_v12, %v1023_v12  ;;  %v1408_v12 = vsel %vm808_vm15, %v1400_v10, 0 }
 0x7bb   : > { %2100 = vmatmul.msk.bf16.vlgmr.msrb.gmra.mxu2 %vm663_vm14, %v1027_v13 }
 0x7c2   : > { %v1315_v15 = vpop.permute.xlu0 %1314 }
 0x7c3   : > { %v1320_v16 = vsel %vm808_vm15, %v1315_v15, 0 }
 0x7c4   : > { %1329 = vmatpush.bf16.msrb.mxu2 %v1320_v16 }
 0x7ca   : > { %v1574_v46 = vpop.permute.xlu0 %1573 }
 0x7cb   : > { %v1579_v47 = vsel %vm808_vm15, %v1574_v46, 0 }
 0x7cc   : > { %1588 = vmatpush.bf16.msra.mxu0 %v1579_v47 }
 0x803   : > { %v1527_v49 = vpop.xlane.xlu2 %1526 }
 0x804   : > { %v1537_v17 = vsub.f32 %v1452_v54, %v1527_v49 }
 0x806   : > { %v1541_v18 = vmul.f32 1.442695, %v1537_v17  ;;  %v1659_v17 = vld [vmem:[#allocation5 + $0xc] sm:$0xf] }
 0x808   : > { %2338 = vpow2.f32 %v1541_v18  ;;  %v1667_v18 = vsel %vm808_vm15, %v1659_v17, 0 }
 0x809   : > { %1676 = vmatpush.bf16.msrb.mxu0 %v1667_v18 }
 0x80b   : > { %v1530_v20 = vpop.xlane.xlu2 %1529 }
 0x80c   : > { %v1538_v21 = vsub.f32 %v1475_v56, %v1530_v20 }
 0x80e   : > { %v2339_v22 = vpop.eup %2338  ;;  %v1543_v23 = vmul.f32 1.442695, %v1538_v21 }
 0x80f   : > { %v1549_v25 = vsel %vm663_vm14, %v2339_v22, 0.0 }
 0x810   : > { %2340 = vpow2.f32 %v1543_v23  ;;  %1550 = vadd.xlane.f32.xlu1 %v1549_v25 }
 0x813   : > { %v1533_v26 = vpop.xlane.xlu2 %1532 }
 0x814   : > { %v1539_v27 = vsub.f32 %v1498_v62, %v1533_v26 }
 0x816   : > { %v2341_v30 = vpop.eup %2340  ;;  %v1545_v31 = vmul.f32 1.442695, %v1539_v27 }
 0x817   : > { %v1552_v32 = vsel %vm663_vm14, %v2341_v30, 0.0 }
 0x818   : > { %2342 = vpow2.f32 %v1545_v31  ;;  %1553 = vadd.xlane.f32.xlu2 %v1552_v32 }
 0x81b   : > { %v1292_v33 = vpop.xlane.xlu2 %1291 }
 0x81e   : > { %v2343_v35 = vpop.eup %2342 }
 0x81f   : > { %v1555_v36 = vsel %vm663_vm14, %v2343_v35, 0.0 }
 0x820   : > { %1556 = vadd.xlane.f32.xlu2 %v1555_v36  ;;  %v2364_v36 = vld [vmem:[%s2709_s19] sm:$0xff] }
 0x823   : > { %v1536_v29 = vpop.xlane.xlu2 %1535 }
 0x824   : > { %v1540_v59 = vsub.f32 %v1521_v0, %v1536_v29 }
 0x826   : > { %v1547_v19 = vmul.f32 1.442695, %v1540_v59 }
 0x828   : > { %2344 = vpow2.f32 %v1547_v19 }
 0x829   : > { %1636 = vrot.lane.b32.xlu1 %v2763_v48, %s2546_s22  ;;  %2346 = vrcp.f32 %v1292_v33 }
 0x82e   : > { %v2345_v38 = vpop.eup %2344 }
 0x82f   : > { %v1558_v45 = vsel %vm663_vm14, %v2345_v38, 0.0  ;;  %v2347_v48 = vpop.eup %2346 }
 0x830   : > { %1559 = vadd.xlane.f32.xlu0 %v1558_v45  ;;  %v1306_v55 = vmul.f32 %v2347_v48, %v2335_v3 }
 0x832   : > { %v1310_v56 = vpack.c.bf16 %v1306_v55, %v1306_v55 }
 0x838   : > { %1594 = vrot.lane.b32.xlu2 %v2766_v50, %s2546_s22  ;;  %s2075_s22 = sshll.u32 %s480_s30, 5 }
 0x839   : > { %s482_s24 = scalar_lea.vmem [#allocation8], %s2075_s22 }
 0x83a   : > { %s1969_s5 = sshll.u32 %s482_s24, 4  ;;  %s1970_s5 = int_to_ptr.vmem [resolvable:$true] %s1969_s5 }
 0x83e   : > { %v1048_v51 = vpop.f32.mrf.mxu2 }
 0x83f   : > { %v1115_v54 = vpack.c.bf16 %v2960_v34, %v1048_v51 }
 0x841   : > { %2104 = vmatmul.msk.bf16.vlgmr.msra.gmra.mxu2 %vm663_vm14, %v1115_v54 }
 0x842   : > { %1417 = vmatpush.bf16.msra.mxu2 %v1408_v12 }
 0x846   : > { %v1050_v37 = vpop.f32.mrf.mxu2 }
 0x847   : > { %v2365_v37 = vld [vmem:[%s2709_s19 + $0x8] sm:$0xff] }
 0x851   : > { %2105 = vmatmul.msk.bf16.gmra.mxu2 %vm663_vm14, %v1116_v6 }
 0x861   : > { %2112 = vmatmul.msk.bf16.vlgmr.msrb.gmra.mxu2 %vm663_vm14, %v1310_v56 }
 0x883   : > { %v1551_v57 = vpop.xlane.xlu1 %1550 }
 0x884   : > { %2348 = vrcp.f32 %v1551_v57 }
 0x88a   : > { %v2349_v50 = vpop.eup %2348 }
 0x88b   : > { %v1565_v58 = vmul.f32 %v2349_v50, %v2339_v22  ;;  %v1554_v60 = vpop.xlane.xlu2 %1553 }
 0x88c   : > { %2350 = vrcp.f32 %v1554_v60 }
 0x88d   : > { %v1569_v34 = vpack.c.bf16 %v1565_v58, %v1565_v58 }
 0x88f   : > { %2122 = vmatmul.msk.bf16.vlgmr.msra.gmra.mxu0 %vm663_vm14, %v1569_v34  ;;  %v2366_v34 = vld [vmem:[%s2709_s19 + $0x10] sm:$0xff] }
 0x892   : > { %v2351_v4 = vpop.eup %2350 }
 0x893   : > { %v1557_v61 = vpop.xlane.xlu2 %1556  ;;  %v1566_v6 = vmul.f32 %v2351_v4, %v2341_v30 }
 0x894   : > { %2352 = vrcp.f32 %v1557_v61 }
 0x895   : > { %v1570_v28 = vpack.c.bf16 %v1566_v6, %v1566_v6 }
 0x89a   : > { %v2353_v5 = vpop.eup %2352 }
 0x89b   : > { %v1567_v62 = vmul.f32 %v2353_v5, %v2343_v35  ;;  %v1637_v63 = vpop.permute.xlu1 %1636  ;;  %v1595_v0 = vpop.permute.xlu2 %1594  ;;  %v2277_v35 = vld [vmem:[%s3162_s6] ss:$0 sm:$0xff] }
 0x89c   : > { %v1642_v1 = vsel %vm808_vm15, %v1637_v63, 0  ;;  %v1600_v2 = vsel %vm808_vm15, %v1595_v0, 0 }
 0x89d   : > { %v1571_v41 = vpack.c.bf16 %v1567_v62, %v1567_v62  ;;  %1609 = vmatpush.bf16.msrb.mxu1 %v1600_v2  ;;  %1651 = vmatpush.bf16.msrb.mxu3 %v1642_v1  ;;  %v2367_v2 = vld [vmem:[%s2709_s19 + $0x18] sm:$0xff] }
 0x89f   : > { %2124 = vmatmul.msk.bf16.vlgmr.msra.gmra.mxu3 %vm663_vm14, %v1571_v41 }
 0x8a0   : > { %2123 = vmatmul.msk.bf16.vlgmr.msrb.gmra.mxu1 %vm663_vm14, %v1570_v28 }
 0x8a3   : > { %v1560_v3 = vpop.xlane.xlu0 %1559 }
 0x8a4   : > { %2354 = vrcp.f32 %v1560_v3 }
 0x8aa   : > { %v2355_v7 = vpop.eup %2354 }
 0x8ab   : > { %v1568_v9 = vmul.f32 %v2355_v7, %v2345_v38 }
 0x8ad   : > { %v1572_v8 = vpack.c.bf16 %v1568_v9, %v1568_v9 }
 0x8af   : > { %2125 = vmatmul.msk.bf16.vlgmr.msrb.gmra.mxu3 %vm663_vm14, %v1572_v8 }
 0x8c4   : > { %v1136_v11 = vpop.f32.mrf.mxu2 }
 0x8cc   : > { %v1138_v13 = vpop.f32.mrf.mxu2 }
 0x8cd   : > { %v1167_v19 = vadd.f32 %v2970_v40, %v1138_v13 }
 0x8d4   : > { %v1141_v15 = vpop.f32.mrf.mxu2 }
 0x8d5   : > { %v1170_v40 = vadd.f32 %v2972_v42, %v1141_v15 }
 0x8dc   : > { %v1143_v16 = vpop.f32.mrf.mxu2 }
 0x8dd   : > { %v1172_v5 = vadd.f32 %v2974_v43, %v1143_v16 }
 0x8e4   : > { %v1331_v46 = vpop.f32.mrf.mxu2 }
 0x8e5   : > { %v1398_v47 = vpack.c.bf16 %v2976_v24, %v1331_v46 }
 0x8e7   : > { %2116 = vmatmul.msk.bf16.vlgmr.msra.gmra.mxu2 %vm663_vm14, %v1398_v47 }
 0x8ec   : > { %v1333_v49 = vpop.f32.mrf.mxu2 }
 0x8f7   : > { %2117 = vmatmul.msk.bf16.gmra.mxu2 %vm663_vm14, %v1399_v53  ;;  %v1165_v53 = vadd.f32 %v2966_v39, %v1136_v11 }
 0x90c   : > { %v1590_v20 = vpop.f32.mrf.mxu0 }
 0x914   : > { %v1592_v21 = vpop.f32.mrf.mxu0 }
 0x91d   : > { %v1611_v22 = vpop.f32.mrf.mxu1 }
 0x91e   : > { %v1657_v23 = vpack.c.bf16 %v1611_v22, %v1590_v20 }
 0x920   : > { %2126 = vmatmul.msk.bf16.vlgmr.msrb.gmra.mxu0 %vm663_vm14, %v1657_v23 }
 0x922   : > { %v1632_v24 = vpop.f32.mrf.mxu3 }
 0x925   : > { %v1613_v25 = vpop.f32.mrf.mxu1 }
 0x92a   : > { %v1634_v26 = vpop.f32.mrf.mxu3 }
 0x932   : > { %v1653_v27 = vpop.f32.mrf.mxu3 }
 0x933   : > { %v1658_v30 = vpack.c.bf16 %v1653_v27, %v1632_v24  ;;  %v2178_v24 = vld [vmem:[#allocation7 + $0x8] sm:$0xff] }
 0x934   : > { %1842 = vmatpush.bf16.msra.mxu1 %v2178_v24 }
 0x935   : > { %2127 = vmatmul.msk.bf16.gmra.mxu0 %vm663_vm14, %v1658_v30  ;;  %v2177_v30 = vld [vmem:[#allocation7] sm:$0xff] }
 0x938   : > { %1843 = vmatpush.bf16.msra.mxu1 %v2177_v30  ;;  %v2182_v30 = vld [vmem:[%s3167_s11 + $0x18] sm:$0xff] }
 0x93a   : > { %v1655_v44 = vpop.f32.mrf.mxu3 }
 0x96a   : > { %v1419_v52 = vpop.f32.mrf.mxu2 }
 0x96b   : > { %v1429_v31 = vadd.f32 %v1419_v52, %v1165_v53 }
 0x972   : > { %v1421_v59 = vpop.f32.mrf.mxu2 }
 0x973   : > { %v1430_v45 = vadd.f32 %v1421_v59, %v1167_v19 }
 0x97a   : > { %v1424_v56 = vpop.f32.mrf.mxu2 }
 0x97b   : > { %v1431_v50 = vadd.f32 %v1424_v56, %v1170_v40 }
 0x982   : > { %v1426_v4 = vpop.f32.mrf.mxu2 }
 0x983   : > { %v1432_v62 = vadd.f32 %v1426_v4, %v1172_v5  ;;  %v2185_v4 = vld [vmem:[%s3167_s11 + $0x30] sm:$0xff]  ;;  %v2279_v5 = vld [vmem:[%s3164_s8] ss:$0 sm:$0xff] }
 0x99d   : > { %v1678_v32 = vpop.f32.mrf.mxu0 }
 0x99e   : > { %v1688_v33 = vadd.f32 %v1678_v32, %v1429_v31 }
 0x9a0   : > { %v1692_v29 = vadd.f32 %v2364_v36, %v1688_v33 }
 0x9a2   : > { %v3031_v38 = vadd.f32 %v2277_v35, %v1692_v29 }
 0x9a4   : > { %v1706_v51 = vsel %vm497_vm0, %v3031_v38, 0.0 }
 0x9a5   : > { %v1680_v39 = vpop.f32.mrf.mxu0  ;;  %1707 = vadd.xlane.f32.xlu2 %v1706_v51 }
 0x9a6   : > { %v1689_v54 = vadd.f32 %v1680_v39, %v1430_v45 }
 0x9a8   : > { %v1693_v48 = vadd.f32 %v2365_v37, %v1689_v54 }
 0x9aa   : > { %v3036_v55 = vadd.f32 %v2277_v35, %v1693_v48 }
 0x9ac   : > { %v1709_v57 = vsel %vm497_vm0, %v3036_v55, 0.0 }
 0x9ad   : > { %1710 = vadd.xlane.f32.xlu1 %v1709_v57  ;;  %v2278_v57 = vld [vmem:[%s3163_s7] ss:$0 sm:$0xff] }
 0x9b2   : > { %v1683_v58 = vpop.f32.mrf.mxu0 }
 0x9b3   : > { %v1690_v60 = vadd.f32 %v1683_v58, %v1431_v50  ;;  %v2186_v58 = vld [vmem:[%s3167_s11 + $0x38] sm:$0xff] }
 0x9b4   : > { %1929 = vmatpush.bf16.msrb.mxu2 %v2186_v58 }
 0x9b5   : > { %v1694_v61 = vadd.f32 %v2366_v34, %v1690_v60 }
 0x9b7   : > { %v3043_v6 = vadd.f32 %v2277_v35, %v1694_v61 }
 0x9b8   : > { %1930 = vmatpush.bf16.msrb.mxu2 %v2185_v4 }
 0x9b9   : > { %v1712_v63 = vsel %vm497_vm0, %v3043_v6, 0.0 }
 0x9ba   : > { %v1685_v0 = vpop.f32.mrf.mxu0  ;;  %1713 = vadd.xlane.f32.xlu0 %v1712_v63 }
 0x9bb   : > { %v1691_v1 = vadd.f32 %v1685_v0, %v1432_v62 }
 0x9bd   : > { %v1695_v41 = vadd.f32 %v2367_v2, %v1691_v1 }
 0x9bf   : > { %v3048_v42 = vadd.f32 %v2277_v35, %v1695_v41 }
 0x9c1   : > { %v1715_v28 = vsel %vm497_vm0, %v3048_v42, 0.0 }
 0x9c2   : > { %1716 = vadd.xlane.f32.xlu0 %v1715_v28 }
 0xa18   : > { %v1708_v3 = vpop.xlane.xlu2 %1707 }
 0xa19   : > { %v1718_v43 = vmul.f32 %v1708_v3, %v2719_v14 }
 0xa1b   : > { %v1722_v7 = vsub.f32 %v3031_v38, %v1718_v43 }
 0xa1d   : > { %v1726_v9 = vmul.f32 %v1722_v7, %v1722_v7 }
 0xa1f   : > { %v1730_v8 = vsel %vm497_vm0, %v1726_v9, 0.0 }
 0xa20   : > { %v1711_v10 = vpop.xlane.xlu1 %1710  ;;  %1731 = vadd.xlane.f32.xlu0 %v1730_v8  ;;  %v2183_v8 = vld [vmem:[%s3167_s11 + $0x20] sm:$0xff] }
 0xa21   : > { %v1719_v11 = vmul.f32 %v1711_v10, %v2719_v14 }
 0xa23   : > { %v1723_v12 = vsub.f32 %v3036_v55, %v1719_v11 }
 0xa25   : > { %v1727_v13 = vmul.f32 %v1723_v12, %v1723_v12 }
 0xa27   : > { %v1733_v15 = vsel %vm497_vm0, %v1727_v13, 0.0 }
 0xa28   : > { %1734 = vadd.xlane.f32.xlu2 %v1733_v15 }
 0xa2d   : > { %v1714_v16 = vpop.xlane.xlu0 %1713 }
 0xa2e   : > { %v1720_v46 = vmul.f32 %v1714_v16, %v2719_v14 }
 0xa30   : > { %v3060_v47 = vsub.f32 %v3043_v6, %v1720_v46 }
 0xa32   : > { %v1728_v49 = vmul.f32 %v3060_v47, %v3060_v47 }
 0xa34   : > { %v1736_v17 = vsel %vm497_vm0, %v1728_v49, 0.0 }
 0xa35   : > { %v1717_v18 = vpop.xlane.xlu0 %1716  ;;  %1737 = vadd.xlane.f32.xlu1 %v1736_v17 }
 0xa36   : > { %v1721_v20 = vmul.f32 %v1717_v18, %v2719_v14 }
 0xa38   : > { %v3067_v21 = vsub.f32 %v3048_v42, %v1721_v20 }
 0xa3a   : > { %v1729_v22 = vmul.f32 %v3067_v21, %v3067_v21 }
 0xa3c   : > { %v1739_v23 = vsel %vm497_vm0, %v1729_v22, 0.0 }
 0xa3d   : > { %1740 = vadd.xlane.f32.xlu0 %v1739_v23 }
 0xa93   : > { %v1732_v25 = vpop.xlane.xlu0 %1731 }
 0xa94   : > { %v1742_v26 = vmul.f32 %v1732_v25, %v2719_v14 }
 0xa96   : > { %v1746_v27 = vadd.f32 1e-05, %v1742_v26 }
 0xa98   : > { %2356 = vrsqrt.f32 %v1746_v27  ;;  %vm1756_vm2 = vweird.f32 %v1746_v27 }
 0xa9b   : > { %v1735_v44 = vpop.xlane.xlu2 %1734 }
 0xa9c   : > { %v1743_v52 = vmul.f32 %v1735_v44, %v2719_v14  ;;  %v2179_v44 = vld [vmem:[%s3167_s11] sm:$0xff] }
 0xa9e   : > { %v2357_v53 = vpop.eup %2356  ;;  %v1747_v31 = vadd.f32 1e-05, %v1743_v52 }
 0xa9f   : > { %v1751_v32 = vmul.f32 %v2357_v53, %v1746_v27  ;;  %vm1757_vm1 = vweird.f32 %v2357_v53 }
 0xaa0   : > { %2358 = vrsqrt.f32 %v1747_v31  ;;  %vm1758_vm3 = vmor %vm1756_vm2, %vm1757_vm1  ;;  %vm1766_vm5 = vweird.f32 %v1747_v31 }
 0xaa1   : > { %v1752_v33 = vmul.f32 %v2357_v53, %v1751_v32 }
 0xaa3   : > { %v1753_v35 = vmul.f32 0.5, %v1752_v33 }
 0xaa5   : > { %v1754_v36 = vsub.f32 1.5, %v1753_v35 }
 0xaa6   : > { %v2359_v29 = vpop.eup %2358 }
 0xaa7   : > { %v1755_v59 = vmul.f32 %v2357_v53, %v1754_v36  ;;  %v1761_v19 = vmul.f32 %v2359_v29, %v1747_v31  ;;  %vm1767_vm4 = vweird.f32 %v2359_v29 }
 0xaa8   : > { %v1738_v45 = vpop.xlane.xlu1 %1737  ;;  %vm1768_vm6 = vmor %vm1766_vm5, %vm1767_vm4 }
 0xaa9   : > { %v1762_v51 = vmul.f32 %v2359_v29, %v1761_v19  ;;  %v1744_v39 = vmul.f32 %v1738_v45, %v2719_v14  ;;  %v1759_v54 = vsel %vm1758_vm3, %v2357_v53, %v1755_v59  ;;  %v2280_v53 = vld [vmem:[%s3166_s10] ss:$0 sm:$0xff] }
 0xaaa   : > { %v1790_v40 = vmul.f32 %v1759_v54, %v1722_v7 }
 0xaab   : > { %v1763_v37 = vmul.f32 0.5, %v1762_v51  ;;  %v1748_v48 = vadd.f32 1e-05, %v1744_v39 }
 0xaac   : > { %v1797_v62 = vmul.f32 %v2278_v57, %v1790_v40 }
 0xaad   : > { %v1764_v56 = vsub.f32 1.5, %v1763_v37  ;;  %2360 = vrsqrt.f32 %v1748_v48  ;;  %vm1776_vm8 = vweird.f32 %v1748_v48 }
 0xaae   : > { %v1804_v28 = vadd.f32 %v2279_v5, %v1797_v62 }
 0xaaf   : > { %v1765_v50 = vmul.f32 %v2359_v29, %v1764_v56 }
 0xab0   : > { %v1741_v60 = vpop.xlane.xlu0 %1740 }
 0xab1   : > { %v1769_v34 = vsel %vm1768_vm6, %v2359_v29, %v1765_v50  ;;  %v1745_v61 = vmul.f32 %v1741_v60, %v2719_v14  ;;  %v2184_v14 = vld [vmem:[%s3167_s11 + $0x28] sm:$0xff] }
 0xab2   : > { %v1791_v63 = vmul.f32 %v1769_v34, %v1723_v12  ;;  %1931 = vmatpush.bf16.msrb.mxu2 %v2184_v14 }
 0xab3   : > { %v2361_v0 = vpop.eup %2360  ;;  %v1749_v1 = vadd.f32 1e-05, %v1745_v61 }
 0xab4   : > { %v1798_v2 = vmul.f32 %v2278_v57, %v1791_v63  ;;  %v1771_v41 = vmul.f32 %v2361_v0, %v1748_v48  ;;  %vm1777_vm7 = vweird.f32 %v2361_v0  ;;  %v2281_v48 = vld [vmem:[%s3168_s12] ss:$0 sm:$0xff] }
 0xab5   : > { %2362 = vrsqrt.f32 %v1749_v1  ;;  %vm1778_vm9 = vmor %vm1776_vm8, %vm1777_vm7  ;;  %vm1786_vm11 = vweird.f32 %v1749_v1 }
 0xab6   : > { %v1805_v3 = vadd.f32 %v2279_v5, %v1798_v2  ;;  %v1772_v43 = vmul.f32 %v2361_v0, %v1771_v41  ;;  %1932 = vmatpush.bf16.msrb.mxu2 %v2183_v8 }
 0xab8   : > { %v1773_v7 = vmul.f32 0.5, %v1772_v43  ;;  %v1808_v9 = vpack.c.bf16 %v1805_v3, %v1804_v28 }
 0xaba   : > { %v1774_v10 = vsub.f32 1.5, %v1773_v7  ;;  %2136 = vmatmul.msk.bf16.vlgmr.msra.gmra.mxu1 %vm497_vm0, %v1808_v9  ;;  %1933 = vmatpush.bf16.msrb.mxu2 %v2182_v30 }
 0xabb   : > { %v2363_v11 = vpop.eup %2362 }
 0xabc   : > { %v1775_v12 = vmul.f32 %v2361_v0, %v1774_v10  ;;  %v1781_v13 = vmul.f32 %v2363_v11, %v1749_v1  ;;  %vm1787_vm10 = vweird.f32 %v2363_v11 }
 0xabd   : > { %vm1788_vm12 = vmor %vm1786_vm11, %vm1787_vm10 }
 0xabe   : > { %v1782_v15 = vmul.f32 %v2363_v11, %v1781_v13  ;;  %v1779_v16 = vsel %vm1778_vm9, %v2361_v0, %v1775_v12 }
 0xabf   : > { %v1792_v17 = vmul.f32 %v1779_v16, %v3060_v47  ;;  %v2181_v47 = vld [vmem:[%s3167_s11 + $0x10] sm:$0xff] }
 0xac0   : > { %v1783_v46 = vmul.f32 0.5, %v1782_v15  ;;  %1934 = vmatpush.bf16.msrb.mxu2 %v2181_v47 }
 0xac1   : > { %v1799_v23 = vmul.f32 %v2278_v57, %v1792_v17 }
 0xac2   : > { %v1784_v49 = vsub.f32 1.5, %v1783_v46 }
 0xac3   : > { %v1806_v25 = vadd.f32 %v2279_v5, %v1799_v23 }
 0xac4   : > { %v1785_v18 = vmul.f32 %v2363_v11, %v1784_v49 }
 0xac6   : > { %v1789_v20 = vsel %vm1788_vm12, %v2363_v11, %v1785_v18 }
 0xac7   : > { %v1793_v22 = vmul.f32 %v1789_v20, %v3067_v21  ;;  %v2180_v21 = vld [vmem:[%s3167_s11 + $0x8] sm:$0xff] }
 0xac8   : > { %1935 = vmatpush.bf16.msrb.mxu2 %v2180_v21 }
 0xac9   : > { %v1800_v24 = vmul.f32 %v2278_v57, %v1793_v22 }
 0xacb   : > { %v1807_v26 = vadd.f32 %v2279_v5, %v1800_v24 }
 0xacc   : > { %1936 = vmatpush.bf16.msrb.mxu2 %v2179_v44 }
 0xacd   : > { %v1809_v27 = vpack.c.bf16 %v1807_v26, %v1806_v25 }
 0xacf   : > { %2137 = vmatmul.msk.bf16.gmra.mxu1 %vm497_vm0, %v1809_v27 }
 0xb37   : > { %v1845_v52 = vpop.f32.mrf.mxu1 }
 0xb38   : > { %v1846_v31 = vadd.f32 %v2280_v53, %v1845_v52 }
 0xb3a   : > { %v1855_v35 = vmax.f32 %v1846_v31, 0.0 }
 0xb3f   : > { %v1847_v32 = vpop.f32.mrf.mxu1 }
 0xb40   : > { %v1848_v33 = vadd.f32 %v2280_v53, %v1847_v32 }
 0xb42   : > { %v1856_v36 = vmax.f32 %v1848_v33, 0.0 }
 0xb44   : > { %v1859_v29 = vpack.c.bf16 %v1856_v36, %v1855_v35 }
 0xb46   : > { %1937 = vmatmul.bf16.vlgmr.msrb.gmra.mxu2 %v1859_v29 }
 0xb4c   : > { %v1850_v59 = vpop.f32.mrf.mxu1 }
 0xb4d   : > { %v1851_v19 = vadd.f32 %v2280_v53, %v1850_v59 }
 0xb4f   : > { %v1857_v39 = vmax.f32 %v1851_v19, 0.0 }
 0xb54   : > { %v1852_v45 = vpop.f32.mrf.mxu1 }
 0xb55   : > { %v1853_v51 = vadd.f32 %v2280_v53, %v1852_v45 }
 0xb57   : > { %v1858_v54 = vmax.f32 %v1853_v51, 0.0 }
 0xb59   : > { %v1860_v37 = vpack.c.bf16 %v1858_v54, %v1857_v39 }
 0xb5b   : > { %1942 = vmatmul.bf16.gmra.mxu2 %v1860_v37 }
 0xbc9   : > { %v1938_v56 = vpop.f32.mrf.mxu2 }
 0xbca   : > { %v1939_v57 = vadd.f32 %v2281_v48, %v1938_v56 }
 0xbcc   : > { %v1948_v40 = vadd.f32 %v1939_v57, %v3031_v38 }
 0xbce   : > { %1952 = vst.msk [vmem:[%s482_s24] sm:$0xff] %vm497_vm0, %v1948_v40 }
 0xbd1   : > { %v1940_v50 = vpop.f32.mrf.mxu2 }
 0xbd2   : > { %v1941_v58 = vadd.f32 %v2281_v48, %v1940_v50 }
 0xbd4   : > { %v1949_v60 = vadd.f32 %v1941_v58, %v3036_v55 }
 0xbd6   : > { %1953 = vst.msk [vmem:[%s482_s24 + $0x8] sm:$0xff] %vm497_vm0, %v1949_v60 }
 0xbde   : > { %v1943_v34 = vpop.f32.mrf.mxu2 }
 0xbdf   : > { %v1944_v61 = vadd.f32 %v2281_v48, %v1943_v34 }
 0xbe1   : > { %v1950_v4 = vadd.f32 %v1944_v61, %v3043_v6 }
 0xbe3   : > { %1954 = vst.msk [vmem:[%s482_s24 + $0x10] sm:$0xff] %vm497_vm0, %v1950_v4 }
 0xbe6   : > { %v1945_v38 = vpop.f32.mrf.mxu2 }
 0xbe7   : > { %v1946_v5 = vadd.f32 %v2281_v48, %v1945_v38 }
 0xbe9   : > { %v1951_v55 = vadd.f32 %v1946_v5, %v3048_v42 }
 0xbeb   : > { %1955 = vst.msk [vmem:[%s482_s24 + $0x18] sm:$0xff] %vm497_vm0, %v1951_v55 }
 0xbec   : > { %2485 = shalt.err (!%p2482_p8)
}
 0xbed   : > { %s2547_s30 = smov 128   ;;  %s2548_s24 = smov 8  }
 0xbee   : > { %2200 = dma.vmem_to_hbm [thread:$0]  (%p2657_p5), %s1970_s5, 512, %s1972_s25, %s1957_s29, %s2547_s30, %s2547_s30, %s2548_s24  }
 0xbef PF: > { %s3186_s19 = sld [smem:[#allocation12_spill]]  ;;  %p2222_p9 = scmp.ge.s32.totalorder %s2528_s28, 2 }
 0xbf1   : > { %p2213_p10 = pnand %p2222_p9, %p2661_p6 }
 0xbf3   : > { %p2214_p11 = pneg %p2213_p10 }
 0xbf5   : > { %s1986_s27 = sand.u32 1, %s3186_s19  }
 0xbf6   : > { %s1987_s23 = scalar_lea.sflag [#allocation4], %s1986_s27 }
 0xbf7   : > { %2511 = dma.done.wait (%p2214_p11), %s1987_s23, 512  }
 0xbf8   : > { %2513 = vsyncadd (%p2214_p11), %s1987_s23, 4294966784  ;;  %s3188_s28 = sld [smem:[#allocation14_spill]]  ;;  %s3191_s25 = smov %s2520_s26 }
 0xbf9   : > { %s3189_s14 = sld [smem:[#allocation13_spill]] }
 0xbfa   : > { %s3190_s27 = sld [smem:[#allocation15_spill]] }
 0xbfe   : > { %p25_p12 = scmp.ge.s32.totalorder %s3188_s28, 4  }
 0xbff   : > { %s3192_s26 = smov %s3189_s14 }
 0xc00   :  { %27 = sbr.rel (!%p25_p12) target bundleno = 7 (0x7), region = 120 }
 0xc05   :  { %1993 = vsyncpa [#allocation3], 1 }
 0xc06   :  { %1995 = vsyncpa [#allocation3 + $0x1], 1 }
 0xc07   :  { %1996 = vsyncpa [#allocation6], 1 }
 0xc08   :  { %1997 = vsyncpa [#allocation4], 1 }
 0xc09   :  { %1999 = vsyncpa [#allocation4 + $0x1], 1 }

// kernel: tpu_custom_call.1
= control target key start
LH: loop header
LB: loop body
LE: loop exit
PB: predicated region body
PF: predicated region fallthrough
CT: control target
= control target key end

     0   :  { %s3156_s0 = inlined_call_operand.vmem [shape: f32[8,8,32], index: 0, kind: input, shape index: {}]   ;;  %s3157_s1 = inlined_call_operand.hbm [shape: f32[1,32], index: 1, kind: input, shape index: {}]   ;;  %s3158_s2 = inlined_call_operand.vmem [shape: f32[1,32], index: 2, kind: input, shape index: {}]   ;;  %s3159_s3 = inlined_call_operand.vmem [shape: bf16[32,96], index: 3, kind: input, shape index: {}]   ;;  %s3160_s4 = inlined_call_operand.vmem [shape: f32[1,96], index: 4, kind: input, shape index: {}]   ;;  %s3161_s5 = inlined_call_operand.hbm [shape: bf16[32,32], index: 5, kind: input, shape index: {}]   ;;  %s3162_s6 = inlined_call_operand.vmem [shape: f32[1,32], index: 6, kind: input, shape index: {}]   ;;  %s3163_s7 = inlined_call_operand.vmem [shape: f32[1,32], index: 7, kind: input, shape index: {}]   ;;  %s3164_s8 = inlined_call_operand.vmem [shape: f32[1,32], index: 8, kind: input, shape index: {}]   ;;  %s3165_s9 = inlined_call_operand.hbm [shape: bf16[32,128], index: 9, kind: input, shape index: {}]   ;;  %s3166_s10 = inlined_call_operand.vmem [shape: f32[1,128], index: 10, kind: input, shape index: {}]   ;;  %s3167_s11 = inlined_call_operand.vmem [shape: bf16[128,32], index: 11, kind: input, shape index: {}]   ;;  %s3168_s12 = inlined_call_operand.vmem [shape: f32[1,32], index: 12, kind: input, shape index: {}]   ;;  %s3169_s13 = inlined_call_operand.hbm [shape: f32[8,8,32], index: 13, kind: output, shape index: {}]  }
   0x1   :  { %3175 = sst [smem:[#allocation17_spill]] %s3161_s5 }
   0x2   :  { %18 = vsyncpa [#allocation3], 0 }
   0x3   :  { %19 = vsyncpa [#allocation6], 0 }
   0x4   :  { %20 = vsyncpa [#allocation4], 0 }
   0x5   :  { %22 = vsyncpa [#allocation4 + $0x1], 0  ;;  %s2619_s25 = smov 0   ;;  %s2621_s26 = smov 0  }
   0x6   :  { %s2623_s27 = smov 0   ;;  %s2625_s28 = smov 0  }
   0x7 LB: > { %3176 = sst [smem:[#allocation12_spill]] %s2516_s25  ;;  %s2640_s29 = sadd.s32 4294967295, %s2528_s28   ;;  %s2528_s28 = sphi %s2625_s28, %s3188_s28   ;;  %s2524_s27 = sphi %s2623_s27, %s3190_s27   ;;  %s2520_s26 = sphi %s2621_s26, %s3192_s26   ;;  %s2516_s25 = sphi %s2619_s25, %s3191_s25  }
   0x8   : > { %3177 = sst [smem:[#allocation13_spill]] %s2524_s27  ;;  %s2065_s30 = sadd.s32 4294967294, %s2528_s28  }
   0x9   : > { %s2644_s14 = sadd.s32 1, %s2528_s28   ;;  %s313_s15 = sadd.s32 1, %s2524_s27 }
   0xa   : > { %3178 = sst [smem:[#allocation14_spill]] %s2644_s14  ;;  %s310_s16 = ssub.s32 %s2528_s28, %s2644_s14 }
   0xb   : > { %p323_p0 = scmp.ne.s32.totalorder %s2524_s27, %s2520_s26  ;;  %p311_p1 = scmp.eq.s32.totalorder %s310_s16, 0 }
   0xc   : > { %p324_p2 = scmp.eq.s32.totalorder %s2640_s29, 1  ;;  %p329_p3 = scmp.ne.s32.totalorder %s2520_s26, %s2516_s25 }
   0xd   : > { %p330_p4 = scmp.eq.s32.totalorder %s2065_s30, 1  ;;  %p2066_p7 = scmp.ge.s32.totalorder %s2528_s28, 1 }
   0xe   : > { %s2655_s17 = scalar_select %p311_p1, %s2524_s27, %s313_s15  }
   0xf   : > { %p2657_p5 = por %p324_p2, %p323_p0  ;;  %p2661_p6 = por %p330_p4, %p329_p3 }
  0x10   : > { %3179 = sst [smem:[#allocation15_spill]] %s2655_s17  ;;  %p337_p8 = scmp.lt.s32.totalorder %s2528_s28, 3 }
  0x11   : > { %s3181_s19 = scalar_select %p2661_p6, 1, 0 }
  0x12   : > { %p2216_p9 = scmp.eq.s32.totalorder %s2640_s29, 0  ;;  %p2668_p10 = pnand %p2066_p7, %p337_p8 }
  0x13   : > { %3182 = sst [smem:[#allocation16_spill]] %s3181_s19  ;;  %s2530_s24 = smov [#allocation5]  }
  0x14   : > { %s3184_s5 = sld [smem:[#allocation17_spill]]  ;;  %p2202_p11 = pneg %p2668_p10 }
  0x15   : > { %s371_s30 = sshll.u32 %s2530_s24, 4  ;;  %s349_s21 = sshll.u32 %s3157_s1, 4  ;;  %s372_s30 = int_to_ptr.vmem [resolvable:$true] %s371_s30  ;;  %s350_s21 = int_to_ptr.hbm [resolvable:$true] %s349_s21 }
  0x16   : > { %p2679_p12 = pnand %p2216_p9, %p2202_p11  ;;  %s2531_s22 = smov 64  }
  0x17   : > { %s2533_s27 = smov [#allocation2]   ;;  %s392_s25 = sshll.u32 %s3165_s9, 4  ;;  %s393_s25 = int_to_ptr.hbm [resolvable:$true] %s392_s25 }
  0x18   : > { %s351_s24 = sshll.u32 %s2533_s27, 4  ;;  %s2534_s17 = smov [#allocation7]   ;;  %s352_s24 = int_to_ptr.vmem [resolvable:$true] %s351_s24 }
  0x19   : > { %2205 = dma.hbm_to_vmem [thread:$0]  (!%p2679_p12), %s350_s21, 16, %s352_s24, [#allocation3]  }
  0x1a   : > { %s369_s23 = sshll.u32 %s3184_s5, 4  ;;  %s2532_s5 = smov 4   ;;  %s370_s23 = int_to_ptr.hbm [resolvable:$true] %s369_s23 }
  0x1b   : > { %2208 = dma.hbm_to_vmem [thread:$0]  (!%p2679_p12), %s370_s23, 256, %s372_s30, [#allocation6], %s2531_s22, %s2531_s22, %s2532_s5  }
  0x1c   : > { %s394_s16 = sshll.u32 %s2534_s17, 4  ;;  %428 = sbr.rel (%p2668_p10) target bundleno = 3055 (0xbef), region = 72  ;;  %s395_s16 = int_to_ptr.vmem [resolvable:$true] %s394_s16 }
  0x1d   : > { %2211 = dma.hbm_to_vmem [thread:$0]  (!%p2679_p12), %s393_s25, 256, %s395_s16, [#allocation6], %s2531_s22, %s2531_s22, %s2532_s5  }
  0x21   : > { %2503 = dma.done.wait (%p2216_p9), [#allocation3], 16  }
  0x22   : > { %2505 = vsyncadd (%p2216_p9), [#allocation3], 4294967280 }
  0x23   : > { %2507 = dma.done.wait (%p2216_p9), [#allocation6], 512  }
  0x24   : > { %2509 = vsyncadd (%p2216_p9), [#allocation6], 4294966784  ;;  %s2076_s27 = sshll.u32 %s2640_s29, 2  ;;  %vm497_vm0 = vcmask 261120   ;;  %v2535_v8 = vmov 32.0   ;;  %v2176_v35 = vld [vmem:[%s3159_s3 + $0x8] sm:$0xff] }
  0x25   : > { %p484_p13 = scmp.lt.s32.totalorder %s2076_s27, 7  ;;  %2282 = vrcp.f32 %v2535_v8  ;;  %641 = vmatpush.bf16.msra.mxu0 %v2176_v35  ;;  %v2175_v39 = vld [vmem:[%s3159_s3] sm:$0xff]  ;;  %s2536_s16 = smov 96   ;;  %vm663_vm14 = vcmask 64512   ;;  %vm808_vm15 = vcmask 1043456  }
  0x26   : > { %s2539_s25 = smov 120   ;;  %s2540_s14 = smov 112  }
  0x27   : > { %s3194_s27 = smov (!%p484_p13, %s2076_s27), 7  ;;  %s2541_s20 = smov 56  }
  0x28   : > { %s2077_s5 = sshll.u32 %s3194_s27, 3  ;;  %s2537_s27 = smov 64  }
  0x29   : > { %s2709_s19 = scalar_lea.vmem %s3156_s0, %s2077_s5  ;;  %642 = vmatpush.bf16.msra.mxu0 %v2175_v39  ;;  %s2538_s5 = smov 88  }
  0x2a   : > { %v493_v0 = vld [vmem:[%s2709_s19 + $0x10] sm:$0xff]  ;;  %v491_v1 = vld [vmem:[%s2709_s19] sm:$0xff]  ;;  %v494_v4 = vld [vmem:[%s2709_s19 + $0x18] sm:$0xff]  ;;  %s2542_s23 = smov 80   ;;  %s2543_s30 = smov 48  }
  0x2b   : > { %v504_v2 = vsel %vm497_vm0, %v493_v0, 0.0  ;;  %v498_v3 = vsel %vm497_vm0, %v491_v1, 0.0  ;;  %v492_v5 = vld [vmem:[%s2709_s19 + $0x8] sm:$0xff]  ;;  %v507_v6 = vsel %vm497_vm0, %v494_v4, 0.0  ;;  %v2283_v9 = vpop.eup %2282  ;;  %s2544_s15 = smov 104   ;;  %s2545_s21 = smov 72  }
  0x2c   : > { %505 = vadd.xlane.f32.xlu1 %v504_v2  ;;  %499 = vadd.xlane.f32.xlu0 %v498_v3  ;;  %v501_v7 = vsel %vm497_vm0, %v492_v5, 0.0  ;;  %v511_v10 = vmul.f32 32.0, %v2283_v9  ;;  %vm515_vm1 = vweird.f32 %v2283_v9  ;;  %s2546_s22 = smov 40   ;;  %s2187_s17 = sshll.u32 %s2640_s29, 5 }
  0x2e   : > { %v512_v11 = vsub.f32 1.0, %v511_v10 }
  0x30   : > { %v513_v12 = vmul.f32 %v2283_v9, %v512_v11 }
  0x32   : > { %v514_v13 = vadd.f32 %v2283_v9, %v513_v12  ;;  %v2275_v12 = vld [vmem:[%s3158_s2] ss:$0 sm:$0xff] }
  0x34   : > { %508 = vadd.xlane.f32.xlu1 %v507_v6  ;;  %502 = vadd.xlane.f32.xlu0 %v501_v7  ;;  %v2719_v14 = vsel %vm515_vm1, %v2283_v9, %v514_v13 }
  0x9f   : > { %v506_v15 = vpop.xlane.xlu1 %505  ;;  %v500_v16 = vpop.xlane.xlu0 %499 }
  0xa0   : > { %v519_v17 = vmul.f32 %v2719_v14, %v506_v15  ;;  %v517_v18 = vmul.f32 %v2719_v14, %v500_v16 }
  0xa2   : > { %v2723_v19 = vsub.f32 %v493_v0, %v519_v17  ;;  %v521_v20 = vsub.f32 %v491_v1, %v517_v18 }
  0xa4   : > { %v527_v21 = vmul.f32 %v2723_v19, %v2723_v19  ;;  %v525_v22 = vmul.f32 %v521_v20, %v521_v20 }
  0xa6   : > { %v535_v23 = vsel %vm497_vm0, %v527_v21, 0.0  ;;  %v529_v24 = vsel %vm497_vm0, %v525_v22, 0.0 }
  0xa7   : > { %v509_v25 = vpop.xlane.xlu1 %508  ;;  %536 = vadd.xlane.f32.xlu0 %v535_v23  ;;  %530 = vadd.xlane.f32.xlu2 %v529_v24  ;;  %v503_v26 = vpop.xlane.xlu0 %502 }
  0xa8   : > { %v520_v27 = vmul.f32 %v2719_v14, %v509_v25  ;;  %v518_v28 = vmul.f32 %v2719_v14, %v503_v26 }
  0xaa   : > { %v2731_v29 = vsub.f32 %v494_v4, %v520_v27  ;;  %v522_v30 = vsub.f32 %v492_v5, %v518_v28  ;;  %v2274_v5 = vld [vmem:[#allocation2] ss:$0 sm:$0xff] }
  0xac   : > { %v528_v31 = vmul.f32 %v2731_v29, %v2731_v29  ;;  %v526_v32 = vmul.f32 %v522_v30, %v522_v30 }
  0xae   : > { %v538_v33 = vsel %vm497_vm0, %v528_v31, 0.0  ;;  %v532_v34 = vsel %vm497_vm0, %v526_v32, 0.0  ;;  %v2276_v32 = vld [vmem:[%s3160_s4] ss:$0 sm:$0xff] }
  0xaf   : > { %539 = vadd.xlane.f32.xlu1 %v538_v33  ;;  %533 = vadd.xlane.f32.xlu2 %v532_v34 }
 0x11a   : > { %v531_v36 = vpop.xlane.xlu2 %530  ;;  %v537_v38 = vpop.xlane.xlu0 %536 }
 0x11b   : > { %v541_v37 = vmul.f32 %v531_v36, %v2719_v14  ;;  %v543_v41 = vmul.f32 %v537_v38, %v2719_v14 }
 0x11d   : > { %v545_v40 = vadd.f32 1e-05, %v541_v37  ;;  %v547_v42 = vadd.f32 1e-05, %v543_v41 }
 0x11f   : > { %2284 = vrsqrt.f32 %v545_v40  ;;  %vm555_vm3 = vweird.f32 %v545_v40  ;;  %vm575_vm10 = vweird.f32 %v547_v42 }
 0x120   : > { %2286 = vrsqrt.f32 %v547_v42 }
 0x122   : > { %v540_v43 = vpop.xlane.xlu1 %539  ;;  %v534_v44 = vpop.xlane.xlu2 %533 }
 0x123   : > { %v544_v45 = vmul.f32 %v540_v43, %v2719_v14  ;;  %v542_v46 = vmul.f32 %v534_v44, %v2719_v14 }
 0x125   : > { %v2285_v47 = vpop.eup %2284  ;;  %v548_v48 = vadd.f32 1e-05, %v544_v45  ;;  %v546_v49 = vadd.f32 1e-05, %v542_v46 }
 0x126   : > { %v550_v50 = vmul.f32 %v2285_v47, %v545_v40  ;;  %v2287_v53 = vpop.eup %2286  ;;  %vm556_vm2 = vweird.f32 %v2285_v47 }
 0x127   : > { %2288 = vrsqrt.f32 %v548_v48  ;;  %v570_v59 = vmul.f32 %v2287_v53, %v547_v42  ;;  %vm557_vm4 = vmor %vm555_vm3, %vm556_vm2  ;;  %vm565_vm6 = vweird.f32 %v546_v49  ;;  %vm585_vm8 = vweird.f32 %v548_v48 }
 0x128   : > { %v551_v51 = vmul.f32 %v2285_v47, %v550_v50  ;;  %2290 = vrsqrt.f32 %v546_v49  ;;  %vm576_vm11 = vweird.f32 %v2287_v53 }
 0x129   : > { %v571_v0 = vmul.f32 %v2287_v53, %v570_v59  ;;  %vm577_vm13 = vmor %vm575_vm10, %vm576_vm11 }
 0x12a   : > { %v552_v52 = vmul.f32 0.5, %v551_v51 }
 0x12b   : > { %v572_v6 = vmul.f32 0.5, %v571_v0 }
 0x12c   : > { %v553_v54 = vsub.f32 1.5, %v552_v52 }
 0x12d   : > { %v2289_v55 = vpop.eup %2288  ;;  %v573_v13 = vsub.f32 1.5, %v572_v6 }
 0x12e   : > { %v2291_v56 = vpop.eup %2290  ;;  %v580_v57 = vmul.f32 %v2289_v55, %v548_v48  ;;  %v554_v58 = vmul.f32 %v2285_v47, %v553_v54  ;;  %vm586_vm9 = vweird.f32 %v2289_v55 }
 0x12f   : > { %v560_v60 = vmul.f32 %v2291_v56, %v546_v49  ;;  %vm566_vm5 = vweird.f32 %v2291_v56  ;;  %vm587_vm12 = vmor %vm585_vm8, %vm586_vm9 }
 0x130   : > { %v581_v61 = vmul.f32 %v2289_v55, %v580_v57  ;;  %v558_v63 = vsel %vm557_vm4, %v2285_v47, %v554_v58  ;;  %vm567_vm7 = vmor %vm565_vm6, %vm566_vm5 }
 0x131   : > { %v561_v62 = vmul.f32 %v2291_v56, %v560_v60  ;;  %v589_v4 = vmul.f32 %v558_v63, %v521_v20  ;;  %v574_v20 = vmul.f32 %v2287_v53, %v573_v13 }
 0x132   : > { %v582_v2 = vmul.f32 0.5, %v581_v61 }
 0x133   : > { %v562_v1 = vmul.f32 0.5, %v561_v62  ;;  %v596_v11 = vmul.f32 %v2274_v5, %v589_v4  ;;  %v578_v23 = vsel %vm577_vm13, %v2287_v53, %v574_v20 }
 0x134   : > { %v583_v8 = vsub.f32 1.5, %v582_v2  ;;  %v591_v25 = vmul.f32 %v578_v23, %v2723_v19 }
 0x135   : > { %v563_v3 = vsub.f32 1.5, %v562_v1  ;;  %v603_v17 = vadd.f32 %v2275_v12, %v596_v11 }
 0x136   : > { %v584_v16 = vmul.f32 %v2289_v55, %v583_v8  ;;  %v598_v27 = vmul.f32 %v2274_v5, %v591_v25 }
 0x137   : > { %v564_v7 = vmul.f32 %v2291_v56, %v563_v3 }
 0x138   : > { %v588_v22 = vsel %vm587_vm12, %v2289_v55, %v584_v16 }
 0x139   : > { %v568_v9 = vsel %vm567_vm7, %v2291_v56, %v564_v7  ;;  %v592_v24 = vmul.f32 %v588_v22, %v2731_v29 }
 0x13a   : > { %v590_v10 = vmul.f32 %v568_v9, %v522_v30  ;;  %v605_v30 = vadd.f32 %v2275_v12, %v598_v27 }
 0x13b   : > { %v599_v26 = vmul.f32 %v2274_v5, %v592_v24 }
 0x13c   : > { %v597_v15 = vmul.f32 %v2274_v5, %v590_v10 }
 0x13d   : > { %v606_v28 = vadd.f32 %v2275_v12, %v599_v26 }
 0x13e   : > { %v604_v18 = vadd.f32 %v2275_v12, %v597_v15 }
 0x13f   : > { %v608_v31 = vpack.c.bf16 %v606_v28, %v605_v30 }
 0x140   : > { %v607_v21 = vpack.c.bf16 %v604_v18, %v603_v17 }
 0x142   : > { %2086 = vmatmul.msk.bf16.vlgmr.msra.gmra.mxu0 %vm497_vm0, %v607_v21 }
 0x152   : > { %2087 = vmatmul.msk.bf16.gmra.mxu0 %vm497_vm0, %v608_v31 }
 0x1bf   : > { %v644_v33 = vpop.f32.mrf.mxu0 }
 0x1c0   : > { %v645_v34 = vadd.f32 %v2276_v32, %v644_v33 }
 0x1c2   : > { %v654_v35 = vpack.c.bf16 %v645_v34, %v645_v34 }
 0x1c4   : > { %v659_v36 = vunpack.c.l.b16 %v654_v35 }
 0x1c6   : > { %v2757_v37 = vpack.c.b16 %v659_v36, %v659_v36 }
 0x1c7   : > { %v646_v29 = vpop.f32.mrf.mxu0 }
 0x1c8   : > { %661 = vrot.lane.b32.xlu2 %v2757_v37, %s2536_s16  ;;  %v647_v44 = vadd.f32 %v2276_v32, %v646_v29 }
 0x1ca   : > { %v655_v47 = vpack.c.bf16 %v647_v44, %v647_v44 }
 0x1cc   : > { %v684_v49 = vunpack.c.l.b16 %v655_v47 }
 0x1ce   : > { %v2766_v50 = vpack.c.b16 %v684_v49, %v684_v49 }
 0x1cf   : > { %v649_v19 = vpop.f32.mrf.mxu0 }
 0x1d0   : > { %v650_v38 = vadd.f32 %v2276_v32, %v649_v19 }
 0x1d2   : > { %v656_v39 = vpack.c.bf16 %v650_v38, %v650_v38 }
 0x1d4   : > { %v708_v40 = vunpack.c.l.b16 %v656_v39 }
 0x1d6   : > { %v2760_v41 = vpack.c.b16 %v708_v40, %v708_v40 }
 0x1d7   : > { %v651_v42 = vpop.f32.mrf.mxu0 }
 0x1d8   : > { %v652_v43 = vadd.f32 %v2276_v32, %v651_v42  ;;  %710 = vrot.lane.b32.xlu0 %v2760_v41, %s2536_s16 }
 0x1da   : > { %v657_v45 = vpack.c.bf16 %v652_v43, %v652_v43 }
 0x1dc   : > { %v732_v46 = vunpack.c.l.b16 %v657_v45 }
 0x1de   : > { %v2763_v48 = vpack.c.b16 %v732_v46, %v732_v46 }
 0x1e0   : > { %734 = vrot.lane.b32.xlu1 %v2763_v48, %s2536_s16 }
 0x1e8   : > { %686 = vrot.lane.b32.xlu1 %v2766_v50, %s2536_s16 }
 0x222   : > { %v662_v51 = vpop.permute.xlu2 %661 }
 0x223   : > { %v668_v52 = vsel %vm663_vm14, %v662_v51, 0 }
 0x224   : > { %677 = vmatpush.bf16.xpose.msra.mxu1 %v668_v52 }
 0x22b   : > { %2088 = vmatmul.msk.bf16.vlgmr.msra.gmra.mxu1 %vm663_vm14, %v654_v35 }
 0x24a   : > { %v711_v53 = vpop.permute.xlu0 %710 }
 0x24b   : > { %v716_v54 = vsel %vm663_vm14, %v711_v53, 0 }
 0x24c   : > { %725 = vmatpush.bf16.xpose.msra.mxu3 %v716_v54 }
 0x252   : > { %v735_v55 = vpop.permute.xlu1 %734 }
 0x253   : > { %2090 = vmatmul.msk.bf16.vlgmr.msra.gmra.mxu3 %vm663_vm14, %v656_v39  ;;  %v740_v56 = vsel %vm663_vm14, %v735_v55, 0 }
 0x254   : > { %749 = vmatpush.bf16.xpose.msrb.mxu1 %v740_v56 }
 0x25a   : > { %v687_v57 = vpop.permute.xlu1 %686 }
 0x25b   : > { %2091 = vmatmul.msk.bf16.vlgmr.msrb.gmra.mxu1 %vm663_vm14, %v657_v45  ;;  %v692_v58 = vsel %vm663_vm14, %v687_v57, 0 }
 0x25c   : > { %701 = vmatpush.bf16.xpose.msra.mxu2 %v692_v58 }
 0x263   : > { %2089 = vmatmul.msk.bf16.vlgmr.msra.gmra.mxu2 %vm663_vm14, %v655_v47 }
 0x2a8   : > { %v2777_v59 = vpop.f32.mrf.mxu1 }
 0x2b0   : > { %v681_v60 = vpop.f32.mrf.mxu1 }
 0x2b1   : > { %v755_v60 = vsel %vm663_vm14, %v2777_v59, -inf }
 0x2d6   : > { %v727_v61 = vpop.f32.mrf.mxu3 }
 0x2d7   : > { %v761_v62 = vsel %vm663_vm14, %v727_v61, -inf }
 0x2d8   : > { %v751_v63 = vpop.f32.mrf.mxu1  ;;  %762 = vmax.xlane.f32.xlu0 %v761_v62 }
 0x2d9   : > { %v764_v0 = vsel %vm663_vm14, %v751_v63, -inf }
 0x2da   : > { %765 = vmax.xlane.f32.xlu2 %v764_v0 }
 0x2de   : > { %v729_v1 = vpop.f32.mrf.mxu3 }
 0x2e0   : > { %v753_v2 = vpop.f32.mrf.mxu1 }
 0x2e6   : > { %v2781_v3 = vpop.f32.mrf.mxu2 }
 0x2e7   : > { %v758_v26 = vsel %vm663_vm14, %v2781_v3, -inf }
 0x2ec   : > { %867 = vrot.lane.b32.xlu0 %v2763_v48, %s2537_s27 }
 0x2ee   : > { %v705_v4 = vpop.f32.mrf.mxu2 }
 0x2f2   : > { %846 = vrot.lane.b32.xlu2 %v2760_v41, %s2537_s27 }
 0x2f4   : > { %939 = vrot.lane.b32.xlu0 %v2760_v41, %s2538_s5 }
 0x2fc   : > { %937 = vrot.lane.b32.xlu0 %v2760_v41, %s2539_s25 }
 0x304   : > { %825 = vrot.lane.b32.xlu0 %v2766_v50, %s2537_s27 }
 0x30c   : > { %1197 = vrot.lane.b32.xlu0 %v2766_v50, %s2540_s14 }
 0x34b   : > { %v763_v5 = vpop.xlane.xlu0 %762 }
 0x34c   : > { %v769_v6 = vsub.f32 %v727_v61, %v763_v5 }
 0x34d   : > { %v766_v7 = vpop.xlane.xlu2 %765 }
 0x34e   : > { %v775_v8 = vmul.f32 1.442695, %v769_v6  ;;  %v770_v9 = vsub.f32 %v751_v63, %v766_v7 }
 0x350   : > { %2292 = vpow2.f32 %v775_v8  ;;  %v777_v10 = vmul.f32 1.442695, %v770_v9 }
 0x352   : > { %2294 = vpow2.f32 %v777_v10 }
 0x355   : > { %v847_v11 = vpop.permute.xlu2 %846 }
 0x356   : > { %v2293_v12 = vpop.eup %2292  ;;  %v852_v13 = vsel %vm808_vm15, %v847_v11, 0 }
 0x357   : > { %861 = vmatpush.bf16.msrb.mxu0 %v852_v13  ;;  %v785_v15 = vsel %vm663_vm14, %v2293_v12, 0.0 }
 0x358   : > { %v2295_v16 = vpop.eup %2294  ;;  %786 = vadd.xlane.f32.xlu2 %v785_v15 }
 0x359   : > { %v788_v17 = vsel %vm663_vm14, %v2295_v16, 0.0 }
 0x35a   : > { %789 = vadd.xlane.f32.xlu1 %v788_v17 }
 0x35e   : > { %v868_v18 = vpop.permute.xlu0 %867 }
 0x35f   : > { %v873_v20 = vsel %vm808_vm15, %v868_v18, 0 }
 0x360   : > { %882 = vmatpush.bf16.msra.mxu1 %v873_v20 }
 0x366   : > { %v940_v21 = vpop.permute.xlu0 %939 }
 0x367   : > { %v945_v22 = vsel %vm663_vm14, %v940_v21, 0 }
 0x368   : > { %954 = vmatpush.bf16.xpose.msra.mxu0 %v945_v22 }
 0x36e   : > { %v938_v23 = vpop.permute.xlu0 %937 }
 0x370   : > { %960 = vrot.lane.b32.xlu2 %v2763_v48, %s2539_s25 }
 0x373   : > { %962 = vrot.lane.b32.xlu1 %v2763_v48, %s2538_s5 }
 0x376   : > { %v826_v24 = vpop.permute.xlu0 %825 }
 0x377   : > { %v831_v25 = vsel %vm808_vm15, %v826_v24, 0 }
 0x378   : > { %840 = vmatpush.bf16.msrb.mxu3 %v831_v25 }
 0x37b   : > { %916 = vrot.lane.b32.xlu1 %v2766_v50, %s2538_s5 }
 0x37e   : > { %v1198_v10 = vpop.permute.xlu0 %1197 }
 0x399   : > { %759 = vmax.xlane.f32.xlu2 %v758_v26 }
 0x3cb   : > { %v787_v27 = vpop.xlane.xlu2 %786 }
 0x3cc   : > { %2296 = vrcp.f32 %v787_v27 }
 0x3cd   : > { %v790_v28 = vpop.xlane.xlu1 %789 }
 0x3ce   : > { %2298 = vrcp.f32 %v790_v28 }
 0x3d2   : > { %v2297_v30 = vpop.eup %2296 }
 0x3d3   : > { %v797_v31 = vmul.f32 %v2297_v30, %v2293_v12  ;;  %v961_v19 = vpop.permute.xlu2 %960 }
 0x3d4   : > { %v2299_v32 = vpop.eup %2298 }
 0x3d5   : > { %v798_v33 = vmul.f32 %v2299_v32, %v2295_v16  ;;  %v801_v34 = vpack.c.bf16 %v797_v31, %v797_v31 }
 0x3d7   : > { %v802_v35 = vpack.c.bf16 %v798_v33, %v798_v33  ;;  %2094 = vmatmul.msk.bf16.vlgmr.msrb.gmra.mxu0 %vm663_vm14, %v801_v34 }
 0x3d9   : > { %2095 = vmatmul.msk.bf16.vlgmr.msra.gmra.mxu1 %vm663_vm14, %v802_v35 }
 0x3e5   : > { %v963_v36 = vpop.permute.xlu1 %962 }
 0x3e6   : > { %v968_v29 = vsel %vm663_vm14, %v963_v36, 0 }
 0x3e7   : > { %2098 = vmatmul.msk.bf16.vlgmr.msra.gmra.mxu0 %vm663_vm14, %v938_v23  ;;  %977 = vmatpush.bf16.xpose.msrb.mxu1 %v968_v29 }
 0x3ed   : > { %v917_v38 = vpop.permute.xlu1 %916 }
 0x3ee   : > { %v922_v39 = vsel %vm663_vm14, %v917_v38, 0  ;;  %2099 = vmatmul.msk.bf16.vlgmr.msrb.gmra.mxu1 %vm663_vm14, %v961_v19 }
 0x3ef   : > { %931 = vmatpush.bf16.xpose.msra.mxu3 %v922_v39 }
 0x40c   : > { %v760_v40 = vpop.xlane.xlu2 %759 }
 0x40d   : > { %v768_v42 = vsub.f32 %v2781_v3, %v760_v40 }
 0x40f   : > { %v773_v43 = vmul.f32 1.442695, %v768_v42 }
 0x411   : > { %2300 = vpow2.f32 %v773_v43 }
 0x417   : > { %v2301_v44 = vpop.eup %2300 }
 0x418   : > { %v782_v45 = vsel %vm663_vm14, %v2301_v44, 0.0 }
 0x419   : > { %783 = vadd.xlane.f32.xlu2 %v782_v45 }
 0x431   : > { %914 = vrot.lane.b32.xlu2 %v2766_v50, %s2539_s25 }
 0x439   : > { %1094 = vrot.lane.b32.xlu2 %v2763_v48, %s2541_s20 }
 0x441   : > { %1073 = vrot.lane.b32.xlu2 %v2760_v41, %s2541_s20 }
 0x449   : > { %1199 = vrot.lane.b32.xlu2 %v2766_v50, %s2542_s23 }
 0x451   : > { %1176 = vrot.lane.b32.xlu2 %v2757_v37, %s2542_s23 }
 0x454   : > { %v2827_v46 = vpop.f32.mrf.mxu0 }
 0x456   : > { %v2829_v47 = vpop.f32.mrf.mxu1 }
 0x457   : > { %v889_v49 = vpack.c.bf16 %v2829_v47, %v2827_v46 }
 0x45c   : > { %v865_v51 = vpop.f32.mrf.mxu0 }
 0x45e   : > { %v886_v52 = vpop.f32.mrf.mxu1 }
 0x464   : > { %v956_v53 = vpop.f32.mrf.mxu0 }
 0x465   : > { %v989_v54 = vsel %vm663_vm14, %v956_v53, -inf }
 0x466   : > { %990 = vmax.xlane.f32.xlu1 %v989_v54 }
 0x46b   : > { %v979_v55 = vpop.f32.mrf.mxu1 }
 0x46c   : > { %v958_v56 = vpop.f32.mrf.mxu0  ;;  %v992_v57 = vsel %vm663_vm14, %v979_v55, -inf }
 0x46d   : > { %993 = vmax.xlane.f32.xlu0 %v992_v57 }
 0x473   : > { %v981_v58 = vpop.f32.mrf.mxu1 }
 0x47a   : > { %756 = vmax.xlane.f32.xlu2 %v755_v60 }
 0x47f   : > { %1174 = vrot.lane.b32.xlu1 %v2757_v37, %s2540_s14 }
 0x481   : > { %1245 = vrot.lane.b32.xlu0 %v2763_v48, %s2542_s23 }
 0x48c   : > { %v784_v61 = vpop.xlane.xlu2 %783 }
 0x48d   : > { %2302 = vrcp.f32 %v784_v61 }
 0x492   : > { %803 = vrot.lane.b32.xlu2 %v2757_v37, %s2537_s27  ;;  %s1968_s27 = scalar_lea.hbm %s3169_s13, %s2187_s17 }
 0x493   : > { %v2303_v62 = vpop.eup %2302 }
 0x494   : > { %v796_v63 = vmul.f32 %v2303_v62, %v2301_v44  ;;  %v915_v0 = vpop.permute.xlu2 %914 }
 0x496   : > { %v800_v1 = vpack.c.bf16 %v796_v63, %v796_v63 }
 0x498   : > { %2093 = vmatmul.msk.bf16.vlgmr.msrb.gmra.mxu3 %vm663_vm14, %v800_v1 }
 0x49c   : > { %v1095_v2 = vpop.permute.xlu2 %1094 }
 0x49d   : > { %v1100_v3 = vsel %vm808_vm15, %v1095_v2, 0 }
 0x49e   : > { %1109 = vmatpush.bf16.msra.mxu1 %v1100_v3 }
 0x4a4   : > { %v1074_v4 = vpop.permute.xlu2 %1073 }
 0x4a5   : > { %v1079_v5 = vsel %vm808_vm15, %v1074_v4, 0 }
 0x4a6   : > { %1088 = vmatpush.bf16.msrb.mxu0 %v1079_v5 }
 0x4a8   : > { %2097 = vmatmul.msk.bf16.vlgmr.msra.gmra.mxu3 %vm663_vm14, %v915_v0 }
 0x4ac   : > { %v1200_v6 = vpop.permute.xlu2 %1199 }
 0x4ad   : > { %v1205_v7 = vsel %vm663_vm14, %v1200_v6, 0 }
 0x4ae   : > { %1214 = vmatpush.bf16.xpose.msrb.mxu1 %v1205_v7 }
 0x4b4   : > { %v1177_v8 = vpop.permute.xlu2 %1176 }
 0x4b5   : > { %v1182_v9 = vsel %vm663_vm14, %v1177_v8, 0 }
 0x4b6   : > { %1191 = vmatpush.bf16.xpose.msra.mxu0 %v1182_v9 }
 0x4d9   : > { %v991_v11 = vpop.xlane.xlu1 %990 }
 0x4da   : > { %v997_v12 = vsub.f32 %v956_v53, %v991_v11 }
 0x4dc   : > { %v1003_v13 = vmul.f32 1.442695, %v997_v12 }
 0x4de   : > { %2304 = vpow2.f32 %v1003_v13 }
 0x4e0   : > { %v994_v15 = vpop.xlane.xlu0 %993 }
 0x4e1   : > { %v998_v16 = vsub.f32 %v979_v55, %v994_v15 }
 0x4e3   : > { %v1005_v17 = vmul.f32 1.442695, %v998_v16 }
 0x4e4   : > { %v2305_v18 = vpop.eup %2304 }
 0x4e5   : > { %2306 = vpow2.f32 %v1005_v17  ;;  %v1013_v20 = vsel %vm663_vm14, %v2305_v18, 0.0 }
 0x4e6   : > { %1014 = vadd.xlane.f32.xlu1 %v1013_v20 }
 0x4eb   : > { %v2307_v21 = vpop.eup %2306 }
 0x4ec   : > { %v1016_v22 = vsel %vm663_vm14, %v2307_v21, 0.0 }
 0x4ed   : > { %v757_v23 = vpop.xlane.xlu2 %756  ;;  %1017 = vadd.xlane.f32.xlu0 %v1016_v22 }
 0x4ee   : > { %v767_v26 = vsub.f32 %v2777_v59, %v757_v23 }
 0x4f0   : > { %v771_v27 = vmul.f32 1.442695, %v767_v26 }
 0x4f1   : > { %v1175_v36 = vpop.permute.xlu1 %1174 }
 0x4f2   : > { %2308 = vpow2.f32 %v771_v27 }
 0x4f3   : > { %v1246_v29 = vpop.permute.xlu0 %1245 }
 0x4f4   : > { %v1251_v45 = vsel %vm663_vm14, %v1246_v29, 0 }
 0x4f5   : > { %v804_v24 = vpop.permute.xlu2 %803 }
 0x4f6   : > { %v810_v25 = vsel %vm808_vm15, %v804_v24, 0 }
 0x4f7   : > { %819 = vmatpush.bf16.msrb.mxu2 %v810_v25 }
 0x4f8   : > { %v2309_v31 = vpop.eup %2308 }
 0x4f9   : > { %v779_v32 = vsel %vm663_vm14, %v2309_v31, 0.0 }
 0x4ff   : > { %1243 = vrot.lane.b32.xlu1 %v2763_v48, %s2540_s14 }
 0x501   : > { %1222 = vrot.lane.b32.xlu0 %v2760_v41, %s2542_s23 }
 0x509   : > { %1220 = vrot.lane.b32.xlu0 %v2760_v41, %s2540_s14 }
 0x511   : > { %893 = vrot.lane.b32.xlu0 %v2757_v37, %s2538_s5 }
 0x519   : > { %891 = vrot.lane.b32.xlu0 %v2757_v37, %s2539_s25  ;;  %s1971_s25 = sshll.u32 %s1968_s27, 4  ;;  %s1972_s25 = int_to_ptr.hbm [resolvable:$true] %s1971_s25 }
 0x51a   : > { %s2472_s14 = sshra.s32 %s1972_s25, 4  ;;  %s2473_s14 = int_to_ptr.hbm [resolvable:$true] %s2472_s14 }
 0x51b   : > { %v2863_v28 = vpop.f32.mrf.mxu3  ;;  %p2479_p3 = scmp.lt.s32.totalorder %s2473_s14, %s3169_s13 }
 0x523   : > { %v844_v30 = vpop.f32.mrf.mxu3 }
 0x529   : > { %780 = vadd.xlane.f32.xlu1 %v779_v32 }
 0x52b   : > { %v933_v33 = vpop.f32.mrf.mxu3 }
 0x52c   : > { %v986_v35 = vsel %vm663_vm14, %v933_v33, -inf }
 0x533   : > { %v935_v34 = vpop.f32.mrf.mxu3 }
 0x543   : > { %987 = vmax.xlane.f32.xlu0 %v986_v35 }
 0x559   : > { %v1015_v59 = vpop.xlane.xlu1 %1014 }
 0x55a   : > { %2310 = vrcp.f32 %v1015_v59 }
 0x560   : > { %v2311_v19 = vpop.eup %2310  ;;  %v1018_v38 = vpop.xlane.xlu0 %1017 }
 0x561   : > { %v1025_v39 = vmul.f32 %v2311_v19, %v2305_v18  ;;  %2312 = vrcp.f32 %v1018_v38 }
 0x563   : > { %v1029_v40 = vpack.c.bf16 %v1025_v39, %v1025_v39 }
 0x565   : > { %2102 = vmatmul.msk.bf16.vlgmr.msrb.gmra.mxu0 %vm663_vm14, %v1029_v40 }
 0x567   : > { %v2313_v42 = vpop.eup %2312 }
 0x568   : > { %v1026_v43 = vmul.f32 %v2313_v42, %v2307_v21 }
 0x56a   : > { %v1030_v44 = vpack.c.bf16 %v1026_v43, %v1026_v43 }
 0x56c   : > { %2103 = vmatmul.msk.bf16.vlgmr.msra.gmra.mxu1 %vm663_vm14, %v1030_v44 }
 0x56d   : > { %1260 = vmatpush.bf16.xpose.msra.mxu1 %v1251_v45 }
 0x571   : > { %v1244_v56 = vpop.permute.xlu1 %1243 }
 0x573   : > { %v1223_v51 = vpop.permute.xlu0 %1222 }
 0x574   : > { %v1228_v52 = vsel %vm663_vm14, %v1223_v51, 0 }
 0x575   : > { %2108 = vmatmul.msk.bf16.vlgmr.msra.gmra.mxu0 %vm663_vm14, %v1175_v36 }
 0x576   : > { %1237 = vmatpush.bf16.xpose.msrb.mxu0 %v1228_v52  ;;  %v890_v52 = vld [vmem:[#allocation5] sm:$0xf] }
 0x57b   : > { %v1221_v53 = vpop.permute.xlu0 %1220 }
 0x57c   : > { %2109 = vmatmul.msk.bf16.vlgmr.msrb.gmra.mxu1 %vm663_vm14, %v1198_v10 }
 0x583   : > { %v894_v54 = vpop.permute.xlu0 %893 }
 0x584   : > { %v899_v55 = vsel %vm663_vm14, %v894_v54, 0 }
 0x585   : > { %908 = vmatpush.bf16.xpose.msra.mxu2 %v899_v55  ;;  %2110 = vmatmul.msk.bf16.vlgmr.msrb.gmra.mxu0 %vm663_vm14, %v1221_v53  ;;  %v1153_v55 = vsel %vm808_vm15, %v890_v52, 0 }
 0x58b   : > { %v892_v62 = vpop.permute.xlu0 %891 }
 0x58c   : > { %2111 = vmatmul.msk.bf16.vlgmr.msra.gmra.mxu1 %vm663_vm14, %v1244_v56 }
 0x59c   : > { %v781_v57 = vpop.xlane.xlu1 %780 }
 0x59d   : > { %2314 = vrcp.f32 %v781_v57 }
 0x5a3   : > { %v2315_v58 = vpop.eup %2314 }
 0x5a4   : > { %v795_v60 = vmul.f32 %v2315_v58, %v2309_v31 }
 0x5a6   : > { %v799_v61 = vpack.c.bf16 %v795_v60, %v795_v60 }
 0x5a8   : > { %2092 = vmatmul.msk.bf16.vlgmr.msrb.gmra.mxu2 %vm663_vm14, %v799_v61 }
 0x5b6   : > { %v988_v63 = vpop.xlane.xlu0 %987 }
 0x5b7   : > { %v996_v0 = vsub.f32 %v933_v33, %v988_v63 }
 0x5b8   : > { %2096 = vmatmul.msk.bf16.vlgmr.msra.gmra.mxu2 %vm663_vm14, %v892_v62 }
 0x5b9   : > { %v1001_v1 = vmul.f32 1.442695, %v996_v0 }
 0x5bb   : > { %2316 = vpow2.f32 %v1001_v1 }
 0x5c1   : > { %v2878_v2 = vpop.eup %2316 }
 0x5c2   : > { %v1010_v3 = vsel %vm663_vm14, %v2878_v2, 0.0 }
 0x5c3   : > { %1011 = vadd.xlane.f32.xlu1 %v1010_v3 }
 0x5e2   : > { %v2882_v4 = vpop.f32.mrf.mxu0 }
 0x5e9   : > { %v2884_v5 = vpop.f32.mrf.mxu1 }
 0x5ea   : > { %v1116_v6 = vpack.c.bf16 %v2884_v5, %v2882_v4  ;;  %v1092_v7 = vpop.f32.mrf.mxu0 }
 0x5f1   : > { %v1113_v8 = vpop.f32.mrf.mxu1 }
 0x5f2   : > { %v2888_v9 = vpop.f32.mrf.mxu0 }
 0x5f3   : > { %v1266_v40 = vsel %vm663_vm14, %v2888_v9, -inf }
 0x5f9   : > { %v1216_v10 = vpop.f32.mrf.mxu1 }
 0x5fa   : > { %v1195_v11 = vpop.f32.mrf.mxu0  ;;  %v1269_v12 = vsel %vm663_vm14, %v1216_v10, -inf }
 0x5fb   : > { %1270 = vmax.xlane.f32.xlu2 %v1269_v12 }
 0x601   : > { %v1218_v13 = vpop.f32.mrf.mxu1 }
 0x602   : > { %v1239_v15 = vpop.f32.mrf.mxu0 }
 0x603   : > { %v1272_v16 = vsel %vm663_vm14, %v1239_v15, -inf }
 0x604   : > { %1273 = vmax.xlane.f32.xlu0 %v1272_v16 }
 0x609   : > { %v1262_v17 = vpop.f32.mrf.mxu1 }
 0x60a   : > { %v1241_v18 = vpop.f32.mrf.mxu0  ;;  %v1275_v20 = vsel %vm663_vm14, %v1262_v17, -inf }
 0x60b   : > { %1276 = vmax.xlane.f32.xlu1 %v1275_v20 }
 0x611   : > { %v1264_v21 = vpop.f32.mrf.mxu1 }
 0x618   : > { %1356 = vrot.lane.b32.xlu0 %v2760_v41, %s2543_s30 }
 0x620   : > { %1433 = vrot.lane.b32.xlu0 %v2757_v37, %s2544_s15 }
 0x624   : > { %1052 = vrot.lane.b32.xlu1 %v2766_v50, %s2541_s20 }
 0x628   : > { %1479 = vrot.lane.b32.xlu0 %v2760_v41, %s2544_s15 }
 0x62b   : > { %v821_v22 = vpop.f32.mrf.mxu2 }
 0x62c   : > { %1377 = vrot.lane.b32.xlu1 %v2763_v48, %s2543_s30  ;;  %v888_v62 = vpack.c.bf16 %v2863_v28, %v821_v22 }
 0x633   : > { %v823_v23 = vpop.f32.mrf.mxu2 }
 0x634   : > { %1435 = vrot.lane.b32.xlu1 %v2757_v37, %s2545_s21 }
 0x636   : > { %v1012_v31 = vpop.xlane.xlu1 %1011 }
 0x63b   : > { %v2904_v24 = vpop.f32.mrf.mxu2 }
 0x63c   : > { %1481 = vrot.lane.b32.xlu1 %v2760_v41, %s2545_s21 }
 0x643   : > { %v912_v25 = vpop.f32.mrf.mxu2 }
 0x644   : > { %1458 = vrot.lane.b32.xlu1 %v2766_v50, %s2545_s21 }
 0x64c   : > { %1504 = vrot.lane.b32.xlu1 %v2763_v48, %s2545_s21  ;;  %s2478_s21 = scalar_lea.hbm %s3169_s13, 64 }
 0x654   : > { %1502 = vrot.lane.b32.xlu1 %v2763_v48, %s2544_s15 }
 0x65c   : > { %1031 = vrot.lane.b32.xlu1 %v2757_v37, %s2541_s20  ;;  %s2474_s20 = scalar_lea.hbm %s2473_s14, 32 }
 0x65d   : > { %p2475_p0 = scmp.ne.s32.totalorder %s2473_s14, %s2474_s20  ;;  %p2480_p4 = scmp.lt.s32.totalorder %s2478_s21, %s2474_s20 }
 0x65f   : > { %p2476_p1 = pnand %p2475_p0, %p2657_p5  ;;  %p2481_p7 = por %p2480_p4, %p2479_p3 }
 0x661   : > { %p2477_p2 = pneg %p2476_p1 }
 0x663   : > { %p2482_p8 = pnand %p2481_p7, %p2477_p2 }
 0x66e   : > { %v1271_v26 = vpop.xlane.xlu2 %1270 }
 0x66f   : > { %v1279_v27 = vsub.f32 %v1216_v10, %v1271_v26 }
 0x671   : > { %v1284_v30 = vmul.f32 1.442695, %v1279_v27 }
 0x673   : > { %2318 = vpow2.f32 %v1284_v30 }
 0x677   : > { %v1274_v32 = vpop.xlane.xlu0 %1273 }
 0x678   : > { %v1280_v33 = vsub.f32 %v1239_v15, %v1274_v32 }
 0x679   : > { %v2319_v34 = vpop.eup %2318 }
 0x67a   : > { %v1286_v35 = vmul.f32 1.442695, %v1280_v33  ;;  %v1293_v36 = vsel %vm663_vm14, %v2319_v34, 0.0 }
 0x67b   : > { %1294 = vadd.xlane.f32.xlu2 %v1293_v36 }
 0x67c   : > { %2320 = vpow2.f32 %v1286_v35 }
 0x67e   : > { %v1277_v29 = vpop.xlane.xlu1 %1276 }
 0x67f   : > { %v1281_v59 = vsub.f32 %v1262_v17, %v1277_v29 }
 0x681   : > { %v1288_v19 = vmul.f32 1.442695, %v1281_v59 }
 0x682   : > { %v2914_v38 = vpop.eup %2320 }
 0x683   : > { %2322 = vpow2.f32 %v1288_v19  ;;  %v1296_v39 = vsel %vm663_vm14, %v2914_v38, 0.0 }
 0x684   : > { %1297 = vadd.xlane.f32.xlu0 %v1296_v39  ;;  %2324 = vrcp.f32 %v1012_v31 }
 0x686   : > { %1267 = vmax.xlane.f32.xlu1 %v1266_v40 }
 0x689   : > { %v2920_v42 = vpop.eup %2322 }
 0x68a   : > { %v1357_v43 = vpop.permute.xlu0 %1356  ;;  %v1299_v44 = vsel %vm663_vm14, %v2920_v42, 0.0  ;;  %v2325_v51 = vpop.eup %2324 }
 0x68b   : > { %v1362_v45 = vsel %vm808_vm15, %v1357_v43, 0  ;;  %v1024_v53 = vmul.f32 %v2325_v51, %v2878_v2 }
 0x68c   : > { %1300 = vadd.xlane.f32.xlu0 %v1299_v44  ;;  %1371 = vmatpush.bf16.msra.mxu0 %v1362_v45 }
 0x68d   : > { %v1028_v57 = vpack.c.bf16 %v1024_v53, %v1024_v53 }
 0x692   : > { %v1434_v10 = vpop.permute.xlu0 %1433 }
 0x693   : > { %1335 = vrot.lane.b32.xlu2 %v2766_v50, %s2543_s30 }
 0x696   : > { %v1053_v54 = vpop.permute.xlu1 %1052 }
 0x697   : > { %v1058_v56 = vsel %vm808_vm15, %v1053_v54, 0 }
 0x698   : > { %1067 = vmatpush.bf16.msrb.mxu3 %v1058_v56 }
 0x69a   : > { %v1480_v12 = vpop.permute.xlu0 %1479 }
 0x69b   : > { %2101 = vmatmul.msk.bf16.vlgmr.msrb.gmra.mxu3 %vm663_vm14, %v1028_v57 }
 0x69c   : > { %1162 = vmatpush.bf16.msra.mxu3 %v1153_v55 }
 0x69e   : > { %v1378_v58 = vpop.permute.xlu1 %1377 }
 0x69f   : > { %v1383_v60 = vsel %vm808_vm15, %v1378_v58, 0  ;;  %1615 = vrot.lane.b32.xlu1 %v2760_v41, %s2546_s22  ;;  %v983_v41 = vsel %vm663_vm14, %v2904_v24, -inf }
 0x6a0   : > { %1392 = vmatpush.bf16.msrb.mxu1 %v1383_v60  ;;  %1456 = vrot.lane.b32.xlu0 %v2766_v50, %s2544_s15 }
 0x6a6   : > { %v1436_v61 = vpop.permute.xlu1 %1435 }
 0x6ab   : > { %2106 = vmatmul.msk.bf16.vlgmr.msra.gmra.mxu3 %vm663_vm14, %v888_v62 }
 0x6ae   : > { %v1482_v63 = vpop.permute.xlu1 %1481 }
 0x6af   : > { %v1487_v0 = vsel %vm663_vm14, %v1482_v63, 0 }
 0x6b0   : > { %1496 = vmatpush.bf16.xpose.msra.mxu1 %v1487_v0 }
 0x6b6   : > { %v1459_v1 = vpop.permute.xlu1 %1458 }
 0x6b7   : > { %v1464_v2 = vsel %vm663_vm14, %v1459_v1, 0 }
 0x6b8   : > { %1473 = vmatpush.bf16.xpose.msrb.mxu0 %v1464_v2 }
 0x6bb   : > { %2107 = vmatmul.msk.bf16.gmra.mxu3 %vm663_vm14, %v889_v49  ;;  %v1441_v49 = vsel %vm663_vm14, %v1436_v61, 0 }
 0x6bc   : > { %984 = vmax.xlane.f32.xlu2 %v983_v41  ;;  %v1117_v41 = vld [vmem:[#allocation5 + $0x4] sm:$0xf] }
 0x6be   : > { %v1505_v28 = vpop.permute.xlu1 %1504 }
 0x6bf   : > { %v1510_v18 = vsel %vm663_vm14, %v1505_v28, 0  ;;  %v1125_v28 = vsel %vm808_vm15, %v1117_v41, 0 }
 0x6c6   : > { %v1503_v3 = vpop.permute.xlu1 %1502 }
 0x6ce   : > { %v1032_v7 = vpop.permute.xlu1 %1031 }
 0x6cf   : > { %v1037_v8 = vsel %vm808_vm15, %v1032_v7, 0 }
 0x6d0   : > { %1046 = vmatpush.bf16.msrb.mxu2 %v1037_v8 }
 0x6d4   : > { %1134 = vmatpush.bf16.msra.mxu2 %v1125_v28 }
 0x6ee   : > { %v1295_v11 = vpop.xlane.xlu2 %1294 }
 0x6ef   : > { %2326 = vrcp.f32 %v1295_v11 }
 0x6f5   : > { %v2327_v13 = vpop.eup %2326 }
 0x6f6   : > { %v1307_v15 = vmul.f32 %v2327_v13, %v2319_v34  ;;  %v1336_v16 = vpop.permute.xlu2 %1335 }
 0x6f7   : > { %v1341_v46 = vsel %vm808_vm15, %v1336_v16, 0  ;;  %v1298_v47 = vpop.xlane.xlu0 %1297 }
 0x6f8   : > { %v1311_v17 = vpack.c.bf16 %v1307_v15, %v1307_v15  ;;  %2328 = vrcp.f32 %v1298_v47  ;;  %1350 = vmatpush.bf16.msrb.mxu3 %v1341_v46 }
 0x6f9   : > { %v1268_v27 = vpop.xlane.xlu1 %1267 }
 0x6fa   : > { %v1278_v57 = vsub.f32 %v2888_v9, %v1268_v27 }
 0x6fb   : > { %2113 = vmatmul.msk.bf16.vlgmr.msrb.gmra.mxu3 %vm663_vm14, %v1311_v17 }
 0x6fc   : > { %1450 = vmatpush.bf16.xpose.msra.mxu3 %v1441_v49  ;;  %v1282_v63 = vmul.f32 1.442695, %v1278_v57 }
 0x6fe   : > { %v2329_v20 = vpop.eup %2328 }
 0x6ff   : > { %v1308_v21 = vmul.f32 %v2329_v20, %v2914_v38  ;;  %v1301_v22 = vpop.xlane.xlu0 %1300 }
 0x700   : > { %2330 = vrcp.f32 %v1301_v22 }
 0x701   : > { %v1312_v23 = vpack.c.bf16 %v1308_v21, %v1308_v21 }
 0x703   : > { %2114 = vmatmul.msk.bf16.vlgmr.msra.gmra.mxu0 %vm663_vm14, %v1312_v23 }
 0x704   : > { %1519 = vmatpush.bf16.xpose.msrb.mxu3 %v1510_v18 }
 0x706   : > { %v2331_v25 = vpop.eup %2330 }
 0x707   : > { %v1309_v26 = vmul.f32 %v2331_v25, %v2920_v42 }
 0x709   : > { %v1313_v30 = vpack.c.bf16 %v1309_v26, %v1309_v26 }
 0x70b   : > { %2115 = vmatmul.msk.bf16.vlgmr.msrb.gmra.mxu1 %vm663_vm14, %v1313_v30  ;;  %2118 = vmatmul.msk.bf16.vlgmr.msra.gmra.mxu3 %vm663_vm14, %v1434_v10 }
 0x711   : > { %v1616_v31 = vpop.permute.xlu1 %1615 }
 0x712   : > { %v1621_v32 = vsel %vm808_vm15, %v1616_v31, 0  ;;  %v1457_v33 = vpop.permute.xlu0 %1456 }
 0x713   : > { %2119 = vmatmul.msk.bf16.vlgmr.msrb.gmra.mxu0 %vm663_vm14, %v1457_v33  ;;  %1630 = vmatpush.bf16.msra.mxu3 %v1621_v32 }
 0x71b   : > { %2120 = vmatmul.msk.bf16.vlgmr.msra.gmra.mxu1 %vm663_vm14, %v1480_v12  ;;  %2121 = vmatmul.msk.bf16.vlgmr.msrb.gmra.mxu3 %vm663_vm14, %v1503_v3 }
 0x71e   : > { %v2960_v34 = vpop.f32.mrf.mxu3 }
 0x726   : > { %v1071_v35 = vpop.f32.mrf.mxu3 }
 0x72e   : > { %v2966_v39 = vpop.f32.mrf.mxu3 }
 0x72f   : > { %v985_v36 = vpop.xlane.xlu2 %984 }
 0x730   : > { %v995_v29 = vsub.f32 %v2904_v24, %v985_v36 }
 0x732   : > { %v999_v59 = vmul.f32 1.442695, %v995_v29 }
 0x734   : > { %2332 = vpow2.f32 %v999_v59 }
 0x735   : > { %2334 = vpow2.f32 %v1282_v63 }
 0x736   : > { %v2970_v40 = vpop.f32.mrf.mxu3 }
 0x73a   : > { %v2333_v19 = vpop.eup %2332 }
 0x73b   : > { %v1007_v38 = vsel %vm663_vm14, %v2333_v19, 0.0  ;;  %v2335_v3 = vpop.eup %2334 }
 0x73c   : > { %1008 = vadd.xlane.f32.xlu0 %v1007_v38  ;;  %v1290_v9 = vsel %vm663_vm14, %v2335_v3, 0.0 }
 0x73e   : > { %v2972_v42 = vpop.f32.mrf.mxu3 }
 0x746   : > { %v2974_v43 = vpop.f32.mrf.mxu3 }
 0x750   : > { %1314 = vrot.lane.b32.xlu0 %v2757_v37, %s2543_s30  ;;  %s480_s30 = sand.u32 1, %s2520_s26  }
 0x751   : > { %s1957_s29 = scalar_lea.sflag [#allocation4], %s480_s30 }
 0x758   : > { %1573 = vrot.lane.b32.xlu0 %v2757_v37, %s2546_s22 }
 0x77e   : > { %v2976_v24 = vpop.f32.mrf.mxu3 }
 0x780   : > { %v2978_v44 = vpop.f32.mrf.mxu0 }
 0x786   : > { %v1354_v45 = vpop.f32.mrf.mxu3 }
 0x788   : > { %v1375_v51 = vpop.f32.mrf.mxu0  ;;  %v2980_v52 = vpop.f32.mrf.mxu1 }
 0x789   : > { %v1399_v53 = vpack.c.bf16 %v2980_v52, %v2978_v44 }
 0x78e   : > { %v1452_v54 = vpop.f32.mrf.mxu3 }
 0x78f   : > { %v1525_v37 = vsel %vm663_vm14, %v1452_v54, -inf }
 0x790   : > { %v1396_v55 = vpop.f32.mrf.mxu1  ;;  %v1475_v56 = vpop.f32.mrf.mxu0  ;;  %1526 = vmax.xlane.f32.xlu2 %v1525_v37 }
 0x791   : > { %v1528_v60 = vsel %vm663_vm14, %v1475_v56, -inf }
 0x796   : > { %v1454_v58 = vpop.f32.mrf.mxu3 }
 0x798   : > { %v1477_v61 = vpop.f32.mrf.mxu0  ;;  %v1498_v62 = vpop.f32.mrf.mxu1  ;;  %1529 = vmax.xlane.f32.xlu2 %v1528_v60 }
 0x799   : > { %v1531_v1 = vsel %vm663_vm14, %v1498_v62, -inf }
 0x79e   : > { %v1521_v0 = vpop.f32.mrf.mxu3 }
 0x79f   : > { %v1534_v10 = vsel %vm663_vm14, %v1521_v0, -inf }
 0x7a0   : > { %v1500_v2 = vpop.f32.mrf.mxu1  ;;  %1532 = vmax.xlane.f32.xlu2 %v1531_v1 }
 0x7a6   : > { %v1523_v7 = vpop.f32.mrf.mxu3 }
 0x7a8   : > { %1291 = vadd.xlane.f32.xlu2 %v1290_v9 }
 0x7af   : > { %v1009_v8 = vpop.xlane.xlu0 %1008 }
 0x7b0   : > { %2336 = vrcp.f32 %v1009_v8  ;;  %1535 = vmax.xlane.f32.xlu2 %v1534_v10  ;;  %v1400_v10 = vld [vmem:[#allocation5 + $0x8] sm:$0xf] }
 0x7b6   : > { %v2337_v11 = vpop.eup %2336 }
 0x7b7   : > { %v1023_v12 = vmul.f32 %v2337_v11, %v2333_v19 }
 0x7b9   : > { %v1027_v13 = vpack.c.bf16 %v1023_v12, %v1023_v12  ;;  %v1408_v12 = vsel %vm808_vm15, %v1400_v10, 0 }
 0x7bb   : > { %2100 = vmatmul.msk.bf16.vlgmr.msrb.gmra.mxu2 %vm663_vm14, %v1027_v13 }
 0x7c2   : > { %v1315_v15 = vpop.permute.xlu0 %1314 }
 0x7c3   : > { %v1320_v16 = vsel %vm808_vm15, %v1315_v15, 0 }
 0x7c4   : > { %1329 = vmatpush.bf16.msrb.mxu2 %v1320_v16 }
 0x7ca   : > { %v1574_v46 = vpop.permute.xlu0 %1573 }
 0x7cb   : > { %v1579_v47 = vsel %vm808_vm15, %v1574_v46, 0 }
 0x7cc   : > { %1588 = vmatpush.bf16.msra.mxu0 %v1579_v47 }
 0x803   : > { %v1527_v49 = vpop.xlane.xlu2 %1526 }
 0x804   : > { %v1537_v17 = vsub.f32 %v1452_v54, %v1527_v49 }
 0x806   : > { %v1541_v18 = vmul.f32 1.442695, %v1537_v17  ;;  %v1659_v17 = vld [vmem:[#allocation5 + $0xc] sm:$0xf] }
 0x808   : > { %2338 = vpow2.f32 %v1541_v18  ;;  %v1667_v18 = vsel %vm808_vm15, %v1659_v17, 0 }
 0x809   : > { %1676 = vmatpush.bf16.msrb.mxu0 %v1667_v18 }
 0x80b   : > { %v1530_v20 = vpop.xlane.xlu2 %1529 }
 0x80c   : > { %v1538_v21 = vsub.f32 %v1475_v56, %v1530_v20 }
 0x80e   : > { %v2339_v22 = vpop.eup %2338  ;;  %v1543_v23 = vmul.f32 1.442695, %v1538_v21 }
 0x80f   : > { %v1549_v25 = vsel %vm663_vm14, %v2339_v22, 0.0 }
 0x810   : > { %2340 = vpow2.f32 %v1543_v23  ;;  %1550 = vadd.xlane.f32.xlu1 %v1549_v25 }
 0x813   : > { %v1533_v26 = vpop.xlane.xlu2 %1532 }
 0x814   : > { %v1539_v27 = vsub.f32 %v1498_v62, %v1533_v26 }
 0x816   : > { %v2341_v30 = vpop.eup %2340  ;;  %v1545_v31 = vmul.f32 1.442695, %v1539_v27 }
 0x817   : > { %v1552_v32 = vsel %vm663_vm14, %v2341_v30, 0.0 }
 0x818   : > { %2342 = vpow2.f32 %v1545_v31  ;;  %1553 = vadd.xlane.f32.xlu2 %v1552_v32 }
 0x81b   : > { %v1292_v33 = vpop.xlane.xlu2 %1291 }
 0x81e   : > { %v2343_v35 = vpop.eup %2342 }
 0x81f   : > { %v1555_v36 = vsel %vm663_vm14, %v2343_v35, 0.0 }
 0x820   : > { %1556 = vadd.xlane.f32.xlu2 %v1555_v36  ;;  %v2364_v36 = vld [vmem:[%s2709_s19] sm:$0xff] }
 0x823   : > { %v1536_v29 = vpop.xlane.xlu2 %1535 }
 0x824   : > { %v1540_v59 = vsub.f32 %v1521_v0, %v1536_v29 }
 0x826   : > { %v1547_v19 = vmul.f32 1.442695, %v1540_v59 }
 0x828   : > { %2344 = vpow2.f32 %v1547_v19 }
 0x829   : > { %1636 = vrot.lane.b32.xlu1 %v2763_v48, %s2546_s22  ;;  %2346 = vrcp.f32 %v1292_v33 }
 0x82e   : > { %v2345_v38 = vpop.eup %2344 }
 0x82f   : > { %v1558_v45 = vsel %vm663_vm14, %v2345_v38, 0.0  ;;  %v2347_v48 = vpop.eup %2346 }
 0x830   : > { %1559 = vadd.xlane.f32.xlu0 %v1558_v45  ;;  %v1306_v55 = vmul.f32 %v2347_v48, %v2335_v3 }
 0x832   : > { %v1310_v56 = vpack.c.bf16 %v1306_v55, %v1306_v55 }
 0x838   : > { %1594 = vrot.lane.b32.xlu2 %v2766_v50, %s2546_s22  ;;  %s2075_s22 = sshll.u32 %s480_s30, 5 }
 0x839   : > { %s482_s24 = scalar_lea.vmem [#allocation8], %s2075_s22 }
 0x83a   : > { %s1969_s5 = sshll.u32 %s482_s24, 4  ;;  %s1970_s5 = int_to_ptr.vmem [resolvable:$true] %s1969_s5 }
 0x83e   : > { %v1048_v51 = vpop.f32.mrf.mxu2 }
 0x83f   : > { %v1115_v54 = vpack.c.bf16 %v2960_v34, %v1048_v51 }
 0x841   : > { %2104 = vmatmul.msk.bf16.vlgmr.msra.gmra.mxu2 %vm663_vm14, %v1115_v54 }
 0x842   : > { %1417 = vmatpush.bf16.msra.mxu2 %v1408_v12 }
 0x846   : > { %v1050_v37 = vpop.f32.mrf.mxu2 }
 0x847   : > { %v2365_v37 = vld [vmem:[%s2709_s19 + $0x8] sm:$0xff] }
 0x851   : > { %2105 = vmatmul.msk.bf16.gmra.mxu2 %vm663_vm14, %v1116_v6 }
 0x861   : > { %2112 = vmatmul.msk.bf16.vlgmr.msrb.gmra.mxu2 %vm663_vm14, %v1310_v56 }
 0x883   : > { %v1551_v57 = vpop.xlane.xlu1 %1550 }
 0x884   : > { %2348 = vrcp.f32 %v1551_v57 }
 0x88a   : > { %v2349_v50 = vpop.eup %2348 }
 0x88b   : > { %v1565_v58 = vmul.f32 %v2349_v50, %v2339_v22  ;;  %v1554_v60 = vpop.xlane.xlu2 %1553 }
 0x88c   : > { %2350 = vrcp.f32 %v1554_v60 }
 0x88d   : > { %v1569_v34 = vpack.c.bf16 %v1565_v58, %v1565_v58 }
 0x88f   : > { %2122 = vmatmul.msk.bf16.vlgmr.msra.gmra.mxu0 %vm663_vm14, %v1569_v34  ;;  %v2366_v34 = vld [vmem:[%s2709_s19 + $0x10] sm:$0xff] }
 0x892   : > { %v2351_v4 = vpop.eup %2350 }
 0x893   : > { %v1557_v61 = vpop.xlane.xlu2 %1556  ;;  %v1566_v6 = vmul.f32 %v2351_v4, %v2341_v30 }
 0x894   : > { %2352 = vrcp.f32 %v1557_v61 }
 0x895   : > { %v1570_v28 = vpack.c.bf16 %v1566_v6, %v1566_v6 }
 0x89a   : > { %v2353_v5 = vpop.eup %2352 }
 0x89b   : > { %v1567_v62 = vmul.f32 %v2353_v5, %v2343_v35  ;;  %v1637_v63 = vpop.permute.xlu1 %1636  ;;  %v1595_v0 = vpop.permute.xlu2 %1594  ;;  %v2277_v35 = vld [vmem:[%s3162_s6] ss:$0 sm:$0xff] }
 0x89c   : > { %v1642_v1 = vsel %vm808_vm15, %v1637_v63, 0  ;;  %v1600_v2 = vsel %vm808_vm15, %v1595_v0, 0 }
 0x89d   : > { %v1571_v41 = vpack.c.bf16 %v1567_v62, %v1567_v62  ;;  %1609 = vmatpush.bf16.msrb.mxu1 %v1600_v2  ;;  %1651 = vmatpush.bf16.msrb.mxu3 %v1642_v1  ;;  %v2367_v2 = vld [vmem:[%s2709_s19 + $0x18] sm:$0xff] }
 0x89f   : > { %2124 = vmatmul.msk.bf16.vlgmr.msra.gmra.mxu3 %vm663_vm14, %v1571_v41 }
 0x8a0   : > { %2123 = vmatmul.msk.bf16.vlgmr.msrb.gmra.mxu1 %vm663_vm14, %v1570_v28 }
 0x8a3   : > { %v1560_v3 = vpop.xlane.xlu0 %1559 }
 0x8a4   : > { %2354 = vrcp.f32 %v1560_v3 }
 0x8aa   : > { %v2355_v7 = vpop.eup %2354 }
 0x8ab   : > { %v1568_v9 = vmul.f32 %v2355_v7, %v2345_v38 }
 0x8ad   : > { %v1572_v8 = vpack.c.bf16 %v1568_v9, %v1568_v9 }
 0x8af   : > { %2125 = vmatmul.msk.bf16.vlgmr.msrb.gmra.mxu3 %vm663_vm14, %v1572_v8 }
 0x8c4   : > { %v1136_v11 = vpop.f32.mrf.mxu2 }
 0x8cc   : > { %v1138_v13 = vpop.f32.mrf.mxu2 }
 0x8cd   : > { %v1167_v19 = vadd.f32 %v2970_v40, %v1138_v13 }
 0x8d4   : > { %v1141_v15 = vpop.f32.mrf.mxu2 }
 0x8d5   : > { %v1170_v40 = vadd.f32 %v2972_v42, %v1141_v15 }
 0x8dc   : > { %v1143_v16 = vpop.f32.mrf.mxu2 }
 0x8dd   : > { %v1172_v5 = vadd.f32 %v2974_v43, %v1143_v16 }
 0x8e4   : > { %v1331_v46 = vpop.f32.mrf.mxu2 }
 0x8e5   : > { %v1398_v47 = vpack.c.bf16 %v2976_v24, %v1331_v46 }
 0x8e7   : > { %2116 = vmatmul.msk.bf16.vlgmr.msra.gmra.mxu2 %vm663_vm14, %v1398_v47 }
 0x8ec   : > { %v1333_v49 = vpop.f32.mrf.mxu2 }
 0x8f7   : > { %2117 = vmatmul.msk.bf16.gmra.mxu2 %vm663_vm14, %v1399_v53  ;;  %v1165_v53 = vadd.f32 %v2966_v39, %v1136_v11 }
 0x90c   : > { %v1590_v20 = vpop.f32.mrf.mxu0 }
 0x914   : > { %v1592_v21 = vpop.f32.mrf.mxu0 }
 0x91d   : > { %v1611_v22 = vpop.f32.mrf.mxu1 }
 0x91e   : > { %v1657_v23 = vpack.c.bf16 %v1611_v22, %v1590_v20 }
 0x920   : > { %2126 = vmatmul.msk.bf16.vlgmr.msrb.gmra.mxu0 %vm663_vm14, %v1657_v23 }
 0x922   : > { %v1632_v24 = vpop.f32.mrf.mxu3 }
 0x925   : > { %v1613_v25 = vpop.f32.mrf.mxu1 }
 0x92a   : > { %v1634_v26 = vpop.f32.mrf.mxu3 }
 0x932   : > { %v1653_v27 = vpop.f32.mrf.mxu3 }
 0x933   : > { %v1658_v30 = vpack.c.bf16 %v1653_v27, %v1632_v24  ;;  %v2178_v24 = vld [vmem:[#allocation7 + $0x8] sm:$0xff] }
 0x934   : > { %1842 = vmatpush.bf16.msra.mxu1 %v2178_v24 }
 0x935   : > { %2127 = vmatmul.msk.bf16.gmra.mxu0 %vm663_vm14, %v1658_v30  ;;  %v2177_v30 = vld [vmem:[#allocation7] sm:$0xff] }
 0x938   : > { %1843 = vmatpush.bf16.msra.mxu1 %v2177_v30  ;;  %v2182_v30 = vld [vmem:[%s3167_s11 + $0x18] sm:$0xff] }
 0x93a   : > { %v1655_v44 = vpop.f32.mrf.mxu3 }
 0x96a   : > { %v1419_v52 = vpop.f32.mrf.mxu2 }
 0x96b   : > { %v1429_v31 = vadd.f32 %v1419_v52, %v1165_v53 }
 0x972   : > { %v1421_v59 = vpop.f32.mrf.mxu2 }
 0x973   : > { %v1430_v45 = vadd.f32 %v1421_v59, %v1167_v19 }
 0x97a   : > { %v1424_v56 = vpop.f32.mrf.mxu2 }
 0x97b   : > { %v1431_v50 = vadd.f32 %v1424_v56, %v1170_v40 }
 0x982   : > { %v1426_v4 = vpop.f32.mrf.mxu2 }
 0x983   : > { %v1432_v62 = vadd.f32 %v1426_v4, %v1172_v5  ;;  %v2185_v4 = vld [vmem:[%s3167_s11 + $0x30] sm:$0xff]  ;;  %v2279_v5 = vld [vmem:[%s3164_s8] ss:$0 sm:$0xff] }
 0x99d   : > { %v1678_v32 = vpop.f32.mrf.mxu0 }
 0x99e   : > { %v1688_v33 = vadd.f32 %v1678_v32, %v1429_v31 }
 0x9a0   : > { %v1692_v29 = vadd.f32 %v2364_v36, %v1688_v33 }
 0x9a2   : > { %v3031_v38 = vadd.f32 %v2277_v35, %v1692_v29 }
 0x9a4   : > { %v1706_v51 = vsel %vm497_vm0, %v3031_v38, 0.0 }
 0x9a5   : > { %v1680_v39 = vpop.f32.mrf.mxu0  ;;  %1707 = vadd.xlane.f32.xlu2 %v1706_v51 }
 0x9a6   : > { %v1689_v54 = vadd.f32 %v1680_v39, %v1430_v45 }
 0x9a8   : > { %v1693_v48 = vadd.f32 %v2365_v37, %v1689_v54 }
 0x9aa   : > { %v3036_v55 = vadd.f32 %v2277_v35, %v1693_v48 }
 0x9ac   : > { %v1709_v57 = vsel %vm497_vm0, %v3036_v55, 0.0 }
 0x9ad   : > { %1710 = vadd.xlane.f32.xlu1 %v1709_v57  ;;  %v2278_v57 = vld [vmem:[%s3163_s7] ss:$0 sm:$0xff] }
 0x9b2   : > { %v1683_v58 = vpop.f32.mrf.mxu0 }
 0x9b3   : > { %v1690_v60 = vadd.f32 %v1683_v58, %v1431_v50  ;;  %v2186_v58 = vld [vmem:[%s3167_s11 + $0x38] sm:$0xff] }
 0x9b4   : > { %1929 = vmatpush.bf16.msrb.mxu2 %v2186_v58 }
 0x9b5   : > { %v1694_v61 = vadd.f32 %v2366_v34, %v1690_v60 }
 0x9b7   : > { %v3043_v6 = vadd.f32 %v2277_v35, %v1694_v61 }
 0x9b8   : > { %1930 = vmatpush.bf16.msrb.mxu2 %v2185_v4 }
 0x9b9   : > { %v1712_v63 = vsel %vm497_vm0, %v3043_v6, 0.0 }
 0x9ba   : > { %v1685_v0 = vpop.f32.mrf.mxu0  ;;  %1713 = vadd.xlane.f32.xlu0 %v1712_v63 }
 0x9bb   : > { %v1691_v1 = vadd.f32 %v1685_v0, %v1432_v62 }
 0x9bd   : > { %v1695_v41 = vadd.f32 %v2367_v2, %v1691_v1 }
 0x9bf   : > { %v3048_v42 = vadd.f32 %v2277_v35, %v1695_v41 }
 0x9c1   : > { %v1715_v28 = vsel %vm497_vm0, %v3048_v42, 0.0 }
 0x9c2   : > { %1716 = vadd.xlane.f32.xlu0 %v1715_v28 }
 0xa18   : > { %v1708_v3 = vpop.xlane.xlu2 %1707 }
 0xa19   : > { %v1718_v43 = vmul.f32 %v1708_v3, %v2719_v14 }
 0xa1b   : > { %v1722_v7 = vsub.f32 %v3031_v38, %v1718_v43 }
 0xa1d   : > { %v1726_v9 = vmul.f32 %v1722_v7, %v1722_v7 }
 0xa1f   : > { %v1730_v8 = vsel %vm497_vm0, %v1726_v9, 0.0 }
 0xa20   : > { %v1711_v10 = vpop.xlane.xlu1 %1710  ;;  %1731 = vadd.xlane.f32.xlu0 %v1730_v8  ;;  %v2183_v8 = vld [vmem:[%s3167_s11 + $0x20] sm:$0xff] }
 0xa21   : > { %v1719_v11 = vmul.f32 %v1711_v10, %v2719_v14 }
 0xa23   : > { %v1723_v12 = vsub.f32 %v3036_v55, %v1719_v11 }
 0xa25   : > { %v1727_v13 = vmul.f32 %v1723_v12, %v1723_v12 }
 0xa27   : > { %v1733_v15 = vsel %vm497_vm0, %v1727_v13, 0.0 }
 0xa28   : > { %1734 = vadd.xlane.f32.xlu2 %v1733_v15 }
 0xa2d   : > { %v1714_v16 = vpop.xlane.xlu0 %1713 }
 0xa2e   : > { %v1720_v46 = vmul.f32 %v1714_v16, %v2719_v14 }
 0xa30   : > { %v3060_v47 = vsub.f32 %v3043_v6, %v1720_v46 }
 0xa32   : > { %v1728_v49 = vmul.f32 %v3060_v47, %v3060_v47 }
 0xa34   : > { %v1736_v17 = vsel %vm497_vm0, %v1728_v49, 0.0 }
 0xa35   : > { %v1717_v18 = vpop.xlane.xlu0 %1716  ;;  %1737 = vadd.xlane.f32.xlu1 %v1736_v17 }
 0xa36   : > { %v1721_v20 = vmul.f32 %v1717_v18, %v2719_v14 }
 0xa38   : > { %v3067_v21 = vsub.f32 %v3048_v42, %v1721_v20 }
 0xa3a   : > { %v1729_v22 = vmul.f32 %v3067_v21, %v3067_v21 }
 0xa3c   : > { %v1739_v23 = vsel %vm497_vm0, %v1729_v22, 0.0 }
 0xa3d   : > { %1740 = vadd.xlane.f32.xlu0 %v1739_v23 }
 0xa93   : > { %v1732_v25 = vpop.xlane.xlu0 %1731 }
 0xa94   : > { %v1742_v26 = vmul.f32 %v1732_v25, %v2719_v14 }
 0xa96   : > { %v1746_v27 = vadd.f32 1e-05, %v1742_v26 }
 0xa98   : > { %2356 = vrsqrt.f32 %v1746_v27  ;;  %vm1756_vm2 = vweird.f32 %v1746_v27 }
 0xa9b   : > { %v1735_v44 = vpop.xlane.xlu2 %1734 }
 0xa9c   : > { %v1743_v52 = vmul.f32 %v1735_v44, %v2719_v14  ;;  %v2179_v44 = vld [vmem:[%s3167_s11] sm:$0xff] }
 0xa9e   : > { %v2357_v53 = vpop.eup %2356  ;;  %v1747_v31 = vadd.f32 1e-05, %v1743_v52 }
 0xa9f   : > { %v1751_v32 = vmul.f32 %v2357_v53, %v1746_v27  ;;  %vm1757_vm1 = vweird.f32 %v2357_v53 }
 0xaa0   : > { %2358 = vrsqrt.f32 %v1747_v31  ;;  %vm1758_vm3 = vmor %vm1756_vm2, %vm1757_vm1  ;;  %vm1766_vm5 = vweird.f32 %v1747_v31 }
 0xaa1   : > { %v1752_v33 = vmul.f32 %v2357_v53, %v1751_v32 }
 0xaa3   : > { %v1753_v35 = vmul.f32 0.5, %v1752_v33 }
 0xaa5   : > { %v1754_v36 = vsub.f32 1.5, %v1753_v35 }
 0xaa6   : > { %v2359_v29 = vpop.eup %2358 }
 0xaa7   : > { %v1755_v59 = vmul.f32 %v2357_v53, %v1754_v36  ;;  %v1761_v19 = vmul.f32 %v2359_v29, %v1747_v31  ;;  %vm1767_vm4 = vweird.f32 %v2359_v29 }
 0xaa8   : > { %v1738_v45 = vpop.xlane.xlu1 %1737  ;;  %vm1768_vm6 = vmor %vm1766_vm5, %vm1767_vm4 }
 0xaa9   : > { %v1762_v51 = vmul.f32 %v2359_v29, %v1761_v19  ;;  %v1744_v39 = vmul.f32 %v1738_v45, %v2719_v14  ;;  %v1759_v54 = vsel %vm1758_vm3, %v2357_v53, %v1755_v59  ;;  %v2280_v53 = vld [vmem:[%s3166_s10] ss:$0 sm:$0xff] }
 0xaaa   : > { %v1790_v40 = vmul.f32 %v1759_v54, %v1722_v7 }
 0xaab   : > { %v1763_v37 = vmul.f32 0.5, %v1762_v51  ;;  %v1748_v48 = vadd.f32 1e-05, %v1744_v39 }
 0xaac   : > { %v1797_v62 = vmul.f32 %v2278_v57, %v1790_v40 }
 0xaad   : > { %v1764_v56 = vsub.f32 1.5, %v1763_v37  ;;  %2360 = vrsqrt.f32 %v1748_v48  ;;  %vm1776_vm8 = vweird.f32 %v1748_v48 }
 0xaae   : > { %v1804_v28 = vadd.f32 %v2279_v5, %v1797_v62 }
 0xaaf   : > { %v1765_v50 = vmul.f32 %v2359_v29, %v1764_v56 }
 0xab0   : > { %v1741_v60 = vpop.xlane.xlu0 %1740 }
 0xab1   : > { %v1769_v34 = vsel %vm1768_vm6, %v2359_v29, %v1765_v50  ;;  %v1745_v61 = vmul.f32 %v1741_v60, %v2719_v14  ;;  %v2184_v14 = vld [vmem:[%s3167_s11 + $0x28] sm:$0xff] }
 0xab2   : > { %v1791_v63 = vmul.f32 %v1769_v34, %v1723_v12  ;;  %1931 = vmatpush.bf16.msrb.mxu2 %v2184_v14 }
 0xab3   : > { %v2361_v0 = vpop.eup %2360  ;;  %v1749_v1 = vadd.f32 1e-05, %v1745_v61 }
 0xab4   : > { %v1798_v2 = vmul.f32 %v2278_v57, %v1791_v63  ;;  %v1771_v41 = vmul.f32 %v2361_v0, %v1748_v48  ;;  %vm1777_vm7 = vweird.f32 %v2361_v0  ;;  %v2281_v48 = vld [vmem:[%s3168_s12] ss:$0 sm:$0xff] }
 0xab5   : > { %2362 = vrsqrt.f32 %v1749_v1  ;;  %vm1778_vm9 = vmor %vm1776_vm8, %vm1777_vm7  ;;  %vm1786_vm11 = vweird.f32 %v1749_v1 }
 0xab6   : > { %v1805_v3 = vadd.f32 %v2279_v5, %v1798_v2  ;;  %v1772_v43 = vmul.f32 %v2361_v0, %v1771_v41  ;;  %1932 = vmatpush.bf16.msrb.mxu2 %v2183_v8 }
 0xab8   : > { %v1773_v7 = vmul.f32 0.5, %v1772_v43  ;;  %v1808_v9 = vpack.c.bf16 %v1805_v3, %v1804_v28 }
 0xaba   : > { %v1774_v10 = vsub.f32 1.5, %v1773_v7  ;;  %2136 = vmatmul.msk.bf16.vlgmr.msra.gmra.mxu1 %vm497_vm0, %v1808_v9  ;;  %1933 = vmatpush.bf16.msrb.mxu2 %v2182_v30 }
 0xabb   : > { %v2363_v11 = vpop.eup %2362 }
 0xabc   : > { %v1775_v12 = vmul.f32 %v2361_v0, %v1774_v10  ;;  %v1781_v13 = vmul.f32 %v2363_v11, %v1749_v1  ;;  %vm1787_vm10 = vweird.f32 %v2363_v11 }
 0xabd   : > { %vm1788_vm12 = vmor %vm1786_vm11, %vm1787_vm10 }
 0xabe   : > { %v1782_v15 = vmul.f32 %v2363_v11, %v1781_v13  ;;  %v1779_v16 = vsel %vm1778_vm9, %v2361_v0, %v1775_v12 }
 0xabf   : > { %v1792_v17 = vmul.f32 %v1779_v16, %v3060_v47  ;;  %v2181_v47 = vld [vmem:[%s3167_s11 + $0x10] sm:$0xff] }
 0xac0   : > { %v1783_v46 = vmul.f32 0.5, %v1782_v15  ;;  %1934 = vmatpush.bf16.msrb.mxu2 %v2181_v47 }
 0xac1   : > { %v1799_v23 = vmul.f32 %v2278_v57, %v1792_v17 }
 0xac2   : > { %v1784_v49 = vsub.f32 1.5, %v1783_v46 }
 0xac3   : > { %v1806_v25 = vadd.f32 %v2279_v5, %v1799_v23 }
 0xac4   : > { %v1785_v18 = vmul.f32 %v2363_v11, %v1784_v49 }
 0xac6   : > { %v1789_v20 = vsel %vm1788_vm12, %v2363_v11, %v1785_v18 }
 0xac7   : > { %v1793_v22 = vmul.f32 %v1789_v20, %v3067_v21  ;;  %v2180_v21 = vld [vmem:[%s3167_s11 + $0x8] sm:$0xff] }
 0xac8   : > { %1935 = vmatpush.bf16.msrb.mxu2 %v2180_v21 }
 0xac9   : > { %v1800_v24 = vmul.f32 %v2278_v57, %v1793_v22 }
 0xacb   : > { %v1807_v26 = vadd.f32 %v2279_v5, %v1800_v24 }
 0xacc   : > { %1936 = vmatpush.bf16.msrb.mxu2 %v2179_v44 }
 0xacd   : > { %v1809_v27 = vpack.c.bf16 %v1807_v26, %v1806_v25 }
 0xacf   : > { %2137 = vmatmul.msk.bf16.gmra.mxu1 %vm497_vm0, %v1809_v27 }
 0xb37   : > { %v1845_v52 = vpop.f32.mrf.mxu1 }
 0xb38   : > { %v1846_v31 = vadd.f32 %v2280_v53, %v1845_v52 }
 0xb3a   : > { %v1855_v35 = vmax.f32 %v1846_v31, 0.0 }
 0xb3f   : > { %v1847_v32 = vpop.f32.mrf.mxu1 }
 0xb40   : > { %v1848_v33 = vadd.f32 %v2280_v53, %v1847_v32 }
 0xb42   : > { %v1856_v36 = vmax.f32 %v1848_v33, 0.0 }
 0xb44   : > { %v1859_v29 = vpack.c.bf16 %v1856_v36, %v1855_v35 }
 0xb46   : > { %1937 = vmatmul.bf16.vlgmr.msrb.gmra.mxu2 %v1859_v29 }
 0xb4c   : > { %v1850_v59 = vpop.f32.mrf.mxu1 }
 0xb4d   : > { %v1851_v19 = vadd.f32 %v2280_v53, %v1850_v59 }
 0xb4f   : > { %v1857_v39 = vmax.f32 %v1851_v19, 0.0 }
 0xb54   : > { %v1852_v45 = vpop.f32.mrf.mxu1 }
 0xb55   : > { %v1853_v51 = vadd.f32 %v2280_v53, %v1852_v45 }
 0xb57   : > { %v1858_v54 = vmax.f32 %v1853_v51, 0.0 }
 0xb59   : > { %v1860_v37 = vpack.c.bf16 %v1858_v54, %v1857_v39 }
 0xb5b   : > { %1942 = vmatmul.bf16.gmra.mxu2 %v1860_v37 }
 0xbc9   : > { %v1938_v56 = vpop.f32.mrf.mxu2 }
 0xbca   : > { %v1939_v57 = vadd.f32 %v2281_v48, %v1938_v56 }
 0xbcc   : > { %v1948_v40 = vadd.f32 %v1939_v57, %v3031_v38 }
 0xbce   : > { %1952 = vst.msk [vmem:[%s482_s24] sm:$0xff] %vm497_vm0, %v1948_v40 }
 0xbd1   : > { %v1940_v50 = vpop.f32.mrf.mxu2 }
 0xbd2   : > { %v1941_v58 = vadd.f32 %v2281_v48, %v1940_v50 }
 0xbd4   : > { %v1949_v60 = vadd.f32 %v1941_v58, %v3036_v55 }
 0xbd6   : > { %1953 = vst.msk [vmem:[%s482_s24 + $0x8] sm:$0xff] %vm497_vm0, %v1949_v60 }
 0xbde   : > { %v1943_v34 = vpop.f32.mrf.mxu2 }
 0xbdf   : > { %v1944_v61 = vadd.f32 %v2281_v48, %v1943_v34 }
 0xbe1   : > { %v1950_v4 = vadd.f32 %v1944_v61, %v3043_v6 }
 0xbe3   : > { %1954 = vst.msk [vmem:[%s482_s24 + $0x10] sm:$0xff] %vm497_vm0, %v1950_v4 }
 0xbe6   : > { %v1945_v38 = vpop.f32.mrf.mxu2 }
 0xbe7   : > { %v1946_v5 = vadd.f32 %v2281_v48, %v1945_v38 }
 0xbe9   : > { %v1951_v55 = vadd.f32 %v1946_v5, %v3048_v42 }
 0xbeb   : > { %1955 = vst.msk [vmem:[%s482_s24 + $0x18] sm:$0xff] %vm497_vm0, %v1951_v55 }
 0xbec   : > { %2485 = shalt.err (!%p2482_p8)
}
 0xbed   : > { %s2547_s30 = smov 128   ;;  %s2548_s24 = smov 8  }
 0xbee   : > { %2200 = dma.vmem_to_hbm [thread:$0]  (%p2657_p5), %s1970_s5, 512, %s1972_s25, %s1957_s29, %s2547_s30, %s2547_s30, %s2548_s24  }
 0xbef PF: > { %s3186_s19 = sld [smem:[#allocation12_spill]]  ;;  %p2222_p9 = scmp.ge.s32.totalorder %s2528_s28, 2 }
 0xbf1   : > { %p2213_p10 = pnand %p2222_p9, %p2661_p6 }
 0xbf3   : > { %p2214_p11 = pneg %p2213_p10 }
 0xbf5   : > { %s1986_s27 = sand.u32 1, %s3186_s19  }
 0xbf6   : > { %s1987_s23 = scalar_lea.sflag [#allocation4], %s1986_s27 }
 0xbf7   : > { %2511 = dma.done.wait (%p2214_p11), %s1987_s23, 512  }
 0xbf8   : > { %2513 = vsyncadd (%p2214_p11), %s1987_s23, 4294966784  ;;  %s3188_s28 = sld [smem:[#allocation14_spill]]  ;;  %s3191_s25 = smov %s2520_s26 }
 0xbf9   : > { %s3189_s14 = sld [smem:[#allocation13_spill]] }
 0xbfa   : > { %s3190_s27 = sld [smem:[#allocation15_spill]] }
 0xbfe   : > { %p25_p12 = scmp.ge.s32.totalorder %s3188_s28, 4  }
 0xbff   : > { %s3192_s26 = smov %s3189_s14 }
 0xc00   :  { %27 = sbr.rel (!%p25_p12) target bundleno = 7 (0x7), region = 120 }
 0xc05   :  { %1993 = vsyncpa [#allocation3], 1 }
 0xc06   :  { %1995 = vsyncpa [#allocation3 + $0x1], 1 }
 0xc07   :  { %1996 = vsyncpa [#allocation6], 1 }
 0xc08   :  { %1997 = vsyncpa [#allocation4], 1 }
 0xc09   :  { %1999 = vsyncpa [#allocation4 + $0x1], 1 }

</bundles_post_ra>
